<compile_context>
chip_gen: v7x
topology: tpu7x:2x2x1
jax: 0.10.0
libtpu: 0.0.40
codegen_flags: <defaults>
</compile_context>

<pallas_src>
import jax
import jax.numpy as jnp
from jax.experimental import pallas as pl
from jax.experimental.pallas import tpu as pltpu

# ----- small FreeVC-style hyper-parameters -----
CHANNELS = 4          # coupling channels (split in half)
HIDDEN   = 16         # hidden_channels of the WN encoder
KERNEL   = 5          # kernel_size
DIL_RATE = 1          # dilation_rate
N_LAYERS = 2          # WN layers
N_FLOWS  = 4          # (ResidualCouplingLayer, Flip) pairs
GIN      = 8          # gin_channels (speaker conditioning)
B, T     = 2, 128     # T=128 -> time maps exactly to the 128-wide lane axis
HALF     = CHANNELS // 2
NTOT     = B * T
H2       = 2 * HIDDEN
POST_PAD = 16         # w_post/b_post (HALF rows) zero-padded to 16 rows (bf16 tile alignment)

# ---- static row offsets inside the packed weight / bias buffers (shared wrapper <-> kernel) ----
W_IN_ROWS   = N_LAYERS * KERNEL * H2                  # all dilated-conv taps, (2H, H) each
W_RS_ROWS   = (N_LAYERS - 1) * H2                     # res+skip convs of non-last layers
WH_PER_FLOW = W_IN_ROWS + W_RS_ROWS + HIDDEN + POST_PAD
B_PER_FLOW  = HIDDEN + (N_LAYERS - 1) * H2 + HIDDEN + POST_PAD


def _win_off(f, i, k):  return f * WH_PER_FLOW + (i * KERNEL + k) * H2
def _wrs_off(f, i):     return f * WH_PER_FLOW + W_IN_ROWS + i * H2
def _wskip_off(f):      return f * WH_PER_FLOW + W_IN_ROWS + W_RS_ROWS
def _wpost_off(f):      return _wskip_off(f) + HIDDEN

def _bpre_off(f):       return f * B_PER_FLOW
def _brs_off(f, i):     return f * B_PER_FLOW + HIDDEN + i * H2
def _bskip_off(f):      return f * B_PER_FLOW + HIDDEN + (N_LAYERS - 1) * H2
def _bpost_off(f):      return _bskip_off(f) + HIDDEN


# ---------------------------------------------------------------------------
# Fused Pallas kernel: the WHOLE flow stack, all flows + folded flips, all batch
# elements (batch folded into the lane axis), in one invocation.
# ---------------------------------------------------------------------------
def _flow_stack_kernel(x_ref, mask_ref, cond_ref, wpre_ref, wh_ref, b_ref, out_ref):
    mask = mask_ref[...]                                   # (1, NTOT)
    u = x_ref[:HALF, :]                                    # (HALF, NTOT)
    v = x_ref[HALF:, :]

    # per-lane time index within its batch element: conv edge / batch-boundary mask
    tmod = jax.lax.broadcasted_iota(jnp.int32, (HIDDEN, NTOT), 1) % T

    def bf(a):                                             # MXU operands in bf16, f32 accumulate
        return a.astype(jnp.bfloat16)

    for f in range(N_FLOWS):                               # static unroll: whole stack fused
        # ---- ResidualCouplingLayer.pre (1x1 conv over channels; flip folded into columns) ----
        wpre = wpre_ref[f * HIDDEN:(f + 1) * HIDDEN, :]                     # (H, HALF) bf16
        h = (jnp.dot(wpre, bf(u), preferred_element_type=jnp.float32)
             + b_ref[_bpre_off(f):_bpre_off(f) + HIDDEN, :]) * mask         # (H, NTOT)

        # ---- WN encoder ----
        skip = None
        for i in range(N_LAYERS):
            dil = DIL_RATE ** i
            pad = (KERNEL * dil - dil) // 2
            li = f * N_LAYERS + i
            # conditioning slab already holds WN cond_layer(g) + in_layers bias
            x_in = cond_ref[li * H2:(li + 1) * H2, :]                       # (2H, NTOT)

            # dilated "same" conv = K accumulated per-tap matmuls on time-shifted h
            for k in range(KERNEL):
                s = pad - k * dil                # static shift of this tap's contribution
                if s == 0:
                    hk = h
                else:
                    if s > 0:    # tap looks back in time: shift right, zero leading frames
                        hk = jnp.concatenate(
                            [jnp.zeros((HIDDEN, s), jnp.float32), h[:, :NTOT - s]], axis=1)
                        keep = tmod >= s
                    else:        # tap looks ahead: shift left, zero trailing frames
                        hk = jnp.concatenate(
                            [h[:, -s:], jnp.zeros((HIDDEN, -s), jnp.float32)], axis=1)
                        keep = tmod < T + s
                    hk = jnp.where(keep, hk, 0.0)          # also blocks cross-batch leakage
                wk = wh_ref[_win_off(f, i, k):_win_off(f, i, k) + H2, :]    # (2H, H) bf16
                x_in = x_in + jnp.dot(wk, bf(hk), preferred_element_type=jnp.float32)

            # fused_add_tanh_sigmoid_multiply (f32 -> EUP)
            acts = jnp.tanh(x_in[:HIDDEN, :]) * jax.nn.sigmoid(x_in[HIDDEN:, :])

            if i < N_LAYERS - 1:
                wrs = wh_ref[_wrs_off(f, i):_wrs_off(f, i) + H2, :]         # (2H, H)
                rs = (jnp.dot(wrs, bf(acts), preferred_element_type=jnp.float32)
                      + b_ref[_brs_off(f, i):_brs_off(f, i) + H2, :])
                h = (h + rs[:HIDDEN, :]) * mask
                contrib = rs[HIDDEN:, :]
            else:
                # last WN layer's res/skip conv only has the skip half of outputs
                wsk = wh_ref[_wskip_off(f):_wskip_off(f) + HIDDEN, :]       # (H, H)
                contrib = (jnp.dot(wsk, bf(acts), preferred_element_type=jnp.float32)
                           + b_ref[_bskip_off(f):_bskip_off(f) + HIDDEN, :])
            skip = contrib if skip is None else skip + contrib
        skip = skip * mask

        # ---- post (1x1 conv, mean_only=True => exp(logs)==1); flip folded into row order ----
        wpost = wh_ref[_wpost_off(f):_wpost_off(f) + POST_PAD, :]           # (16, H), rows>=HALF are 0
        m16 = (jnp.dot(wpost, bf(skip), preferred_element_type=jnp.float32)
               + b_ref[_bpost_off(f):_bpost_off(f) + POST_PAD, :]) * mask   # (16, NTOT)
        m = m16[:HALF, :]
        u, v = m + v * mask, u          # coupling update; half-swap == folded Flip()

    out_ref[...] = jnp.concatenate([u, v], axis=0)


# ---------------------------------------------------------------------------
# Wrapper: pack weights (flip folded in), pre-fold biases + cond_layer(g) into a
# conditioning slab, re-layout to lane-dense (C, B*T), call Pallas once (grid=()).
# ---------------------------------------------------------------------------
def residual_coupling_block_forward(x, x_mask, g, params):
    """ResidualCouplingBlock.forward(x, x_mask, g=g, reverse=False).
    x: (B, CHANNELS, T) NCT (PyTorch layout); x_mask: (B, 1, T); g: (B, GIN)."""
    wpre_l, wh_l, b_l, cond_l = [], [], [], []
    for f, p in enumerate(params):
        flip = (f % 2 == 1)   # accumulated Flip() parity, folded into the weights
        w_pre  = p['w_pre'][:, ::-1] if flip else p['w_pre']              # (H, HALF)
        w_post = p['w_post'][::-1, :] if flip else p['w_post']            # (HALF, H)
        b_post = p['b_post'][::-1]    if flip else p['b_post']            # (HALF,)

        wpre_l.append(w_pre)

        rows = []                                                          # packed in-dim-H weights
        for i in range(N_LAYERS):
            for k in range(KERNEL):
                rows.append(p['w_in'][i, :, :, k])                         # (2H, H)
        for i in range(N_LAYERS - 1):
            rows.append(p['w_rs'][i])                                      # (2H, H)
        rows.append(p['w_skip_last'])                                      # (H, H)
        rows.append(jnp.concatenate(
            [w_post, jnp.zeros((POST_PAD - HALF, HIDDEN), jnp.float32)], axis=0))  # (16, H)
        wh_l.append(jnp.concatenate(rows, axis=0))

        bs = [p['b_pre']]                                                  # packed biases
        for i in range(N_LAYERS - 1):
            bs.append(p['b_rs'][i])
        bs.append(p['b_skip_last'])
        bs.append(jnp.concatenate([b_post, jnp.zeros((POST_PAD - HALF,), jnp.float32)]))
        b_l.append(jnp.concatenate(bs))

        # WN cond_layer(g) (1x1 conv on the length-1 speaker embedding) + in_layers bias,
        # broadcast over each batch element's T frames -> rows of the conditioning slab.
        cg = (g @ p['w_cond'].T + p['b_cond']).reshape(B, N_LAYERS, H2)    # (B, NL, 2H)
        cg = cg + p['b_in'][None]
        cg = jnp.transpose(cg, (1, 2, 0))                                  # (NL, 2H, B)
        cg = jnp.broadcast_to(cg[..., None], (N_LAYERS, H2, B, T)).reshape(N_LAYERS * H2, NTOT)
        cond_l.append(cg)

    wpre_all = jnp.concatenate(wpre_l, axis=0).astype(jnp.bfloat16)        # (NF*H, HALF)
    wh_all   = jnp.concatenate(wh_l, axis=0).astype(jnp.bfloat16)          # (NF*WH_PER_FLOW, H)
    b_all    = jnp.concatenate(b_l)[:, None]                               # (NF*B_PER_FLOW, 1)
    cond_all = jnp.concatenate(cond_l, axis=0)                             # (NF*NL*2H, B*T)

    # lane-dense channel-major layout: (C, B*T)
    x2    = jnp.transpose(x, (1, 0, 2)).reshape(CHANNELS, NTOT)
    mask2 = jnp.transpose(x_mask, (1, 0, 2)).reshape(1, NTOT)

    vmem = pl.BlockSpec(memory_space=pltpu.MemorySpace.VMEM)   # whole-array blocks, no grid
    out2 = pl.pallas_call(
        _flow_stack_kernel,
        out_shape=jax.ShapeDtypeStruct((CHANNELS, NTOT), jnp.float32),
        in_specs=[vmem] * 6,
        out_specs=vmem,
    )(x2, mask2, cond_all, wpre_all, wh_all, b_all)

    out = out2.reshape(CHANNELS, B, T).transpose(1, 0, 2)                  # back to NCT
    if N_FLOWS % 2 == 1:
        # odd flow count only: undo the residual within-half reversal left by the folded Flip
        out = jnp.concatenate([out[:, HALF - 1::-1, :], out[:, :HALF - 1:-1, :]], axis=1)
    return out


# ---------------------------------------------------------------------------
# Deterministic parameter init (weight_norm at init == plain weights; dropout p=0).
# ---------------------------------------------------------------------------
def init_params(key):
    params = []
    for f in range(N_FLOWS):
        ks = jax.random.split(jax.random.fold_in(key, f), 12)
        sc = 0.1
        p = dict(
            w_pre=sc * jax.random.normal(ks[0], (HIDDEN, HALF), jnp.float32),
            b_pre=sc * jax.random.normal(ks[1], (HIDDEN,), jnp.float32),
            # WN in_layers: dilated Conv1d weights, (layer, out=2H, in=H, tap)
            w_in=sc * jax.random.normal(ks[2], (N_LAYERS, H2, HIDDEN, KERNEL), jnp.float32),
            b_in=sc * jax.random.normal(ks[3], (N_LAYERS, H2), jnp.float32),
            # res/skip 1x1 convs for layers 0..n_layers-2 (res + skip halves)
            w_rs=sc * jax.random.normal(ks[4], (N_LAYERS - 1, H2, HIDDEN), jnp.float32),
            b_rs=sc * jax.random.normal(ks[5], (N_LAYERS - 1, H2), jnp.float32),
            # last layer's res/skip conv has only HIDDEN (skip) outputs in PyTorch
            w_skip_last=sc * jax.random.normal(ks[6], (HIDDEN, HIDDEN), jnp.float32),
            b_skip_last=sc * jax.random.normal(ks[7], (HIDDEN,), jnp.float32),
            # NOTE: PyTorch zero-inits the post conv; random here so the coupling path is
            # actually exercised by the correctness check.
            w_post=sc * jax.random.normal(ks[8], (HALF, HIDDEN), jnp.float32),
            b_post=sc * jax.random.normal(ks[9], (HALF,), jnp.float32),
            # WN cond_layer: 1x1 conv gin -> 2H*NL
            w_cond=sc * jax.random.normal(ks[10], (N_LAYERS * H2, GIN), jnp.float32),
            b_cond=sc * jax.random.normal(ks[11], (N_LAYERS * H2,), jnp.float32),
        )
        params.append(p)
    return params


# ---------------------------------------------------------------------------
# Plain-JAX reference (explicit flips, per-tap conv, same bf16-in/f32-acc matmuls).
# ---------------------------------------------------------------------------
def _bdot(w, x):
    # (out,in) x (B,in,T) -> (B,out,T); bf16 MXU inputs / f32 accumulation (matches kernel)
    return jnp.einsum('oi,bit->bot', w.astype(jnp.bfloat16), x.astype(jnp.bfloat16),
                      preferred_element_type=jnp.float32)


def _reference_coupling_layer(x, x_mask, g, p):
    x0, x1 = x[:, :HALF, :], x[:, HALF:, :]
    h = (_bdot(p['w_pre'], x0) + p['b_pre'][None, :, None]) * x_mask
    cond = (g @ p['w_cond'].T + p['b_cond']).reshape(B, N_LAYERS, H2)
    skip = jnp.zeros((B, HIDDEN, T), jnp.float32)
    for i in range(N_LAYERS):
        dil = DIL_RATE ** i
        pad = (KERNEL * dil - dil) // 2
        hp = jnp.pad(h, ((0, 0), (0, 0), (pad, pad)))
        x_in = cond[:, i, :, None] + p['b_in'][i][None, :, None]
        for k in range(KERNEL):
            x_in = x_in + _bdot(p['w_in'][i, :, :, k], hp[:, :, k * dil:k * dil + T])
        acts = jnp.tanh(x_in[:, :HIDDEN, :]) * jax.nn.sigmoid(x_in[:, HIDDEN:, :])
        if i < N_LAYERS - 1:
            rs = _bdot(p['w_rs'][i], acts) + p['b_rs'][i][None, :, None]
            h = (h + rs[:, :HIDDEN, :]) * x_mask
            skip = skip + rs[:, HIDDEN:, :]
        else:
            skip = skip + _bdot(p['w_skip_last'], acts) + p['b_skip_last'][None, :, None]
    skip = skip * x_mask
    m = (_bdot(p['w_post'], skip) + p['b_post'][None, :, None]) * x_mask
    return jnp.concatenate([x0, m + x1 * x_mask], axis=1)


def _reference_block(x, x_mask, g, params):
    for p in params:
        x = _reference_coupling_layer(x, x_mask, g, p)
        x = x[:, ::-1, :]    # Flip(): torch.flip(x, [1]) on the channel axis
    return x


if __name__ == "__main__":
    key = jax.random.PRNGKey(0)
    kx, kg, kp = jax.random.split(key, 3)

    x = jax.random.normal(kx, (B, CHANNELS, T), jnp.float32)               # NCT (PyTorch layout)
    lengths = jnp.array([T, T - 37])
    x_mask = (jnp.arange(T)[None, :] < lengths[:, None]).astype(jnp.float32)[:, None, :]  # (B,1,T)
    g = jax.random.normal(kg, (B, GIN), jnp.float32)                       # speaker embedding

    params = init_params(kp)

    fwd = jax.jit(residual_coupling_block_forward)
    out = jax.block_until_ready(fwd(x, x_mask, g, params))

    ref = _reference_block(x, x_mask, g, params)
    assert out.shape == (B, CHANNELS, T)
    err = jnp.max(jnp.abs(out - ref))
    assert jnp.allclose(out, ref, atol=2e-3, rtol=2e-3), \
        f"Pallas output mismatch vs JAX reference (max_err={err})"

    print("KERNEL_OK")
</pallas_src>

<mosaic_0001>
module attributes {stable_mosaic.version = 11 : i64} {
  func.func @_flow_stack_kernel(%arg0: memref<4x256xf32, #tpu.memory_space<vmem>>, %arg1: memref<1x256xf32, #tpu.memory_space<vmem>>, %arg2: memref<256x256xf32, #tpu.memory_space<vmem>>, %arg3: memref<64x2xbf16, #tpu.memory_space<vmem>>, %arg4: memref<1536x16xbf16, #tpu.memory_space<vmem>>, %arg5: memref<320x1xf32, #tpu.memory_space<vmem>>, %arg6: memref<4x256xf32, #tpu.memory_space<vmem>>) attributes {dimension_semantics = [], scalar_prefetch = 0 : i64, scratch_operands = 0 : i64, tpu.core_type = #tpu.core_type<tc>} {
    %c0 = arith.constant 0 : index
    %c0_0 = arith.constant 0 : index
    %0 = vector.load %arg1[%c0, %c0_0] : memref<1x256xf32, #tpu.memory_space<vmem>>, vector<1x256xf32>
    %c0_1 = arith.constant 0 : index
    %c0_2 = arith.constant 0 : index
    %1 = vector.load %arg0[%c0_1, %c0_2] : memref<4x256xf32, #tpu.memory_space<vmem>>, vector<2x256xf32>
    %c2 = arith.constant 2 : index
    %c0_3 = arith.constant 0 : index
    %2 = vector.load %arg0[%c2, %c0_3] : memref<4x256xf32, #tpu.memory_space<vmem>>, vector<2x256xf32>
    %3 = tpu.iota {dimensions = array<i32: 1>} : vector<16x256xi32>
    %c128_i32 = arith.constant 128 : i32
    %c0_i32 = arith.constant 0 : i32
    %4 = arith.cmpi eq, %c128_i32, %c0_i32 : i32
    %c1_i32 = arith.constant 1 : i32
    %5 = arith.select %4, %c1_i32, %c128_i32 : i32
    %6 = vector.broadcast %5 : i32 to vector<16x256xi32>
    %7 = arith.remsi %3, %6 : vector<16x256xi32>
    %c0_i32_4 = arith.constant 0 : i32
    %8 = vector.broadcast %c0_i32_4 : i32 to vector<16x256xi32>
    %9 = arith.cmpi ne, %7, %8 : vector<16x256xi32>
    %c0_i32_5 = arith.constant 0 : i32
    %10 = vector.broadcast %c0_i32_5 : i32 to vector<16x256xi32>
    %11 = arith.cmpi slt, %7, %10 : vector<16x256xi32>
    %c0_i32_6 = arith.constant 0 : i32
    %12 = arith.cmpi slt, %5, %c0_i32_6 : i32
    %13 = vector.broadcast %12 : i1 to vector<16x256xi1>
    %14 = vector.broadcast %13 : vector<16x256xi1> to vector<16x256xi1>
    %15 = arith.xori %11, %14 : vector<16x256xi1>
    %16 = arith.andi %15, %9 : vector<16x256xi1>
    %17 = vector.broadcast %5 : i32 to vector<16x256xi32>
    %18 = arith.addi %7, %17 : vector<16x256xi32>
    %19 = arith.select %16, %18, %7 : vector<16x256xi1>, vector<16x256xi32>
    %c0_7 = arith.constant 0 : index
    %c0_8 = arith.constant 0 : index
    %20 = vector.load %arg3[%c0_7, %c0_8] : memref<64x2xbf16, #tpu.memory_space<vmem>>, vector<16x2xbf16>
    %21 = arith.truncf %1 : vector<2x256xf32> to vector<2x256xbf16>
    %cst = arith.constant dense<0.000000e+00> : vector<16x256xf32>
    %22 = tpu.matmul %20, %21, %cst {dimension_numbers = #tpu.dot_dimension_numbers<[1], [0], [0], [1], [0, 0, 1, 1], [], []>} : vector<16x2xbf16>, vector<2x256xbf16>, vector<16x256xf32> -> vector<16x256xf32>
    %c0_9 = arith.constant 0 : index
    %c0_10 = arith.constant 0 : index
    %23 = vector.load %arg5[%c0_9, %c0_10] : memref<320x1xf32, #tpu.memory_space<vmem>>, vector<16x1xf32>
    %24 = vector.broadcast %23 : vector<16x1xf32> to vector<16x256xf32>
    %25 = arith.addf %22, %24 : vector<16x256xf32>
    %26 = vector.broadcast %0 : vector<1x256xf32> to vector<16x256xf32>
    %27 = arith.mulf %25, %26 : vector<16x256xf32>
    %c0_11 = arith.constant 0 : index
    %c0_12 = arith.constant 0 : index
    %28 = vector.load %arg2[%c0_11, %c0_12] : memref<256x256xf32, #tpu.memory_space<vmem>>, vector<32x256xf32>
    %cst_13 = arith.constant 0.000000e+00 : f32
    %29 = vector.broadcast %cst_13 : f32 to vector<16x2xf32>
    %30 = vector.extract_strided_slice %27 {offsets = [0, 0], sizes = [16, 254], strides = [1, 1]} : vector<16x256xf32> to vector<16x254xf32>
    %31 = tpu.concatenate %29, %30 in 1 : vector<16x2xf32>, vector<16x254xf32> -> vector<16x256xf32>
    %c2_i32 = arith.constant 2 : i32
    %32 = vector.broadcast %c2_i32 : i32 to vector<16x256xi32>
    %33 = arith.cmpi sge, %19, %32 : vector<16x256xi32>
    %cst_14 = arith.constant 0.000000e+00 : f32
    %34 = vector.broadcast %cst_14 : f32 to vector<16x256xf32>
    %35 = arith.select %33, %31, %34 : vector<16x256xi1>, vector<16x256xf32>
    %c0_15 = arith.constant 0 : index
    %c0_16 = arith.constant 0 : index
    %36 = vector.load %arg4[%c0_15, %c0_16] : memref<1536x16xbf16, #tpu.memory_space<vmem>>, vector<32x16xbf16>
    %37 = arith.truncf %35 : vector<16x256xf32> to vector<16x256xbf16>
    %cst_17 = arith.constant dense<0.000000e+00> : vector<32x256xf32>
    %38 = tpu.matmul %36, %37, %cst_17 {dimension_numbers = #tpu.dot_dimension_numbers<[1], [0], [0], [1], [0, 0, 1, 1], [], []>} : vector<32x16xbf16>, vector<16x256xbf16>, vector<32x256xf32> -> vector<32x256xf32>
    %39 = arith.addf %28, %38 : vector<32x256xf32>
    %cst_18 = arith.constant 0.000000e+00 : f32
    %40 = vector.broadcast %cst_18 : f32 to vector<16x1xf32>
    %41 = vector.extract_strided_slice %27 {offsets = [0, 0], sizes = [16, 255], strides = [1, 1]} : vector<16x256xf32> to vector<16x255xf32>
    %42 = tpu.concatenate %40, %41 in 1 : vector<16x1xf32>, vector<16x255xf32> -> vector<16x256xf32>
    %c1_i32_19 = arith.constant 1 : i32
    %43 = vector.broadcast %c1_i32_19 : i32 to vector<16x256xi32>
    %44 = arith.cmpi sge, %19, %43 : vector<16x256xi32>
    %cst_20 = arith.constant 0.000000e+00 : f32
    %45 = vector.broadcast %cst_20 : f32 to vector<16x256xf32>
    %46 = arith.select %44, %42, %45 : vector<16x256xi1>, vector<16x256xf32>
    %c32 = arith.constant 32 : index
    %c0_21 = arith.constant 0 : index
    %47 = vector.load %arg4[%c32, %c0_21] : memref<1536x16xbf16, #tpu.memory_space<vmem>>, vector<32x16xbf16>
    %48 = arith.truncf %46 : vector<16x256xf32> to vector<16x256xbf16>
    %cst_22 = arith.constant dense<0.000000e+00> : vector<32x256xf32>
    %49 = tpu.matmul %47, %48, %cst_22 {dimension_numbers = #tpu.dot_dimension_numbers<[1], [0], [0], [1], [0, 0, 1, 1], [], []>} : vector<32x16xbf16>, vector<16x256xbf16>, vector<32x256xf32> -> vector<32x256xf32>
    %50 = arith.addf %39, %49 : vector<32x256xf32>
    %c64 = arith.constant 64 : index
    %c0_23 = arith.constant 0 : index
    %51 = vector.load %arg4[%c64, %c0_23] : memref<1536x16xbf16, #tpu.memory_space<vmem>>, vector<32x16xbf16>
    %52 = arith.truncf %27 : vector<16x256xf32> to vector<16x256xbf16>
    %cst_24 = arith.constant dense<0.000000e+00> : vector<32x256xf32>
    %53 = tpu.matmul %51, %52, %cst_24 {dimension_numbers = #tpu.dot_dimension_numbers<[1], [0], [0], [1], [0, 0, 1, 1], [], []>} : vector<32x16xbf16>, vector<16x256xbf16>, vector<32x256xf32> -> vector<32x256xf32>
    %54 = arith.addf %50, %53 : vector<32x256xf32>
    %55 = vector.extract_strided_slice %27 {offsets = [0, 1], sizes = [16, 255], strides = [1, 1]} : vector<16x256xf32> to vector<16x255xf32>
    %cst_25 = arith.constant 0.000000e+00 : f32
    %56 = vector.broadcast %cst_25 : f32 to vector<16x1xf32>
    %57 = tpu.concatenate %55, %56 in 1 : vector<16x255xf32>, vector<16x1xf32> -> vector<16x256xf32>
    %c127_i32 = arith.constant 127 : i32
    %58 = vector.broadcast %c127_i32 : i32 to vector<16x256xi32>
    %59 = arith.cmpi slt, %19, %58 : vector<16x256xi32>
    %cst_26 = arith.constant 0.000000e+00 : f32
    %60 = vector.broadcast %cst_26 : f32 to vector<16x256xf32>
    %61 = arith.select %59, %57, %60 : vector<16x256xi1>, vector<16x256xf32>
    %c96 = arith.constant 96 : index
    %c0_27 = arith.constant 0 : index
    %62 = vector.load %arg4[%c96, %c0_27] : memref<1536x16xbf16, #tpu.memory_space<vmem>>, vector<32x16xbf16>
    %63 = arith.truncf %61 : vector<16x256xf32> to vector<16x256xbf16>
    %cst_28 = arith.constant dense<0.000000e+00> : vector<32x256xf32>
    %64 = tpu.matmul %62, %63, %cst_28 {dimension_numbers = #tpu.dot_dimension_numbers<[1], [0], [0], [1], [0, 0, 1, 1], [], []>} : vector<32x16xbf16>, vector<16x256xbf16>, vector<32x256xf32> -> vector<32x256xf32>
    %65 = arith.addf %54, %64 : vector<32x256xf32>
    %66 = vector.extract_strided_slice %27 {offsets = [0, 2], sizes = [16, 254], strides = [1, 1]} : vector<16x256xf32> to vector<16x254xf32>
    %cst_29 = arith.constant 0.000000e+00 : f32
    %67 = vector.broadcast %cst_29 : f32 to vector<16x2xf32>
    %68 = tpu.concatenate %66, %67 in 1 : vector<16x254xf32>, vector<16x2xf32> -> vector<16x256xf32>
    %c126_i32 = arith.constant 126 : i32
    %69 = vector.broadcast %c126_i32 : i32 to vector<16x256xi32>
    %70 = arith.cmpi slt, %19, %69 : vector<16x256xi32>
    %cst_30 = arith.constant 0.000000e+00 : f32
    %71 = vector.broadcast %cst_30 : f32 to vector<16x256xf32>
    %72 = arith.select %70, %68, %71 : vector<16x256xi1>, vector<16x256xf32>
    %c128 = arith.constant 128 : index
    %c0_31 = arith.constant 0 : index
    %73 = vector.load %arg4[%c128, %c0_31] : memref<1536x16xbf16, #tpu.memory_space<vmem>>, vector<32x16xbf16>
    %74 = arith.truncf %72 : vector<16x256xf32> to vector<16x256xbf16>
    %cst_32 = arith.constant dense<0.000000e+00> : vector<32x256xf32>
    %75 = tpu.matmul %73, %74, %cst_32 {dimension_numbers = #tpu.dot_dimension_numbers<[1], [0], [0], [1], [0, 0, 1, 1], [], []>} : vector<32x16xbf16>, vector<16x256xbf16>, vector<32x256xf32> -> vector<32x256xf32>
    %76 = arith.addf %65, %75 : vector<32x256xf32>
    %77 = vector.extract_strided_slice %76 {offsets = [0, 0], sizes = [16, 256], strides = [1, 1]} : vector<32x256xf32> to vector<16x256xf32>
    %78 = math.tanh %77 : vector<16x256xf32>
    %79 = vector.extract_strided_slice %76 {offsets = [16, 0], sizes = [16, 256], strides = [1, 1]} : vector<32x256xf32> to vector<16x256xf32>
    %80 = arith.negf %79 : vector<16x256xf32>
    %81 = math.exp %80 : vector<16x256xf32>
    %cst_33 = arith.constant 1.000000e+00 : f32
    %82 = vector.broadcast %cst_33 : f32 to vector<16x256xf32>
    %83 = arith.addf %82, %81 : vector<16x256xf32>
    %84 = arith.divf %82, %83 : vector<16x256xf32>
    %85 = arith.mulf %78, %84 : vector<16x256xf32>
    %c320 = arith.constant 320 : index
    %c0_34 = arith.constant 0 : index
    %86 = vector.load %arg4[%c320, %c0_34] : memref<1536x16xbf16, #tpu.memory_space<vmem>>, vector<32x16xbf16>
    %87 = arith.truncf %85 : vector<16x256xf32> to vector<16x256xbf16>
    %cst_35 = arith.constant dense<0.000000e+00> : vector<32x256xf32>
    %88 = tpu.matmul %86, %87, %cst_35 {dimension_numbers = #tpu.dot_dimension_numbers<[1], [0], [0], [1], [0, 0, 1, 1], [], []>} : vector<32x16xbf16>, vector<16x256xbf16>, vector<32x256xf32> -> vector<32x256xf32>
    %c16 = arith.constant 16 : index
    %c0_36 = arith.constant 0 : index
    %89 = vector.load %arg5[%c16, %c0_36] : memref<320x1xf32, #tpu.memory_space<vmem>>, vector<32x1xf32>
    %90 = vector.broadcast %89 : vector<32x1xf32> to vector<32x256xf32>
    %91 = arith.addf %88, %90 : vector<32x256xf32>
    %92 = vector.extract_strided_slice %91 {offsets = [0, 0], sizes = [16, 256], strides = [1, 1]} : vector<32x256xf32> to vector<16x256xf32>
    %93 = arith.addf %27, %92 : vector<16x256xf32>
    %94 = vector.broadcast %0 : vector<1x256xf32> to vector<16x256xf32>
    %95 = arith.mulf %93, %94 : vector<16x256xf32>
    %96 = vector.extract_strided_slice %91 {offsets = [16, 0], sizes = [16, 256], strides = [1, 1]} : vector<32x256xf32> to vector<16x256xf32>
    %c32_37 = arith.constant 32 : index
    %c0_38 = arith.constant 0 : index
    %97 = vector.load %arg2[%c32_37, %c0_38] : memref<256x256xf32, #tpu.memory_space<vmem>>, vector<32x256xf32>
    %cst_39 = arith.constant 0.000000e+00 : f32
    %98 = vector.broadcast %cst_39 : f32 to vector<16x2xf32>
    %99 = vector.extract_strided_slice %95 {offsets = [0, 0], sizes = [16, 254], strides = [1, 1]} : vector<16x256xf32> to vector<16x254xf32>
    %100 = tpu.concatenate %98, %99 in 1 : vector<16x2xf32>, vector<16x254xf32> -> vector<16x256xf32>
    %c2_i32_40 = arith.constant 2 : i32
    %101 = vector.broadcast %c2_i32_40 : i32 to vector<16x256xi32>
    %102 = arith.cmpi sge, %19, %101 : vector<16x256xi32>
    %cst_41 = arith.constant 0.000000e+00 : f32
    %103 = vector.broadcast %cst_41 : f32 to vector<16x256xf32>
    %104 = arith.select %102, %100, %103 : vector<16x256xi1>, vector<16x256xf32>
    %c160 = arith.constant 160 : index
    %c0_42 = arith.constant 0 : index
    %105 = vector.load %arg4[%c160, %c0_42] : memref<1536x16xbf16, #tpu.memory_space<vmem>>, vector<32x16xbf16>
    %106 = arith.truncf %104 : vector<16x256xf32> to vector<16x256xbf16>
    %cst_43 = arith.constant dense<0.000000e+00> : vector<32x256xf32>
    %107 = tpu.matmul %105, %106, %cst_43 {dimension_numbers = #tpu.dot_dimension_numbers<[1], [0], [0], [1], [0, 0, 1, 1], [], []>} : vector<32x16xbf16>, vector<16x256xbf16>, vector<32x256xf32> -> vector<32x256xf32>
    %108 = arith.addf %97, %107 : vector<32x256xf32>
    %cst_44 = arith.constant 0.000000e+00 : f32
    %109 = vector.broadcast %cst_44 : f32 to vector<16x1xf32>
    %110 = vector.extract_strided_slice %95 {offsets = [0, 0], sizes = [16, 255], strides = [1, 1]} : vector<16x256xf32> to vector<16x255xf32>
    %111 = tpu.concatenate %109, %110 in 1 : vector<16x1xf32>, vector<16x255xf32> -> vector<16x256xf32>
    %c1_i32_45 = arith.constant 1 : i32
    %112 = vector.broadcast %c1_i32_45 : i32 to vector<16x256xi32>
    %113 = arith.cmpi sge, %19, %112 : vector<16x256xi32>
    %cst_46 = arith.constant 0.000000e+00 : f32
    %114 = vector.broadcast %cst_46 : f32 to vector<16x256xf32>
    %115 = arith.select %113, %111, %114 : vector<16x256xi1>, vector<16x256xf32>
    %c192 = arith.constant 192 : index
    %c0_47 = arith.constant 0 : index
    %116 = vector.load %arg4[%c192, %c0_47] : memref<1536x16xbf16, #tpu.memory_space<vmem>>, vector<32x16xbf16>
    %117 = arith.truncf %115 : vector<16x256xf32> to vector<16x256xbf16>
    %cst_48 = arith.constant dense<0.000000e+00> : vector<32x256xf32>
    %118 = tpu.matmul %116, %117, %cst_48 {dimension_numbers = #tpu.dot_dimension_numbers<[1], [0], [0], [1], [0, 0, 1, 1], [], []>} : vector<32x16xbf16>, vector<16x256xbf16>, vector<32x256xf32> -> vector<32x256xf32>
    %119 = arith.addf %108, %118 : vector<32x256xf32>
    %c224 = arith.constant 224 : index
    %c0_49 = arith.constant 0 : index
    %120 = vector.load %arg4[%c224, %c0_49] : memref<1536x16xbf16, #tpu.memory_space<vmem>>, vector<32x16xbf16>
    %121 = arith.truncf %95 : vector<16x256xf32> to vector<16x256xbf16>
    %cst_50 = arith.constant dense<0.000000e+00> : vector<32x256xf32>
    %122 = tpu.matmul %120, %121, %cst_50 {dimension_numbers = #tpu.dot_dimension_numbers<[1], [0], [0], [1], [0, 0, 1, 1], [], []>} : vector<32x16xbf16>, vector<16x256xbf16>, vector<32x256xf32> -> vector<32x256xf32>
    %123 = arith.addf %119, %122 : vector<32x256xf32>
    %124 = vector.extract_strided_slice %95 {offsets = [0, 1], sizes = [16, 255], strides = [1, 1]} : vector<16x256xf32> to vector<16x255xf32>
    %cst_51 = arith.constant 0.000000e+00 : f32
    %125 = vector.broadcast %cst_51 : f32 to vector<16x1xf32>
    %126 = tpu.concatenate %124, %125 in 1 : vector<16x255xf32>, vector<16x1xf32> -> vector<16x256xf32>
    %c127_i32_52 = arith.constant 127 : i32
    %127 = vector.broadcast %c127_i32_52 : i32 to vector<16x256xi32>
    %128 = arith.cmpi slt, %19, %127 : vector<16x256xi32>
    %cst_53 = arith.constant 0.000000e+00 : f32
    %129 = vector.broadcast %cst_53 : f32 to vector<16x256xf32>
    %130 = arith.select %128, %126, %129 : vector<16x256xi1>, vector<16x256xf32>
    %c256 = arith.constant 256 : index
    %c0_54 = arith.constant 0 : index
    %131 = vector.load %arg4[%c256, %c0_54] : memref<1536x16xbf16, #tpu.memory_space<vmem>>, vector<32x16xbf16>
    %132 = arith.truncf %130 : vector<16x256xf32> to vector<16x256xbf16>
    %cst_55 = arith.constant dense<0.000000e+00> : vector<32x256xf32>
    %133 = tpu.matmul %131, %132, %cst_55 {dimension_numbers = #tpu.dot_dimension_numbers<[1], [0], [0], [1], [0, 0, 1, 1], [], []>} : vector<32x16xbf16>, vector<16x256xbf16>, vector<32x256xf32> -> vector<32x256xf32>
    %134 = arith.addf %123, %133 : vector<32x256xf32>
    %135 = vector.extract_strided_slice %95 {offsets = [0, 2], sizes = [16, 254], strides = [1, 1]} : vector<16x256xf32> to vector<16x254xf32>
    %cst_56 = arith.constant 0.000000e+00 : f32
    %136 = vector.broadcast %cst_56 : f32 to vector<16x2xf32>
    %137 = tpu.concatenate %135, %136 in 1 : vector<16x254xf32>, vector<16x2xf32> -> vector<16x256xf32>
    %c126_i32_57 = arith.constant 126 : i32
    %138 = vector.broadcast %c126_i32_57 : i32 to vector<16x256xi32>
    %139 = arith.cmpi slt, %19, %138 : vector<16x256xi32>
    %cst_58 = arith.constant 0.000000e+00 : f32
    %140 = vector.broadcast %cst_58 : f32 to vector<16x256xf32>
    %141 = arith.select %139, %137, %140 : vector<16x256xi1>, vector<16x256xf32>
    %c288 = arith.constant 288 : index
    %c0_59 = arith.constant 0 : index
    %142 = vector.load %arg4[%c288, %c0_59] : memref<1536x16xbf16, #tpu.memory_space<vmem>>, vector<32x16xbf16>
    %143 = arith.truncf %141 : vector<16x256xf32> to vector<16x256xbf16>
    %cst_60 = arith.constant dense<0.000000e+00> : vector<32x256xf32>
    %144 = tpu.matmul %142, %143, %cst_60 {dimension_numbers = #tpu.dot_dimension_numbers<[1], [0], [0], [1], [0, 0, 1, 1], [], []>} : vector<32x16xbf16>, vector<16x256xbf16>, vector<32x256xf32> -> vector<32x256xf32>
    %145 = arith.addf %134, %144 : vector<32x256xf32>
    %146 = vector.extract_strided_slice %145 {offsets = [0, 0], sizes = [16, 256], strides = [1, 1]} : vector<32x256xf32> to vector<16x256xf32>
    %147 = math.tanh %146 : vector<16x256xf32>
    %148 = vector.extract_strided_slice %145 {offsets = [16, 0], sizes = [16, 256], strides = [1, 1]} : vector<32x256xf32> to vector<16x256xf32>
    %149 = arith.negf %148 : vector<16x256xf32>
    %150 = math.exp %149 : vector<16x256xf32>
    %cst_61 = arith.constant 1.000000e+00 : f32
    %151 = vector.broadcast %cst_61 : f32 to vector<16x256xf32>
    %152 = arith.addf %151, %150 : vector<16x256xf32>
    %153 = arith.divf %151, %152 : vector<16x256xf32>
    %154 = arith.mulf %147, %153 : vector<16x256xf32>
    %c352 = arith.constant 352 : index
    %c0_62 = arith.constant 0 : index
    %155 = vector.load %arg4[%c352, %c0_62] : memref<1536x16xbf16, #tpu.memory_space<vmem>>, vector<16x16xbf16>
    %156 = arith.truncf %154 : vector<16x256xf32> to vector<16x256xbf16>
    %cst_63 = arith.constant dense<0.000000e+00> : vector<16x256xf32>
    %157 = tpu.matmul %155, %156, %cst_63 {dimension_numbers = #tpu.dot_dimension_numbers<[1], [0], [0], [1], [0, 0, 1, 1], [], []>} : vector<16x16xbf16>, vector<16x256xbf16>, vector<16x256xf32> -> vector<16x256xf32>
    %c48 = arith.constant 48 : index
    %c0_64 = arith.constant 0 : index
    %158 = vector.load %arg5[%c48, %c0_64] : memref<320x1xf32, #tpu.memory_space<vmem>>, vector<16x1xf32>
    %159 = vector.broadcast %158 : vector<16x1xf32> to vector<16x256xf32>
    %160 = arith.addf %157, %159 : vector<16x256xf32>
    %161 = arith.addf %96, %160 : vector<16x256xf32>
    %162 = vector.broadcast %0 : vector<1x256xf32> to vector<16x256xf32>
    %163 = arith.mulf %161, %162 : vector<16x256xf32>
    %c368 = arith.constant 368 : index
    %c0_65 = arith.constant 0 : index
    %164 = vector.load %arg4[%c368, %c0_65] : memref<1536x16xbf16, #tpu.memory_space<vmem>>, vector<16x16xbf16>
    %165 = arith.truncf %163 : vector<16x256xf32> to vector<16x256xbf16>
    %cst_66 = arith.constant dense<0.000000e+00> : vector<16x256xf32>
    %166 = tpu.matmul %164, %165, %cst_66 {dimension_numbers = #tpu.dot_dimension_numbers<[1], [0], [0], [1], [0, 0, 1, 1], [], []>} : vector<16x16xbf16>, vector<16x256xbf16>, vector<16x256xf32> -> vector<16x256xf32>
    %c64_67 = arith.constant 64 : index
    %c0_68 = arith.constant 0 : index
    %167 = vector.load %arg5[%c64_67, %c0_68] : memref<320x1xf32, #tpu.memory_space<vmem>>, vector<16x1xf32>
    %168 = vector.broadcast %167 : vector<16x1xf32> to vector<16x256xf32>
    %169 = arith.addf %166, %168 : vector<16x256xf32>
    %170 = vector.broadcast %0 : vector<1x256xf32> to vector<16x256xf32>
    %171 = arith.mulf %169, %170 : vector<16x256xf32>
    %172 = vector.extract_strided_slice %171 {offsets = [0, 0], sizes = [2, 256], strides = [1, 1]} : vector<16x256xf32> to vector<2x256xf32>
    %173 = vector.broadcast %0 : vector<1x256xf32> to vector<2x256xf32>
    %174 = arith.mulf %2, %173 : vector<2x256xf32>
    %175 = arith.addf %172, %174 : vector<2x256xf32>
    %c16_69 = arith.constant 16 : index
    %c0_70 = arith.constant 0 : index
    %176 = vector.load %arg3[%c16_69, %c0_70] : memref<64x2xbf16, #tpu.memory_space<vmem>>, vector<16x2xbf16>
    %177 = arith.truncf %175 : vector<2x256xf32> to vector<2x256xbf16>
    %cst_71 = arith.constant dense<0.000000e+00> : vector<16x256xf32>
    %178 = tpu.matmul %176, %177, %cst_71 {dimension_numbers = #tpu.dot_dimension_numbers<[1], [0], [0], [1], [0, 0, 1, 1], [], []>} : vector<16x2xbf16>, vector<2x256xbf16>, vector<16x256xf32> -> vector<16x256xf32>
    %c80 = arith.constant 80 : index
    %c0_72 = arith.constant 0 : index
    %179 = vector.load %arg5[%c80, %c0_72] : memref<320x1xf32, #tpu.memory_space<vmem>>, vector<16x1xf32>
    %180 = vector.broadcast %179 : vector<16x1xf32> to vector<16x256xf32>
    %181 = arith.addf %178, %180 : vector<16x256xf32>
    %182 = vector.broadcast %0 : vector<1x256xf32> to vector<16x256xf32>
    %183 = arith.mulf %181, %182 : vector<16x256xf32>
    %c64_73 = arith.constant 64 : index
    %c0_74 = arith.constant 0 : index
    %184 = vector.load %arg2[%c64_73, %c0_74] : memref<256x256xf32, #tpu.memory_space<vmem>>, vector<32x256xf32>
    %cst_75 = arith.constant 0.000000e+00 : f32
    %185 = vector.broadcast %cst_75 : f32 to vector<16x2xf32>
    %186 = vector.extract_strided_slice %183 {offsets = [0, 0], sizes = [16, 254], strides = [1, 1]} : vector<16x256xf32> to vector<16x254xf32>
    %187 = tpu.concatenate %185, %186 in 1 : vector<16x2xf32>, vector<16x254xf32> -> vector<16x256xf32>
    %c2_i32_76 = arith.constant 2 : i32
    %188 = vector.broadcast %c2_i32_76 : i32 to vector<16x256xi32>
    %189 = arith.cmpi sge, %19, %188 : vector<16x256xi32>
    %cst_77 = arith.constant 0.000000e+00 : f32
    %190 = vector.broadcast %cst_77 : f32 to vector<16x256xf32>
    %191 = arith.select %189, %187, %190 : vector<16x256xi1>, vector<16x256xf32>
    %c384 = arith.constant 384 : index
    %c0_78 = arith.constant 0 : index
    %192 = vector.load %arg4[%c384, %c0_78] : memref<1536x16xbf16, #tpu.memory_space<vmem>>, vector<32x16xbf16>
    %193 = arith.truncf %191 : vector<16x256xf32> to vector<16x256xbf16>
    %cst_79 = arith.constant dense<0.000000e+00> : vector<32x256xf32>
    %194 = tpu.matmul %192, %193, %cst_79 {dimension_numbers = #tpu.dot_dimension_numbers<[1], [0], [0], [1], [0, 0, 1, 1], [], []>} : vector<32x16xbf16>, vector<16x256xbf16>, vector<32x256xf32> -> vector<32x256xf32>
    %195 = arith.addf %184, %194 : vector<32x256xf32>
    %cst_80 = arith.constant 0.000000e+00 : f32
    %196 = vector.broadcast %cst_80 : f32 to vector<16x1xf32>
    %197 = vector.extract_strided_slice %183 {offsets = [0, 0], sizes = [16, 255], strides = [1, 1]} : vector<16x256xf32> to vector<16x255xf32>
    %198 = tpu.concatenate %196, %197 in 1 : vector<16x1xf32>, vector<16x255xf32> -> vector<16x256xf32>
    %c1_i32_81 = arith.constant 1 : i32
    %199 = vector.broadcast %c1_i32_81 : i32 to vector<16x256xi32>
    %200 = arith.cmpi sge, %19, %199 : vector<16x256xi32>
    %cst_82 = arith.constant 0.000000e+00 : f32
    %201 = vector.broadcast %cst_82 : f32 to vector<16x256xf32>
    %202 = arith.select %200, %198, %201 : vector<16x256xi1>, vector<16x256xf32>
    %c416 = arith.constant 416 : index
    %c0_83 = arith.constant 0 : index
    %203 = vector.load %arg4[%c416, %c0_83] : memref<1536x16xbf16, #tpu.memory_space<vmem>>, vector<32x16xbf16>
    %204 = arith.truncf %202 : vector<16x256xf32> to vector<16x256xbf16>
    %cst_84 = arith.constant dense<0.000000e+00> : vector<32x256xf32>
    %205 = tpu.matmul %203, %204, %cst_84 {dimension_numbers = #tpu.dot_dimension_numbers<[1], [0], [0], [1], [0, 0, 1, 1], [], []>} : vector<32x16xbf16>, vector<16x256xbf16>, vector<32x256xf32> -> vector<32x256xf32>
    %206 = arith.addf %195, %205 : vector<32x256xf32>
    %c448 = arith.constant 448 : index
    %c0_85 = arith.constant 0 : index
    %207 = vector.load %arg4[%c448, %c0_85] : memref<1536x16xbf16, #tpu.memory_space<vmem>>, vector<32x16xbf16>
    %208 = arith.truncf %183 : vector<16x256xf32> to vector<16x256xbf16>
    %cst_86 = arith.constant dense<0.000000e+00> : vector<32x256xf32>
    %209 = tpu.matmul %207, %208, %cst_86 {dimension_numbers = #tpu.dot_dimension_numbers<[1], [0], [0], [1], [0, 0, 1, 1], [], []>} : vector<32x16xbf16>, vector<16x256xbf16>, vector<32x256xf32> -> vector<32x256xf32>
    %210 = arith.addf %206, %209 : vector<32x256xf32>
    %211 = vector.extract_strided_slice %183 {offsets = [0, 1], sizes = [16, 255], strides = [1, 1]} : vector<16x256xf32> to vector<16x255xf32>
    %cst_87 = arith.constant 0.000000e+00 : f32
    %212 = vector.broadcast %cst_87 : f32 to vector<16x1xf32>
    %213 = tpu.concatenate %211, %212 in 1 : vector<16x255xf32>, vector<16x1xf32> -> vector<16x256xf32>
    %c127_i32_88 = arith.constant 127 : i32
    %214 = vector.broadcast %c127_i32_88 : i32 to vector<16x256xi32>
    %215 = arith.cmpi slt, %19, %214 : vector<16x256xi32>
    %cst_89 = arith.constant 0.000000e+00 : f32
    %216 = vector.broadcast %cst_89 : f32 to vector<16x256xf32>
    %217 = arith.select %215, %213, %216 : vector<16x256xi1>, vector<16x256xf32>
    %c480 = arith.constant 480 : index
    %c0_90 = arith.constant 0 : index
    %218 = vector.load %arg4[%c480, %c0_90] : memref<1536x16xbf16, #tpu.memory_space<vmem>>, vector<32x16xbf16>
    %219 = arith.truncf %217 : vector<16x256xf32> to vector<16x256xbf16>
    %cst_91 = arith.constant dense<0.000000e+00> : vector<32x256xf32>
    %220 = tpu.matmul %218, %219, %cst_91 {dimension_numbers = #tpu.dot_dimension_numbers<[1], [0], [0], [1], [0, 0, 1, 1], [], []>} : vector<32x16xbf16>, vector<16x256xbf16>, vector<32x256xf32> -> vector<32x256xf32>
    %221 = arith.addf %210, %220 : vector<32x256xf32>
    %222 = vector.extract_strided_slice %183 {offsets = [0, 2], sizes = [16, 254], strides = [1, 1]} : vector<16x256xf32> to vector<16x254xf32>
    %cst_92 = arith.constant 0.000000e+00 : f32
    %223 = vector.broadcast %cst_92 : f32 to vector<16x2xf32>
    %224 = tpu.concatenate %222, %223 in 1 : vector<16x254xf32>, vector<16x2xf32> -> vector<16x256xf32>
    %c126_i32_93 = arith.constant 126 : i32
    %225 = vector.broadcast %c126_i32_93 : i32 to vector<16x256xi32>
    %226 = arith.cmpi slt, %19, %225 : vector<16x256xi32>
    %cst_94 = arith.constant 0.000000e+00 : f32
    %227 = vector.broadcast %cst_94 : f32 to vector<16x256xf32>
    %228 = arith.select %226, %224, %227 : vector<16x256xi1>, vector<16x256xf32>
    %c512 = arith.constant 512 : index
    %c0_95 = arith.constant 0 : index
    %229 = vector.load %arg4[%c512, %c0_95] : memref<1536x16xbf16, #tpu.memory_space<vmem>>, vector<32x16xbf16>
    %230 = arith.truncf %228 : vector<16x256xf32> to vector<16x256xbf16>
    %cst_96 = arith.constant dense<0.000000e+00> : vector<32x256xf32>
    %231 = tpu.matmul %229, %230, %cst_96 {dimension_numbers = #tpu.dot_dimension_numbers<[1], [0], [0], [1], [0, 0, 1, 1], [], []>} : vector<32x16xbf16>, vector<16x256xbf16>, vector<32x256xf32> -> vector<32x256xf32>
    %232 = arith.addf %221, %231 : vector<32x256xf32>
    %233 = vector.extract_strided_slice %232 {offsets = [0, 0], sizes = [16, 256], strides = [1, 1]} : vector<32x256xf32> to vector<16x256xf32>
    %234 = math.tanh %233 : vector<16x256xf32>
    %235 = vector.extract_strided_slice %232 {offsets = [16, 0], sizes = [16, 256], strides = [1, 1]} : vector<32x256xf32> to vector<16x256xf32>
    %236 = arith.negf %235 : vector<16x256xf32>
    %237 = math.exp %236 : vector<16x256xf32>
    %cst_97 = arith.constant 1.000000e+00 : f32
    %238 = vector.broadcast %cst_97 : f32 to vector<16x256xf32>
    %239 = arith.addf %238, %237 : vector<16x256xf32>
    %240 = arith.divf %238, %239 : vector<16x256xf32>
    %241 = arith.mulf %234, %240 : vector<16x256xf32>
    %c704 = arith.constant 704 : index
    %c0_98 = arith.constant 0 : index
    %242 = vector.load %arg4[%c704, %c0_98] : memref<1536x16xbf16, #tpu.memory_space<vmem>>, vector<32x16xbf16>
    %243 = arith.truncf %241 : vector<16x256xf32> to vector<16x256xbf16>
    %cst_99 = arith.constant dense<0.000000e+00> : vector<32x256xf32>
    %244 = tpu.matmul %242, %243, %cst_99 {dimension_numbers = #tpu.dot_dimension_numbers<[1], [0], [0], [1], [0, 0, 1, 1], [], []>} : vector<32x16xbf16>, vector<16x256xbf16>, vector<32x256xf32> -> vector<32x256xf32>
    %c96_100 = arith.constant 96 : index
    %c0_101 = arith.constant 0 : index
    %245 = vector.load %arg5[%c96_100, %c0_101] : memref<320x1xf32, #tpu.memory_space<vmem>>, vector<32x1xf32>
    %246 = vector.broadcast %245 : vector<32x1xf32> to vector<32x256xf32>
    %247 = arith.addf %244, %246 : vector<32x256xf32>
    %248 = vector.extract_strided_slice %247 {offsets = [0, 0], sizes = [16, 256], strides = [1, 1]} : vector<32x256xf32> to vector<16x256xf32>
    %249 = arith.addf %183, %248 : vector<16x256xf32>
    %250 = vector.broadcast %0 : vector<1x256xf32> to vector<16x256xf32>
    %251 = arith.mulf %249, %250 : vector<16x256xf32>
    %252 = vector.extract_strided_slice %247 {offsets = [16, 0], sizes = [16, 256], strides = [1, 1]} : vector<32x256xf32> to vector<16x256xf32>
    %c96_102 = arith.constant 96 : index
    %c0_103 = arith.constant 0 : index
    %253 = vector.load %arg2[%c96_102, %c0_103] : memref<256x256xf32, #tpu.memory_space<vmem>>, vector<32x256xf32>
    %cst_104 = arith.constant 0.000000e+00 : f32
    %254 = vector.broadcast %cst_104 : f32 to vector<16x2xf32>
    %255 = vector.extract_strided_slice %251 {offsets = [0, 0], sizes = [16, 254], strides = [1, 1]} : vector<16x256xf32> to vector<16x254xf32>
    %256 = tpu.concatenate %254, %255 in 1 : vector<16x2xf32>, vector<16x254xf32> -> vector<16x256xf32>
    %c2_i32_105 = arith.constant 2 : i32
    %257 = vector.broadcast %c2_i32_105 : i32 to vector<16x256xi32>
    %258 = arith.cmpi sge, %19, %257 : vector<16x256xi32>
    %cst_106 = arith.constant 0.000000e+00 : f32
    %259 = vector.broadcast %cst_106 : f32 to vector<16x256xf32>
    %260 = arith.select %258, %256, %259 : vector<16x256xi1>, vector<16x256xf32>
    %c544 = arith.constant 544 : index
    %c0_107 = arith.constant 0 : index
    %261 = vector.load %arg4[%c544, %c0_107] : memref<1536x16xbf16, #tpu.memory_space<vmem>>, vector<32x16xbf16>
    %262 = arith.truncf %260 : vector<16x256xf32> to vector<16x256xbf16>
    %cst_108 = arith.constant dense<0.000000e+00> : vector<32x256xf32>
    %263 = tpu.matmul %261, %262, %cst_108 {dimension_numbers = #tpu.dot_dimension_numbers<[1], [0], [0], [1], [0, 0, 1, 1], [], []>} : vector<32x16xbf16>, vector<16x256xbf16>, vector<32x256xf32> -> vector<32x256xf32>
    %264 = arith.addf %253, %263 : vector<32x256xf32>
    %cst_109 = arith.constant 0.000000e+00 : f32
    %265 = vector.broadcast %cst_109 : f32 to vector<16x1xf32>
    %266 = vector.extract_strided_slice %251 {offsets = [0, 0], sizes = [16, 255], strides = [1, 1]} : vector<16x256xf32> to vector<16x255xf32>
    %267 = tpu.concatenate %265, %266 in 1 : vector<16x1xf32>, vector<16x255xf32> -> vector<16x256xf32>
    %c1_i32_110 = arith.constant 1 : i32
    %268 = vector.broadcast %c1_i32_110 : i32 to vector<16x256xi32>
    %269 = arith.cmpi sge, %19, %268 : vector<16x256xi32>
    %cst_111 = arith.constant 0.000000e+00 : f32
    %270 = vector.broadcast %cst_111 : f32 to vector<16x256xf32>
    %271 = arith.select %269, %267, %270 : vector<16x256xi1>, vector<16x256xf32>
    %c576 = arith.constant 576 : index
    %c0_112 = arith.constant 0 : index
    %272 = vector.load %arg4[%c576, %c0_112] : memref<1536x16xbf16, #tpu.memory_space<vmem>>, vector<32x16xbf16>
    %273 = arith.truncf %271 : vector<16x256xf32> to vector<16x256xbf16>
    %cst_113 = arith.constant dense<0.000000e+00> : vector<32x256xf32>
    %274 = tpu.matmul %272, %273, %cst_113 {dimension_numbers = #tpu.dot_dimension_numbers<[1], [0], [0], [1], [0, 0, 1, 1], [], []>} : vector<32x16xbf16>, vector<16x256xbf16>, vector<32x256xf32> -> vector<32x256xf32>
    %275 = arith.addf %264, %274 : vector<32x256xf32>
    %c608 = arith.constant 608 : index
    %c0_114 = arith.constant 0 : index
    %276 = vector.load %arg4[%c608, %c0_114] : memref<1536x16xbf16, #tpu.memory_space<vmem>>, vector<32x16xbf16>
    %277 = arith.truncf %251 : vector<16x256xf32> to vector<16x256xbf16>
    %cst_115 = arith.constant dense<0.000000e+00> : vector<32x256xf32>
    %278 = tpu.matmul %276, %277, %cst_115 {dimension_numbers = #tpu.dot_dimension_numbers<[1], [0], [0], [1], [0, 0, 1, 1], [], []>} : vector<32x16xbf16>, vector<16x256xbf16>, vector<32x256xf32> -> vector<32x256xf32>
    %279 = arith.addf %275, %278 : vector<32x256xf32>
    %280 = vector.extract_strided_slice %251 {offsets = [0, 1], sizes = [16, 255], strides = [1, 1]} : vector<16x256xf32> to vector<16x255xf32>
    %cst_116 = arith.constant 0.000000e+00 : f32
    %281 = vector.broadcast %cst_116 : f32 to vector<16x1xf32>
    %282 = tpu.concatenate %280, %281 in 1 : vector<16x255xf32>, vector<16x1xf32> -> vector<16x256xf32>
    %c127_i32_117 = arith.constant 127 : i32
    %283 = vector.broadcast %c127_i32_117 : i32 to vector<16x256xi32>
    %284 = arith.cmpi slt, %19, %283 : vector<16x256xi32>
    %cst_118 = arith.constant 0.000000e+00 : f32
    %285 = vector.broadcast %cst_118 : f32 to vector<16x256xf32>
    %286 = arith.select %284, %282, %285 : vector<16x256xi1>, vector<16x256xf32>
    %c640 = arith.constant 640 : index
    %c0_119 = arith.constant 0 : index
    %287 = vector.load %arg4[%c640, %c0_119] : memref<1536x16xbf16, #tpu.memory_space<vmem>>, vector<32x16xbf16>
    %288 = arith.truncf %286 : vector<16x256xf32> to vector<16x256xbf16>
    %cst_120 = arith.constant dense<0.000000e+00> : vector<32x256xf32>
    %289 = tpu.matmul %287, %288, %cst_120 {dimension_numbers = #tpu.dot_dimension_numbers<[1], [0], [0], [1], [0, 0, 1, 1], [], []>} : vector<32x16xbf16>, vector<16x256xbf16>, vector<32x256xf32> -> vector<32x256xf32>
    %290 = arith.addf %279, %289 : vector<32x256xf32>
    %291 = vector.extract_strided_slice %251 {offsets = [0, 2], sizes = [16, 254], strides = [1, 1]} : vector<16x256xf32> to vector<16x254xf32>
    %cst_121 = arith.constant 0.000000e+00 : f32
    %292 = vector.broadcast %cst_121 : f32 to vector<16x2xf32>
    %293 = tpu.concatenate %291, %292 in 1 : vector<16x254xf32>, vector<16x2xf32> -> vector<16x256xf32>
    %c126_i32_122 = arith.constant 126 : i32
    %294 = vector.broadcast %c126_i32_122 : i32 to vector<16x256xi32>
    %295 = arith.cmpi slt, %19, %294 : vector<16x256xi32>
    %cst_123 = arith.constant 0.000000e+00 : f32
    %296 = vector.broadcast %cst_123 : f32 to vector<16x256xf32>
    %297 = arith.select %295, %293, %296 : vector<16x256xi1>, vector<16x256xf32>
    %c672 = arith.constant 672 : index
    %c0_124 = arith.constant 0 : index
    %298 = vector.load %arg4[%c672, %c0_124] : memref<1536x16xbf16, #tpu.memory_space<vmem>>, vector<32x16xbf16>
    %299 = arith.truncf %297 : vector<16x256xf32> to vector<16x256xbf16>
    %cst_125 = arith.constant dense<0.000000e+00> : vector<32x256xf32>
    %300 = tpu.matmul %298, %299, %cst_125 {dimension_numbers = #tpu.dot_dimension_numbers<[1], [0], [0], [1], [0, 0, 1, 1], [], []>} : vector<32x16xbf16>, vector<16x256xbf16>, vector<32x256xf32> -> vector<32x256xf32>
    %301 = arith.addf %290, %300 : vector<32x256xf32>
    %302 = vector.extract_strided_slice %301 {offsets = [0, 0], sizes = [16, 256], strides = [1, 1]} : vector<32x256xf32> to vector<16x256xf32>
    %303 = math.tanh %302 : vector<16x256xf32>
    %304 = vector.extract_strided_slice %301 {offsets = [16, 0], sizes = [16, 256], strides = [1, 1]} : vector<32x256xf32> to vector<16x256xf32>
    %305 = arith.negf %304 : vector<16x256xf32>
    %306 = math.exp %305 : vector<16x256xf32>
    %cst_126 = arith.constant 1.000000e+00 : f32
    %307 = vector.broadcast %cst_126 : f32 to vector<16x256xf32>
    %308 = arith.addf %307, %306 : vector<16x256xf32>
    %309 = arith.divf %307, %308 : vector<16x256xf32>
    %310 = arith.mulf %303, %309 : vector<16x256xf32>
    %c736 = arith.constant 736 : index
    %c0_127 = arith.constant 0 : index
    %311 = vector.load %arg4[%c736, %c0_127] : memref<1536x16xbf16, #tpu.memory_space<vmem>>, vector<16x16xbf16>
    %312 = arith.truncf %310 : vector<16x256xf32> to vector<16x256xbf16>
    %cst_128 = arith.constant dense<0.000000e+00> : vector<16x256xf32>
    %313 = tpu.matmul %311, %312, %cst_128 {dimension_numbers = #tpu.dot_dimension_numbers<[1], [0], [0], [1], [0, 0, 1, 1], [], []>} : vector<16x16xbf16>, vector<16x256xbf16>, vector<16x256xf32> -> vector<16x256xf32>
    %c128_129 = arith.constant 128 : index
    %c0_130 = arith.constant 0 : index
    %314 = vector.load %arg5[%c128_129, %c0_130] : memref<320x1xf32, #tpu.memory_space<vmem>>, vector<16x1xf32>
    %315 = vector.broadcast %314 : vector<16x1xf32> to vector<16x256xf32>
    %316 = arith.addf %313, %315 : vector<16x256xf32>
    %317 = arith.addf %252, %316 : vector<16x256xf32>
    %318 = vector.broadcast %0 : vector<1x256xf32> to vector<16x256xf32>
    %319 = arith.mulf %317, %318 : vector<16x256xf32>
    %c752 = arith.constant 752 : index
    %c0_131 = arith.constant 0 : index
    %320 = vector.load %arg4[%c752, %c0_131] : memref<1536x16xbf16, #tpu.memory_space<vmem>>, vector<16x16xbf16>
    %321 = arith.truncf %319 : vector<16x256xf32> to vector<16x256xbf16>
    %cst_132 = arith.constant dense<0.000000e+00> : vector<16x256xf32>
    %322 = tpu.matmul %320, %321, %cst_132 {dimension_numbers = #tpu.dot_dimension_numbers<[1], [0], [0], [1], [0, 0, 1, 1], [], []>} : vector<16x16xbf16>, vector<16x256xbf16>, vector<16x256xf32> -> vector<16x256xf32>
    %c144 = arith.constant 144 : index
    %c0_133 = arith.constant 0 : index
    %323 = vector.load %arg5[%c144, %c0_133] : memref<320x1xf32, #tpu.memory_space<vmem>>, vector<16x1xf32>
    %324 = vector.broadcast %323 : vector<16x1xf32> to vector<16x256xf32>
    %325 = arith.addf %322, %324 : vector<16x256xf32>
    %326 = vector.broadcast %0 : vector<1x256xf32> to vector<16x256xf32>
    %327 = arith.mulf %325, %326 : vector<16x256xf32>
    %328 = vector.extract_strided_slice %327 {offsets = [0, 0], sizes = [2, 256], strides = [1, 1]} : vector<16x256xf32> to vector<2x256xf32>
    %329 = vector.broadcast %0 : vector<1x256xf32> to vector<2x256xf32>
    %330 = arith.mulf %1, %329 : vector<2x256xf32>
    %331 = arith.addf %328, %330 : vector<2x256xf32>
    %c32_134 = arith.constant 32 : index
    %c0_135 = arith.constant 0 : index
    %332 = vector.load %arg3[%c32_134, %c0_135] : memref<64x2xbf16, #tpu.memory_space<vmem>>, vector<16x2xbf16>
    %333 = arith.truncf %331 : vector<2x256xf32> to vector<2x256xbf16>
    %cst_136 = arith.constant dense<0.000000e+00> : vector<16x256xf32>
    %334 = tpu.matmul %332, %333, %cst_136 {dimension_numbers = #tpu.dot_dimension_numbers<[1], [0], [0], [1], [0, 0, 1, 1], [], []>} : vector<16x2xbf16>, vector<2x256xbf16>, vector<16x256xf32> -> vector<16x256xf32>
    %c160_137 = arith.constant 160 : index
    %c0_138 = arith.constant 0 : index
    %335 = vector.load %arg5[%c160_137, %c0_138] : memref<320x1xf32, #tpu.memory_space<vmem>>, vector<16x1xf32>
    %336 = vector.broadcast %335 : vector<16x1xf32> to vector<16x256xf32>
    %337 = arith.addf %334, %336 : vector<16x256xf32>
    %338 = vector.broadcast %0 : vector<1x256xf32> to vector<16x256xf32>
    %339 = arith.mulf %337, %338 : vector<16x256xf32>
    %c128_139 = arith.constant 128 : index
    %c0_140 = arith.constant 0 : index
    %340 = vector.load %arg2[%c128_139, %c0_140] : memref<256x256xf32, #tpu.memory_space<vmem>>, vector<32x256xf32>
    %cst_141 = arith.constant 0.000000e+00 : f32
    %341 = vector.broadcast %cst_141 : f32 to vector<16x2xf32>
    %342 = vector.extract_strided_slice %339 {offsets = [0, 0], sizes = [16, 254], strides = [1, 1]} : vector<16x256xf32> to vector<16x254xf32>
    %343 = tpu.concatenate %341, %342 in 1 : vector<16x2xf32>, vector<16x254xf32> -> vector<16x256xf32>
    %c2_i32_142 = arith.constant 2 : i32
    %344 = vector.broadcast %c2_i32_142 : i32 to vector<16x256xi32>
    %345 = arith.cmpi sge, %19, %344 : vector<16x256xi32>
    %cst_143 = arith.constant 0.000000e+00 : f32
    %346 = vector.broadcast %cst_143 : f32 to vector<16x256xf32>
    %347 = arith.select %345, %343, %346 : vector<16x256xi1>, vector<16x256xf32>
    %c768 = arith.constant 768 : index
    %c0_144 = arith.constant 0 : index
    %348 = vector.load %arg4[%c768, %c0_144] : memref<1536x16xbf16, #tpu.memory_space<vmem>>, vector<32x16xbf16>
    %349 = arith.truncf %347 : vector<16x256xf32> to vector<16x256xbf16>
    %cst_145 = arith.constant dense<0.000000e+00> : vector<32x256xf32>
    %350 = tpu.matmul %348, %349, %cst_145 {dimension_numbers = #tpu.dot_dimension_numbers<[1], [0], [0], [1], [0, 0, 1, 1], [], []>} : vector<32x16xbf16>, vector<16x256xbf16>, vector<32x256xf32> -> vector<32x256xf32>
    %351 = arith.addf %340, %350 : vector<32x256xf32>
    %cst_146 = arith.constant 0.000000e+00 : f32
    %352 = vector.broadcast %cst_146 : f32 to vector<16x1xf32>
    %353 = vector.extract_strided_slice %339 {offsets = [0, 0], sizes = [16, 255], strides = [1, 1]} : vector<16x256xf32> to vector<16x255xf32>
    %354 = tpu.concatenate %352, %353 in 1 : vector<16x1xf32>, vector<16x255xf32> -> vector<16x256xf32>
    %c1_i32_147 = arith.constant 1 : i32
    %355 = vector.broadcast %c1_i32_147 : i32 to vector<16x256xi32>
    %356 = arith.cmpi sge, %19, %355 : vector<16x256xi32>
    %cst_148 = arith.constant 0.000000e+00 : f32
    %357 = vector.broadcast %cst_148 : f32 to vector<16x256xf32>
    %358 = arith.select %356, %354, %357 : vector<16x256xi1>, vector<16x256xf32>
    %c800 = arith.constant 800 : index
    %c0_149 = arith.constant 0 : index
    %359 = vector.load %arg4[%c800, %c0_149] : memref<1536x16xbf16, #tpu.memory_space<vmem>>, vector<32x16xbf16>
    %360 = arith.truncf %358 : vector<16x256xf32> to vector<16x256xbf16>
    %cst_150 = arith.constant dense<0.000000e+00> : vector<32x256xf32>
    %361 = tpu.matmul %359, %360, %cst_150 {dimension_numbers = #tpu.dot_dimension_numbers<[1], [0], [0], [1], [0, 0, 1, 1], [], []>} : vector<32x16xbf16>, vector<16x256xbf16>, vector<32x256xf32> -> vector<32x256xf32>
    %362 = arith.addf %351, %361 : vector<32x256xf32>
    %c832 = arith.constant 832 : index
    %c0_151 = arith.constant 0 : index
    %363 = vector.load %arg4[%c832, %c0_151] : memref<1536x16xbf16, #tpu.memory_space<vmem>>, vector<32x16xbf16>
    %364 = arith.truncf %339 : vector<16x256xf32> to vector<16x256xbf16>
    %cst_152 = arith.constant dense<0.000000e+00> : vector<32x256xf32>
    %365 = tpu.matmul %363, %364, %cst_152 {dimension_numbers = #tpu.dot_dimension_numbers<[1], [0], [0], [1], [0, 0, 1, 1], [], []>} : vector<32x16xbf16>, vector<16x256xbf16>, vector<32x256xf32> -> vector<32x256xf32>
    %366 = arith.addf %362, %365 : vector<32x256xf32>
    %367 = vector.extract_strided_slice %339 {offsets = [0, 1], sizes = [16, 255], strides = [1, 1]} : vector<16x256xf32> to vector<16x255xf32>
    %cst_153 = arith.constant 0.000000e+00 : f32
    %368 = vector.broadcast %cst_153 : f32 to vector<16x1xf32>
    %369 = tpu.concatenate %367, %368 in 1 : vector<16x255xf32>, vector<16x1xf32> -> vector<16x256xf32>
    %c127_i32_154 = arith.constant 127 : i32
    %370 = vector.broadcast %c127_i32_154 : i32 to vector<16x256xi32>
    %371 = arith.cmpi slt, %19, %370 : vector<16x256xi32>
    %cst_155 = arith.constant 0.000000e+00 : f32
    %372 = vector.broadcast %cst_155 : f32 to vector<16x256xf32>
    %373 = arith.select %371, %369, %372 : vector<16x256xi1>, vector<16x256xf32>
    %c864 = arith.constant 864 : index
    %c0_156 = arith.constant 0 : index
    %374 = vector.load %arg4[%c864, %c0_156] : memref<1536x16xbf16, #tpu.memory_space<vmem>>, vector<32x16xbf16>
    %375 = arith.truncf %373 : vector<16x256xf32> to vector<16x256xbf16>
    %cst_157 = arith.constant dense<0.000000e+00> : vector<32x256xf32>
    %376 = tpu.matmul %374, %375, %cst_157 {dimension_numbers = #tpu.dot_dimension_numbers<[1], [0], [0], [1], [0, 0, 1, 1], [], []>} : vector<32x16xbf16>, vector<16x256xbf16>, vector<32x256xf32> -> vector<32x256xf32>
    %377 = arith.addf %366, %376 : vector<32x256xf32>
    %378 = vector.extract_strided_slice %339 {offsets = [0, 2], sizes = [16, 254], strides = [1, 1]} : vector<16x256xf32> to vector<16x254xf32>
    %cst_158 = arith.constant 0.000000e+00 : f32
    %379 = vector.broadcast %cst_158 : f32 to vector<16x2xf32>
    %380 = tpu.concatenate %378, %379 in 1 : vector<16x254xf32>, vector<16x2xf32> -> vector<16x256xf32>
    %c126_i32_159 = arith.constant 126 : i32
    %381 = vector.broadcast %c126_i32_159 : i32 to vector<16x256xi32>
    %382 = arith.cmpi slt, %19, %381 : vector<16x256xi32>
    %cst_160 = arith.constant 0.000000e+00 : f32
    %383 = vector.broadcast %cst_160 : f32 to vector<16x256xf32>
    %384 = arith.select %382, %380, %383 : vector<16x256xi1>, vector<16x256xf32>
    %c896 = arith.constant 896 : index
    %c0_161 = arith.constant 0 : index
    %385 = vector.load %arg4[%c896, %c0_161] : memref<1536x16xbf16, #tpu.memory_space<vmem>>, vector<32x16xbf16>
    %386 = arith.truncf %384 : vector<16x256xf32> to vector<16x256xbf16>
    %cst_162 = arith.constant dense<0.000000e+00> : vector<32x256xf32>
    %387 = tpu.matmul %385, %386, %cst_162 {dimension_numbers = #tpu.dot_dimension_numbers<[1], [0], [0], [1], [0, 0, 1, 1], [], []>} : vector<32x16xbf16>, vector<16x256xbf16>, vector<32x256xf32> -> vector<32x256xf32>
    %388 = arith.addf %377, %387 : vector<32x256xf32>
    %389 = vector.extract_strided_slice %388 {offsets = [0, 0], sizes = [16, 256], strides = [1, 1]} : vector<32x256xf32> to vector<16x256xf32>
    %390 = math.tanh %389 : vector<16x256xf32>
    %391 = vector.extract_strided_slice %388 {offsets = [16, 0], sizes = [16, 256], strides = [1, 1]} : vector<32x256xf32> to vector<16x256xf32>
    %392 = arith.negf %391 : vector<16x256xf32>
    %393 = math.exp %392 : vector<16x256xf32>
    %cst_163 = arith.constant 1.000000e+00 : f32
    %394 = vector.broadcast %cst_163 : f32 to vector<16x256xf32>
    %395 = arith.addf %394, %393 : vector<16x256xf32>
    %396 = arith.divf %394, %395 : vector<16x256xf32>
    %397 = arith.mulf %390, %396 : vector<16x256xf32>
    %c1088 = arith.constant 1088 : index
    %c0_164 = arith.constant 0 : index
    %398 = vector.load %arg4[%c1088, %c0_164] : memref<1536x16xbf16, #tpu.memory_space<vmem>>, vector<32x16xbf16>
    %399 = arith.truncf %397 : vector<16x256xf32> to vector<16x256xbf16>
    %cst_165 = arith.constant dense<0.000000e+00> : vector<32x256xf32>
    %400 = tpu.matmul %398, %399, %cst_165 {dimension_numbers = #tpu.dot_dimension_numbers<[1], [0], [0], [1], [0, 0, 1, 1], [], []>} : vector<32x16xbf16>, vector<16x256xbf16>, vector<32x256xf32> -> vector<32x256xf32>
    %c176 = arith.constant 176 : index
    %c0_166 = arith.constant 0 : index
    %401 = vector.load %arg5[%c176, %c0_166] : memref<320x1xf32, #tpu.memory_space<vmem>>, vector<32x1xf32>
    %402 = vector.broadcast %401 : vector<32x1xf32> to vector<32x256xf32>
    %403 = arith.addf %400, %402 : vector<32x256xf32>
    %404 = vector.extract_strided_slice %403 {offsets = [0, 0], sizes = [16, 256], strides = [1, 1]} : vector<32x256xf32> to vector<16x256xf32>
    %405 = arith.addf %339, %404 : vector<16x256xf32>
    %406 = vector.broadcast %0 : vector<1x256xf32> to vector<16x256xf32>
    %407 = arith.mulf %405, %406 : vector<16x256xf32>
    %408 = vector.extract_strided_slice %403 {offsets = [16, 0], sizes = [16, 256], strides = [1, 1]} : vector<32x256xf32> to vector<16x256xf32>
    %c160_167 = arith.constant 160 : index
    %c0_168 = arith.constant 0 : index
    %409 = vector.load %arg2[%c160_167, %c0_168] : memref<256x256xf32, #tpu.memory_space<vmem>>, vector<32x256xf32>
    %cst_169 = arith.constant 0.000000e+00 : f32
    %410 = vector.broadcast %cst_169 : f32 to vector<16x2xf32>
    %411 = vector.extract_strided_slice %407 {offsets = [0, 0], sizes = [16, 254], strides = [1, 1]} : vector<16x256xf32> to vector<16x254xf32>
    %412 = tpu.concatenate %410, %411 in 1 : vector<16x2xf32>, vector<16x254xf32> -> vector<16x256xf32>
    %c2_i32_170 = arith.constant 2 : i32
    %413 = vector.broadcast %c2_i32_170 : i32 to vector<16x256xi32>
    %414 = arith.cmpi sge, %19, %413 : vector<16x256xi32>
    %cst_171 = arith.constant 0.000000e+00 : f32
    %415 = vector.broadcast %cst_171 : f32 to vector<16x256xf32>
    %416 = arith.select %414, %412, %415 : vector<16x256xi1>, vector<16x256xf32>
    %c928 = arith.constant 928 : index
    %c0_172 = arith.constant 0 : index
    %417 = vector.load %arg4[%c928, %c0_172] : memref<1536x16xbf16, #tpu.memory_space<vmem>>, vector<32x16xbf16>
    %418 = arith.truncf %416 : vector<16x256xf32> to vector<16x256xbf16>
    %cst_173 = arith.constant dense<0.000000e+00> : vector<32x256xf32>
    %419 = tpu.matmul %417, %418, %cst_173 {dimension_numbers = #tpu.dot_dimension_numbers<[1], [0], [0], [1], [0, 0, 1, 1], [], []>} : vector<32x16xbf16>, vector<16x256xbf16>, vector<32x256xf32> -> vector<32x256xf32>
    %420 = arith.addf %409, %419 : vector<32x256xf32>
    %cst_174 = arith.constant 0.000000e+00 : f32
    %421 = vector.broadcast %cst_174 : f32 to vector<16x1xf32>
    %422 = vector.extract_strided_slice %407 {offsets = [0, 0], sizes = [16, 255], strides = [1, 1]} : vector<16x256xf32> to vector<16x255xf32>
    %423 = tpu.concatenate %421, %422 in 1 : vector<16x1xf32>, vector<16x255xf32> -> vector<16x256xf32>
    %c1_i32_175 = arith.constant 1 : i32
    %424 = vector.broadcast %c1_i32_175 : i32 to vector<16x256xi32>
    %425 = arith.cmpi sge, %19, %424 : vector<16x256xi32>
    %cst_176 = arith.constant 0.000000e+00 : f32
    %426 = vector.broadcast %cst_176 : f32 to vector<16x256xf32>
    %427 = arith.select %425, %423, %426 : vector<16x256xi1>, vector<16x256xf32>
    %c960 = arith.constant 960 : index
    %c0_177 = arith.constant 0 : index
    %428 = vector.load %arg4[%c960, %c0_177] : memref<1536x16xbf16, #tpu.memory_space<vmem>>, vector<32x16xbf16>
    %429 = arith.truncf %427 : vector<16x256xf32> to vector<16x256xbf16>
    %cst_178 = arith.constant dense<0.000000e+00> : vector<32x256xf32>
    %430 = tpu.matmul %428, %429, %cst_178 {dimension_numbers = #tpu.dot_dimension_numbers<[1], [0], [0], [1], [0, 0, 1, 1], [], []>} : vector<32x16xbf16>, vector<16x256xbf16>, vector<32x256xf32> -> vector<32x256xf32>
    %431 = arith.addf %420, %430 : vector<32x256xf32>
    %c992 = arith.constant 992 : index
    %c0_179 = arith.constant 0 : index
    %432 = vector.load %arg4[%c992, %c0_179] : memref<1536x16xbf16, #tpu.memory_space<vmem>>, vector<32x16xbf16>
    %433 = arith.truncf %407 : vector<16x256xf32> to vector<16x256xbf16>
    %cst_180 = arith.constant dense<0.000000e+00> : vector<32x256xf32>
    %434 = tpu.matmul %432, %433, %cst_180 {dimension_numbers = #tpu.dot_dimension_numbers<[1], [0], [0], [1], [0, 0, 1, 1], [], []>} : vector<32x16xbf16>, vector<16x256xbf16>, vector<32x256xf32> -> vector<32x256xf32>
    %435 = arith.addf %431, %434 : vector<32x256xf32>
    %436 = vector.extract_strided_slice %407 {offsets = [0, 1], sizes = [16, 255], strides = [1, 1]} : vector<16x256xf32> to vector<16x255xf32>
    %cst_181 = arith.constant 0.000000e+00 : f32
    %437 = vector.broadcast %cst_181 : f32 to vector<16x1xf32>
    %438 = tpu.concatenate %436, %437 in 1 : vector<16x255xf32>, vector<16x1xf32> -> vector<16x256xf32>
    %c127_i32_182 = arith.constant 127 : i32
    %439 = vector.broadcast %c127_i32_182 : i32 to vector<16x256xi32>
    %440 = arith.cmpi slt, %19, %439 : vector<16x256xi32>
    %cst_183 = arith.constant 0.000000e+00 : f32
    %441 = vector.broadcast %cst_183 : f32 to vector<16x256xf32>
    %442 = arith.select %440, %438, %441 : vector<16x256xi1>, vector<16x256xf32>
    %c1024 = arith.constant 1024 : index
    %c0_184 = arith.constant 0 : index
    %443 = vector.load %arg4[%c1024, %c0_184] : memref<1536x16xbf16, #tpu.memory_space<vmem>>, vector<32x16xbf16>
    %444 = arith.truncf %442 : vector<16x256xf32> to vector<16x256xbf16>
    %cst_185 = arith.constant dense<0.000000e+00> : vector<32x256xf32>
    %445 = tpu.matmul %443, %444, %cst_185 {dimension_numbers = #tpu.dot_dimension_numbers<[1], [0], [0], [1], [0, 0, 1, 1], [], []>} : vector<32x16xbf16>, vector<16x256xbf16>, vector<32x256xf32> -> vector<32x256xf32>
    %446 = arith.addf %435, %445 : vector<32x256xf32>
    %447 = vector.extract_strided_slice %407 {offsets = [0, 2], sizes = [16, 254], strides = [1, 1]} : vector<16x256xf32> to vector<16x254xf32>
    %cst_186 = arith.constant 0.000000e+00 : f32
    %448 = vector.broadcast %cst_186 : f32 to vector<16x2xf32>
    %449 = tpu.concatenate %447, %448 in 1 : vector<16x254xf32>, vector<16x2xf32> -> vector<16x256xf32>
    %c126_i32_187 = arith.constant 126 : i32
    %450 = vector.broadcast %c126_i32_187 : i32 to vector<16x256xi32>
    %451 = arith.cmpi slt, %19, %450 : vector<16x256xi32>
    %cst_188 = arith.constant 0.000000e+00 : f32
    %452 = vector.broadcast %cst_188 : f32 to vector<16x256xf32>
    %453 = arith.select %451, %449, %452 : vector<16x256xi1>, vector<16x256xf32>
    %c1056 = arith.constant 1056 : index
    %c0_189 = arith.constant 0 : index
    %454 = vector.load %arg4[%c1056, %c0_189] : memref<1536x16xbf16, #tpu.memory_space<vmem>>, vector<32x16xbf16>
    %455 = arith.truncf %453 : vector<16x256xf32> to vector<16x256xbf16>
    %cst_190 = arith.constant dense<0.000000e+00> : vector<32x256xf32>
    %456 = tpu.matmul %454, %455, %cst_190 {dimension_numbers = #tpu.dot_dimension_numbers<[1], [0], [0], [1], [0, 0, 1, 1], [], []>} : vector<32x16xbf16>, vector<16x256xbf16>, vector<32x256xf32> -> vector<32x256xf32>
    %457 = arith.addf %446, %456 : vector<32x256xf32>
    %458 = vector.extract_strided_slice %457 {offsets = [0, 0], sizes = [16, 256], strides = [1, 1]} : vector<32x256xf32> to vector<16x256xf32>
    %459 = math.tanh %458 : vector<16x256xf32>
    %460 = vector.extract_strided_slice %457 {offsets = [16, 0], sizes = [16, 256], strides = [1, 1]} : vector<32x256xf32> to vector<16x256xf32>
    %461 = arith.negf %460 : vector<16x256xf32>
    %462 = math.exp %461 : vector<16x256xf32>
    %cst_191 = arith.constant 1.000000e+00 : f32
    %463 = vector.broadcast %cst_191 : f32 to vector<16x256xf32>
    %464 = arith.addf %463, %462 : vector<16x256xf32>
    %465 = arith.divf %463, %464 : vector<16x256xf32>
    %466 = arith.mulf %459, %465 : vector<16x256xf32>
    %c1120 = arith.constant 1120 : index
    %c0_192 = arith.constant 0 : index
    %467 = vector.load %arg4[%c1120, %c0_192] : memref<1536x16xbf16, #tpu.memory_space<vmem>>, vector<16x16xbf16>
    %468 = arith.truncf %466 : vector<16x256xf32> to vector<16x256xbf16>
    %cst_193 = arith.constant dense<0.000000e+00> : vector<16x256xf32>
    %469 = tpu.matmul %467, %468, %cst_193 {dimension_numbers = #tpu.dot_dimension_numbers<[1], [0], [0], [1], [0, 0, 1, 1], [], []>} : vector<16x16xbf16>, vector<16x256xbf16>, vector<16x256xf32> -> vector<16x256xf32>
    %c208 = arith.constant 208 : index
    %c0_194 = arith.constant 0 : index
    %470 = vector.load %arg5[%c208, %c0_194] : memref<320x1xf32, #tpu.memory_space<vmem>>, vector<16x1xf32>
    %471 = vector.broadcast %470 : vector<16x1xf32> to vector<16x256xf32>
    %472 = arith.addf %469, %471 : vector<16x256xf32>
    %473 = arith.addf %408, %472 : vector<16x256xf32>
    %474 = vector.broadcast %0 : vector<1x256xf32> to vector<16x256xf32>
    %475 = arith.mulf %473, %474 : vector<16x256xf32>
    %c1136 = arith.constant 1136 : index
    %c0_195 = arith.constant 0 : index
    %476 = vector.load %arg4[%c1136, %c0_195] : memref<1536x16xbf16, #tpu.memory_space<vmem>>, vector<16x16xbf16>
    %477 = arith.truncf %475 : vector<16x256xf32> to vector<16x256xbf16>
    %cst_196 = arith.constant dense<0.000000e+00> : vector<16x256xf32>
    %478 = tpu.matmul %476, %477, %cst_196 {dimension_numbers = #tpu.dot_dimension_numbers<[1], [0], [0], [1], [0, 0, 1, 1], [], []>} : vector<16x16xbf16>, vector<16x256xbf16>, vector<16x256xf32> -> vector<16x256xf32>
    %c224_197 = arith.constant 224 : index
    %c0_198 = arith.constant 0 : index
    %479 = vector.load %arg5[%c224_197, %c0_198] : memref<320x1xf32, #tpu.memory_space<vmem>>, vector<16x1xf32>
    %480 = vector.broadcast %479 : vector<16x1xf32> to vector<16x256xf32>
    %481 = arith.addf %478, %480 : vector<16x256xf32>
    %482 = vector.broadcast %0 : vector<1x256xf32> to vector<16x256xf32>
    %483 = arith.mulf %481, %482 : vector<16x256xf32>
    %484 = vector.extract_strided_slice %483 {offsets = [0, 0], sizes = [2, 256], strides = [1, 1]} : vector<16x256xf32> to vector<2x256xf32>
    %485 = vector.broadcast %0 : vector<1x256xf32> to vector<2x256xf32>
    %486 = arith.mulf %175, %485 : vector<2x256xf32>
    %487 = arith.addf %484, %486 : vector<2x256xf32>
    %c48_199 = arith.constant 48 : index
    %c0_200 = arith.constant 0 : index
    %488 = vector.load %arg3[%c48_199, %c0_200] : memref<64x2xbf16, #tpu.memory_space<vmem>>, vector<16x2xbf16>
    %489 = arith.truncf %487 : vector<2x256xf32> to vector<2x256xbf16>
    %cst_201 = arith.constant dense<0.000000e+00> : vector<16x256xf32>
    %490 = tpu.matmul %488, %489, %cst_201 {dimension_numbers = #tpu.dot_dimension_numbers<[1], [0], [0], [1], [0, 0, 1, 1], [], []>} : vector<16x2xbf16>, vector<2x256xbf16>, vector<16x256xf32> -> vector<16x256xf32>
    %c240 = arith.constant 240 : index
    %c0_202 = arith.constant 0 : index
    %491 = vector.load %arg5[%c240, %c0_202] : memref<320x1xf32, #tpu.memory_space<vmem>>, vector<16x1xf32>
    %492 = vector.broadcast %491 : vector<16x1xf32> to vector<16x256xf32>
    %493 = arith.addf %490, %492 : vector<16x256xf32>
    %494 = vector.broadcast %0 : vector<1x256xf32> to vector<16x256xf32>
    %495 = arith.mulf %493, %494 : vector<16x256xf32>
    %c192_203 = arith.constant 192 : index
    %c0_204 = arith.constant 0 : index
    %496 = vector.load %arg2[%c192_203, %c0_204] : memref<256x256xf32, #tpu.memory_space<vmem>>, vector<32x256xf32>
    %cst_205 = arith.constant 0.000000e+00 : f32
    %497 = vector.broadcast %cst_205 : f32 to vector<16x2xf32>
    %498 = vector.extract_strided_slice %495 {offsets = [0, 0], sizes = [16, 254], strides = [1, 1]} : vector<16x256xf32> to vector<16x254xf32>
    %499 = tpu.concatenate %497, %498 in 1 : vector<16x2xf32>, vector<16x254xf32> -> vector<16x256xf32>
    %c2_i32_206 = arith.constant 2 : i32
    %500 = vector.broadcast %c2_i32_206 : i32 to vector<16x256xi32>
    %501 = arith.cmpi sge, %19, %500 : vector<16x256xi32>
    %cst_207 = arith.constant 0.000000e+00 : f32
    %502 = vector.broadcast %cst_207 : f32 to vector<16x256xf32>
    %503 = arith.select %501, %499, %502 : vector<16x256xi1>, vector<16x256xf32>
    %c1152 = arith.constant 1152 : index
    %c0_208 = arith.constant 0 : index
    %504 = vector.load %arg4[%c1152, %c0_208] : memref<1536x16xbf16, #tpu.memory_space<vmem>>, vector<32x16xbf16>
    %505 = arith.truncf %503 : vector<16x256xf32> to vector<16x256xbf16>
    %cst_209 = arith.constant dense<0.000000e+00> : vector<32x256xf32>
    %506 = tpu.matmul %504, %505, %cst_209 {dimension_numbers = #tpu.dot_dimension_numbers<[1], [0], [0], [1], [0, 0, 1, 1], [], []>} : vector<32x16xbf16>, vector<16x256xbf16>, vector<32x256xf32> -> vector<32x256xf32>
    %507 = arith.addf %496, %506 : vector<32x256xf32>
    %cst_210 = arith.constant 0.000000e+00 : f32
    %508 = vector.broadcast %cst_210 : f32 to vector<16x1xf32>
    %509 = vector.extract_strided_slice %495 {offsets = [0, 0], sizes = [16, 255], strides = [1, 1]} : vector<16x256xf32> to vector<16x255xf32>
    %510 = tpu.concatenate %508, %509 in 1 : vector<16x1xf32>, vector<16x255xf32> -> vector<16x256xf32>
    %c1_i32_211 = arith.constant 1 : i32
    %511 = vector.broadcast %c1_i32_211 : i32 to vector<16x256xi32>
    %512 = arith.cmpi sge, %19, %511 : vector<16x256xi32>
    %cst_212 = arith.constant 0.000000e+00 : f32
    %513 = vector.broadcast %cst_212 : f32 to vector<16x256xf32>
    %514 = arith.select %512, %510, %513 : vector<16x256xi1>, vector<16x256xf32>
    %c1184 = arith.constant 1184 : index
    %c0_213 = arith.constant 0 : index
    %515 = vector.load %arg4[%c1184, %c0_213] : memref<1536x16xbf16, #tpu.memory_space<vmem>>, vector<32x16xbf16>
    %516 = arith.truncf %514 : vector<16x256xf32> to vector<16x256xbf16>
    %cst_214 = arith.constant dense<0.000000e+00> : vector<32x256xf32>
    %517 = tpu.matmul %515, %516, %cst_214 {dimension_numbers = #tpu.dot_dimension_numbers<[1], [0], [0], [1], [0, 0, 1, 1], [], []>} : vector<32x16xbf16>, vector<16x256xbf16>, vector<32x256xf32> -> vector<32x256xf32>
    %518 = arith.addf %507, %517 : vector<32x256xf32>
    %c1216 = arith.constant 1216 : index
    %c0_215 = arith.constant 0 : index
    %519 = vector.load %arg4[%c1216, %c0_215] : memref<1536x16xbf16, #tpu.memory_space<vmem>>, vector<32x16xbf16>
    %520 = arith.truncf %495 : vector<16x256xf32> to vector<16x256xbf16>
    %cst_216 = arith.constant dense<0.000000e+00> : vector<32x256xf32>
    %521 = tpu.matmul %519, %520, %cst_216 {dimension_numbers = #tpu.dot_dimension_numbers<[1], [0], [0], [1], [0, 0, 1, 1], [], []>} : vector<32x16xbf16>, vector<16x256xbf16>, vector<32x256xf32> -> vector<32x256xf32>
    %522 = arith.addf %518, %521 : vector<32x256xf32>
    %523 = vector.extract_strided_slice %495 {offsets = [0, 1], sizes = [16, 255], strides = [1, 1]} : vector<16x256xf32> to vector<16x255xf32>
    %cst_217 = arith.constant 0.000000e+00 : f32
    %524 = vector.broadcast %cst_217 : f32 to vector<16x1xf32>
    %525 = tpu.concatenate %523, %524 in 1 : vector<16x255xf32>, vector<16x1xf32> -> vector<16x256xf32>
    %c127_i32_218 = arith.constant 127 : i32
    %526 = vector.broadcast %c127_i32_218 : i32 to vector<16x256xi32>
    %527 = arith.cmpi slt, %19, %526 : vector<16x256xi32>
    %cst_219 = arith.constant 0.000000e+00 : f32
    %528 = vector.broadcast %cst_219 : f32 to vector<16x256xf32>
    %529 = arith.select %527, %525, %528 : vector<16x256xi1>, vector<16x256xf32>
    %c1248 = arith.constant 1248 : index
    %c0_220 = arith.constant 0 : index
    %530 = vector.load %arg4[%c1248, %c0_220] : memref<1536x16xbf16, #tpu.memory_space<vmem>>, vector<32x16xbf16>
    %531 = arith.truncf %529 : vector<16x256xf32> to vector<16x256xbf16>
    %cst_221 = arith.constant dense<0.000000e+00> : vector<32x256xf32>
    %532 = tpu.matmul %530, %531, %cst_221 {dimension_numbers = #tpu.dot_dimension_numbers<[1], [0], [0], [1], [0, 0, 1, 1], [], []>} : vector<32x16xbf16>, vector<16x256xbf16>, vector<32x256xf32> -> vector<32x256xf32>
    %533 = arith.addf %522, %532 : vector<32x256xf32>
    %534 = vector.extract_strided_slice %495 {offsets = [0, 2], sizes = [16, 254], strides = [1, 1]} : vector<16x256xf32> to vector<16x254xf32>
    %cst_222 = arith.constant 0.000000e+00 : f32
    %535 = vector.broadcast %cst_222 : f32 to vector<16x2xf32>
    %536 = tpu.concatenate %534, %535 in 1 : vector<16x254xf32>, vector<16x2xf32> -> vector<16x256xf32>
    %c126_i32_223 = arith.constant 126 : i32
    %537 = vector.broadcast %c126_i32_223 : i32 to vector<16x256xi32>
    %538 = arith.cmpi slt, %19, %537 : vector<16x256xi32>
    %cst_224 = arith.constant 0.000000e+00 : f32
    %539 = vector.broadcast %cst_224 : f32 to vector<16x256xf32>
    %540 = arith.select %538, %536, %539 : vector<16x256xi1>, vector<16x256xf32>
    %c1280 = arith.constant 1280 : index
    %c0_225 = arith.constant 0 : index
    %541 = vector.load %arg4[%c1280, %c0_225] : memref<1536x16xbf16, #tpu.memory_space<vmem>>, vector<32x16xbf16>
    %542 = arith.truncf %540 : vector<16x256xf32> to vector<16x256xbf16>
    %cst_226 = arith.constant dense<0.000000e+00> : vector<32x256xf32>
    %543 = tpu.matmul %541, %542, %cst_226 {dimension_numbers = #tpu.dot_dimension_numbers<[1], [0], [0], [1], [0, 0, 1, 1], [], []>} : vector<32x16xbf16>, vector<16x256xbf16>, vector<32x256xf32> -> vector<32x256xf32>
    %544 = arith.addf %533, %543 : vector<32x256xf32>
    %545 = vector.extract_strided_slice %544 {offsets = [0, 0], sizes = [16, 256], strides = [1, 1]} : vector<32x256xf32> to vector<16x256xf32>
    %546 = math.tanh %545 : vector<16x256xf32>
    %547 = vector.extract_strided_slice %544 {offsets = [16, 0], sizes = [16, 256], strides = [1, 1]} : vector<32x256xf32> to vector<16x256xf32>
    %548 = arith.negf %547 : vector<16x256xf32>
    %549 = math.exp %548 : vector<16x256xf32>
    %cst_227 = arith.constant 1.000000e+00 : f32
    %550 = vector.broadcast %cst_227 : f32 to vector<16x256xf32>
    %551 = arith.addf %550, %549 : vector<16x256xf32>
    %552 = arith.divf %550, %551 : vector<16x256xf32>
    %553 = arith.mulf %546, %552 : vector<16x256xf32>
    %c1472 = arith.constant 1472 : index
    %c0_228 = arith.constant 0 : index
    %554 = vector.load %arg4[%c1472, %c0_228] : memref<1536x16xbf16, #tpu.memory_space<vmem>>, vector<32x16xbf16>
    %555 = arith.truncf %553 : vector<16x256xf32> to vector<16x256xbf16>
    %cst_229 = arith.constant dense<0.000000e+00> : vector<32x256xf32>
    %556 = tpu.matmul %554, %555, %cst_229 {dimension_numbers = #tpu.dot_dimension_numbers<[1], [0], [0], [1], [0, 0, 1, 1], [], []>} : vector<32x16xbf16>, vector<16x256xbf16>, vector<32x256xf32> -> vector<32x256xf32>
    %c256_230 = arith.constant 256 : index
    %c0_231 = arith.constant 0 : index
    %557 = vector.load %arg5[%c256_230, %c0_231] : memref<320x1xf32, #tpu.memory_space<vmem>>, vector<32x1xf32>
    %558 = vector.broadcast %557 : vector<32x1xf32> to vector<32x256xf32>
    %559 = arith.addf %556, %558 : vector<32x256xf32>
    %560 = vector.extract_strided_slice %559 {offsets = [0, 0], sizes = [16, 256], strides = [1, 1]} : vector<32x256xf32> to vector<16x256xf32>
    %561 = arith.addf %495, %560 : vector<16x256xf32>
    %562 = vector.broadcast %0 : vector<1x256xf32> to vector<16x256xf32>
    %563 = arith.mulf %561, %562 : vector<16x256xf32>
    %564 = vector.extract_strided_slice %559 {offsets = [16, 0], sizes = [16, 256], strides = [1, 1]} : vector<32x256xf32> to vector<16x256xf32>
    %c224_232 = arith.constant 224 : index
    %c0_233 = arith.constant 0 : index
    %565 = vector.load %arg2[%c224_232, %c0_233] : memref<256x256xf32, #tpu.memory_space<vmem>>, vector<32x256xf32>
    %cst_234 = arith.constant 0.000000e+00 : f32
    %566 = vector.broadcast %cst_234 : f32 to vector<16x2xf32>
    %567 = vector.extract_strided_slice %563 {offsets = [0, 0], sizes = [16, 254], strides = [1, 1]} : vector<16x256xf32> to vector<16x254xf32>
    %568 = tpu.concatenate %566, %567 in 1 : vector<16x2xf32>, vector<16x254xf32> -> vector<16x256xf32>
    %c2_i32_235 = arith.constant 2 : i32
    %569 = vector.broadcast %c2_i32_235 : i32 to vector<16x256xi32>
    %570 = arith.cmpi sge, %19, %569 : vector<16x256xi32>
    %cst_236 = arith.constant 0.000000e+00 : f32
    %571 = vector.broadcast %cst_236 : f32 to vector<16x256xf32>
    %572 = arith.select %570, %568, %571 : vector<16x256xi1>, vector<16x256xf32>
    %c1312 = arith.constant 1312 : index
    %c0_237 = arith.constant 0 : index
    %573 = vector.load %arg4[%c1312, %c0_237] : memref<1536x16xbf16, #tpu.memory_space<vmem>>, vector<32x16xbf16>
    %574 = arith.truncf %572 : vector<16x256xf32> to vector<16x256xbf16>
    %cst_238 = arith.constant dense<0.000000e+00> : vector<32x256xf32>
    %575 = tpu.matmul %573, %574, %cst_238 {dimension_numbers = #tpu.dot_dimension_numbers<[1], [0], [0], [1], [0, 0, 1, 1], [], []>} : vector<32x16xbf16>, vector<16x256xbf16>, vector<32x256xf32> -> vector<32x256xf32>
    %576 = arith.addf %565, %575 : vector<32x256xf32>
    %cst_239 = arith.constant 0.000000e+00 : f32
    %577 = vector.broadcast %cst_239 : f32 to vector<16x1xf32>
    %578 = vector.extract_strided_slice %563 {offsets = [0, 0], sizes = [16, 255], strides = [1, 1]} : vector<16x256xf32> to vector<16x255xf32>
    %579 = tpu.concatenate %577, %578 in 1 : vector<16x1xf32>, vector<16x255xf32> -> vector<16x256xf32>
    %c1_i32_240 = arith.constant 1 : i32
    %580 = vector.broadcast %c1_i32_240 : i32 to vector<16x256xi32>
    %581 = arith.cmpi sge, %19, %580 : vector<16x256xi32>
    %cst_241 = arith.constant 0.000000e+00 : f32
    %582 = vector.broadcast %cst_241 : f32 to vector<16x256xf32>
    %583 = arith.select %581, %579, %582 : vector<16x256xi1>, vector<16x256xf32>
    %c1344 = arith.constant 1344 : index
    %c0_242 = arith.constant 0 : index
    %584 = vector.load %arg4[%c1344, %c0_242] : memref<1536x16xbf16, #tpu.memory_space<vmem>>, vector<32x16xbf16>
    %585 = arith.truncf %583 : vector<16x256xf32> to vector<16x256xbf16>
    %cst_243 = arith.constant dense<0.000000e+00> : vector<32x256xf32>
    %586 = tpu.matmul %584, %585, %cst_243 {dimension_numbers = #tpu.dot_dimension_numbers<[1], [0], [0], [1], [0, 0, 1, 1], [], []>} : vector<32x16xbf16>, vector<16x256xbf16>, vector<32x256xf32> -> vector<32x256xf32>
    %587 = arith.addf %576, %586 : vector<32x256xf32>
    %c1376 = arith.constant 1376 : index
    %c0_244 = arith.constant 0 : index
    %588 = vector.load %arg4[%c1376, %c0_244] : memref<1536x16xbf16, #tpu.memory_space<vmem>>, vector<32x16xbf16>
    %589 = arith.truncf %563 : vector<16x256xf32> to vector<16x256xbf16>
    %cst_245 = arith.constant dense<0.000000e+00> : vector<32x256xf32>
    %590 = tpu.matmul %588, %589, %cst_245 {dimension_numbers = #tpu.dot_dimension_numbers<[1], [0], [0], [1], [0, 0, 1, 1], [], []>} : vector<32x16xbf16>, vector<16x256xbf16>, vector<32x256xf32> -> vector<32x256xf32>
    %591 = arith.addf %587, %590 : vector<32x256xf32>
    %592 = vector.extract_strided_slice %563 {offsets = [0, 1], sizes = [16, 255], strides = [1, 1]} : vector<16x256xf32> to vector<16x255xf32>
    %cst_246 = arith.constant 0.000000e+00 : f32
    %593 = vector.broadcast %cst_246 : f32 to vector<16x1xf32>
    %594 = tpu.concatenate %592, %593 in 1 : vector<16x255xf32>, vector<16x1xf32> -> vector<16x256xf32>
    %c127_i32_247 = arith.constant 127 : i32
    %595 = vector.broadcast %c127_i32_247 : i32 to vector<16x256xi32>
    %596 = arith.cmpi slt, %19, %595 : vector<16x256xi32>
    %cst_248 = arith.constant 0.000000e+00 : f32
    %597 = vector.broadcast %cst_248 : f32 to vector<16x256xf32>
    %598 = arith.select %596, %594, %597 : vector<16x256xi1>, vector<16x256xf32>
    %c1408 = arith.constant 1408 : index
    %c0_249 = arith.constant 0 : index
    %599 = vector.load %arg4[%c1408, %c0_249] : memref<1536x16xbf16, #tpu.memory_space<vmem>>, vector<32x16xbf16>
    %600 = arith.truncf %598 : vector<16x256xf32> to vector<16x256xbf16>
    %cst_250 = arith.constant dense<0.000000e+00> : vector<32x256xf32>
    %601 = tpu.matmul %599, %600, %cst_250 {dimension_numbers = #tpu.dot_dimension_numbers<[1], [0], [0], [1], [0, 0, 1, 1], [], []>} : vector<32x16xbf16>, vector<16x256xbf16>, vector<32x256xf32> -> vector<32x256xf32>
    %602 = arith.addf %591, %601 : vector<32x256xf32>
    %603 = vector.extract_strided_slice %563 {offsets = [0, 2], sizes = [16, 254], strides = [1, 1]} : vector<16x256xf32> to vector<16x254xf32>
    %cst_251 = arith.constant 0.000000e+00 : f32
    %604 = vector.broadcast %cst_251 : f32 to vector<16x2xf32>
    %605 = tpu.concatenate %603, %604 in 1 : vector<16x254xf32>, vector<16x2xf32> -> vector<16x256xf32>
    %c126_i32_252 = arith.constant 126 : i32
    %606 = vector.broadcast %c126_i32_252 : i32 to vector<16x256xi32>
    %607 = arith.cmpi slt, %19, %606 : vector<16x256xi32>
    %cst_253 = arith.constant 0.000000e+00 : f32
    %608 = vector.broadcast %cst_253 : f32 to vector<16x256xf32>
    %609 = arith.select %607, %605, %608 : vector<16x256xi1>, vector<16x256xf32>
    %c1440 = arith.constant 1440 : index
    %c0_254 = arith.constant 0 : index
    %610 = vector.load %arg4[%c1440, %c0_254] : memref<1536x16xbf16, #tpu.memory_space<vmem>>, vector<32x16xbf16>
    %611 = arith.truncf %609 : vector<16x256xf32> to vector<16x256xbf16>
    %cst_255 = arith.constant dense<0.000000e+00> : vector<32x256xf32>
    %612 = tpu.matmul %610, %611, %cst_255 {dimension_numbers = #tpu.dot_dimension_numbers<[1], [0], [0], [1], [0, 0, 1, 1], [], []>} : vector<32x16xbf16>, vector<16x256xbf16>, vector<32x256xf32> -> vector<32x256xf32>
    %613 = arith.addf %602, %612 : vector<32x256xf32>
    %614 = vector.extract_strided_slice %613 {offsets = [0, 0], sizes = [16, 256], strides = [1, 1]} : vector<32x256xf32> to vector<16x256xf32>
    %615 = math.tanh %614 : vector<16x256xf32>
    %616 = vector.extract_strided_slice %613 {offsets = [16, 0], sizes = [16, 256], strides = [1, 1]} : vector<32x256xf32> to vector<16x256xf32>
    %617 = arith.negf %616 : vector<16x256xf32>
    %618 = math.exp %617 : vector<16x256xf32>
    %cst_256 = arith.constant 1.000000e+00 : f32
    %619 = vector.broadcast %cst_256 : f32 to vector<16x256xf32>
    %620 = arith.addf %619, %618 : vector<16x256xf32>
    %621 = arith.divf %619, %620 : vector<16x256xf32>
    %622 = arith.mulf %615, %621 : vector<16x256xf32>
    %c1504 = arith.constant 1504 : index
    %c0_257 = arith.constant 0 : index
    %623 = vector.load %arg4[%c1504, %c0_257] : memref<1536x16xbf16, #tpu.memory_space<vmem>>, vector<16x16xbf16>
    %624 = arith.truncf %622 : vector<16x256xf32> to vector<16x256xbf16>
    %cst_258 = arith.constant dense<0.000000e+00> : vector<16x256xf32>
    %625 = tpu.matmul %623, %624, %cst_258 {dimension_numbers = #tpu.dot_dimension_numbers<[1], [0], [0], [1], [0, 0, 1, 1], [], []>} : vector<16x16xbf16>, vector<16x256xbf16>, vector<16x256xf32> -> vector<16x256xf32>
    %c288_259 = arith.constant 288 : index
    %c0_260 = arith.constant 0 : index
    %626 = vector.load %arg5[%c288_259, %c0_260] : memref<320x1xf32, #tpu.memory_space<vmem>>, vector<16x1xf32>
    %627 = vector.broadcast %626 : vector<16x1xf32> to vector<16x256xf32>
    %628 = arith.addf %625, %627 : vector<16x256xf32>
    %629 = arith.addf %564, %628 : vector<16x256xf32>
    %630 = vector.broadcast %0 : vector<1x256xf32> to vector<16x256xf32>
    %631 = arith.mulf %629, %630 : vector<16x256xf32>
    %c1520 = arith.constant 1520 : index
    %c0_261 = arith.constant 0 : index
    %632 = vector.load %arg4[%c1520, %c0_261] : memref<1536x16xbf16, #tpu.memory_space<vmem>>, vector<16x16xbf16>
    %633 = arith.truncf %631 : vector<16x256xf32> to vector<16x256xbf16>
    %cst_262 = arith.constant dense<0.000000e+00> : vector<16x256xf32>
    %634 = tpu.matmul %632, %633, %cst_262 {dimension_numbers = #tpu.dot_dimension_numbers<[1], [0], [0], [1], [0, 0, 1, 1], [], []>} : vector<16x16xbf16>, vector<16x256xbf16>, vector<16x256xf32> -> vector<16x256xf32>
    %c304 = arith.constant 304 : index
    %c0_263 = arith.constant 0 : index
    %635 = vector.load %arg5[%c304, %c0_263] : memref<320x1xf32, #tpu.memory_space<vmem>>, vector<16x1xf32>
    %636 = vector.broadcast %635 : vector<16x1xf32> to vector<16x256xf32>
    %637 = arith.addf %634, %636 : vector<16x256xf32>
    %638 = vector.broadcast %0 : vector<1x256xf32> to vector<16x256xf32>
    %639 = arith.mulf %637, %638 : vector<16x256xf32>
    %640 = vector.extract_strided_slice %639 {offsets = [0, 0], sizes = [2, 256], strides = [1, 1]} : vector<16x256xf32> to vector<2x256xf32>
    %641 = vector.broadcast %0 : vector<1x256xf32> to vector<2x256xf32>
    %642 = arith.mulf %331, %641 : vector<2x256xf32>
    %643 = arith.addf %640, %642 : vector<2x256xf32>
    %644 = tpu.concatenate %643, %487 in 0 : vector<2x256xf32>, vector<2x256xf32> -> vector<4x256xf32>
    %c0_264 = arith.constant 0 : index
    %c0_265 = arith.constant 0 : index
    %645 = vector.load %arg6[%c0_264, %c0_265] : memref<4x256xf32, #tpu.memory_space<vmem>>, vector<4x256xf32>
    tpu.vector_store %arg6[%c0_264, %c0_265], %644 {strides = array<i32>} : memref<4x256xf32, #tpu.memory_space<vmem>>, vector<4x256xf32>,
    return
  }
}

</mosaic_0001>

<bundles_post_ra>
// kernel: residual_coupling_block_forward.1
= control target key start
LH: loop header
LB: loop body
LE: loop exit
PB: predicated region body
PF: predicated region fallthrough
CT: control target
= control target key end

     0   :  { %vm83_vm0 = vcmask 1040384   ;;  %v7192_v3 = vmov 0   ;;  %vm79_vm1 = vcmask 15360   ;;  %s8712_s0 = inlined_call_operand.vmem [shape: f32[4,256], index: 0, kind: input, shape index: {}]   ;;  %s8713_s1 = inlined_call_operand.vmem [shape: f32[1,256], index: 1, kind: input, shape index: {}]   ;;  %s8714_s2 = inlined_call_operand.vmem [shape: f32[256,256], index: 2, kind: input, shape index: {}]   ;;  %s8715_s3 = inlined_call_operand.vmem [shape: bf16[64,2], index: 3, kind: input, shape index: {}]   ;;  %s8716_s4 = inlined_call_operand.vmem [shape: bf16[1536,16], index: 4, kind: input, shape index: {}]   ;;  %s8717_s5 = inlined_call_operand.vmem [shape: f32[320,1], index: 5, kind: input, shape index: {}]   ;;  %s8718_s6 = inlined_call_operand.hbm [shape: f32[4,256], index: 6, kind: output, shape index: {}]  }
   0x1   :  { %v26_v0 = vld [vmem:[%s8712_s0] sm:$0x33]  ;;  %122 = vmatprep.mubr.bf16.mxu1 %v7192_v3  ;;  %6552 = vset.pattern.permute.xlu0 %v7192_v3  ;;  %v63_v8 = vld [vmem:[%s8717_s5 + $0x8] sm:$0xff] }
   0x2   :  { %v58_v1 = vcombine.high %v26_v0, %v26_v0  ;;  %v60_v2 = vpack.c.bf16 %v26_v0, %v26_v0  ;;  %v62_v4 = vld [vmem:[%s8717_s5] sm:$0xff]  ;;  %6593 = vset.pattern.permute.xlu1 %v7192_v3  ;;  %892 = vmatprep.mubr.bf16.mxu0 %v7192_v3 }
   0x3   :  { %66 = vperm.xlu0 %6552, %v62_v4   ;;  %v6875_v7 = vld [vmem:[%s8715_s3] sm:$0xff]  }
   0x4   :  { %v61_v5 = vpack.c.bf16 %v58_v1, %v58_v1  ;;  %v85_v6 = vsel %vm83_vm0, %v60_v2, 0 }
   0x6   :  { %5751 = vmatprep.subr.msk.bf16.mxu1 %vm83_vm0, %v61_v5 }
   0x7   :  { %91 = vmatpush1.bf16.msra.mxu1 %v85_v6  ;;  %71 = vperm.xlu0 %6552, %v63_v8  }
   0xa   :  { %5752 = vmatmul.mubr.msk.bf16.vlgmr.msra.gmra.mrb[0].mxu1 %vm79_vm1, %v6875_v7 }
   0xb   :  { %237 = vmatprep.mubr.bf16.mxu1 %v7192_v3 }
   0xc   :  { %11 = vsyncpa [#allocation3], 0  ;;  %v28_v9 = vlaneseq  ;;  %v25_v13 = vld [vmem:[%s8713_s1] sm:$0x3]  ;;  %s7193_s1 = smov 1   ;;  %s7194_s7 = smov 2  }
   0xd   :  { %s7195_s8 = smov 127   ;;  %s7196_s9 = smov 126   ;;  %v705_v33 = vld [vmem:[%s8717_s5 + $0x10] sm:$0xff]  ;;  %vm274_vm5 = vcmask 7168   ;;  %v6876_v58 = vld [vmem:[%s8716_s4] sm:$0xff]   ;;  %vm198_vm9 = vcmask 130048  }
   0xe   :  { %v135_v10 = vshrl.u32 %v28_v9, 7  ;;  %v7291_v35 = vand.u32 127, %v28_v9  ;;  %v6877_v5 = vld [vmem:[%s8716_s4 + $0x8] sm:$0xff]   ;;  %vm463_vm12 = vcmask 1039360   ;;  %v6878_v9 = vld [vmem:[%s8716_s4 + $0x10] sm:$0xff]   ;;  %vm569_vm15 = vcmask 1031168  }
   0xf   :  { %v6964_v51 = vld [vmem:[%s8716_s4 + $0x298] sm:$0xff]   ;;  %v6965_v63 = vld [vmem:[%s8716_s4 + $0x2a0] sm:$0xff]  }
  0x10   :  { %v136_v12 = vsub.s32 0, %v135_v10  ;;  %v140_v14 = vsub.s32 1, %v135_v10  ;;  %v30_v36 = vadd.s32 128, %v7291_v35  ;;  %vm176_vm3 = vcmp.ge.s32.totalorder %v7291_v35, 2 }
  0x11   :  { %vm7306_vm6 = vmpackc.low %vm176_vm3, %vm176_vm3  ;;  %vm283_vm8 = vcmp.ge.s32.totalorder %v7291_v35, 1 }
  0x12   :  { %v7256_v15 = vrot.slane %v25_v13, %v136_v12  ;;  %v7258_v18 = vrot.slane %v25_v13, %v140_v14  ;;  %v7294_v38 = vand.u32 127, %v30_v36  ;;  %vm7327_vm11 = vmpackc.low %vm283_vm8, %vm283_vm8  ;;  %v6967_v13 = vld [vmem:[%s8716_s4 + $0x2b0] sm:$0xff]   ;;  %v6969_v36 = vld [vmem:[%s8716_s4 + $0x2c0] sm:$0xff]  }
  0x14   :  { %vm177_vm2 = vcmp.ge.s32.totalorder %v7294_v38, 2  ;;  %vm284_vm7 = vcmp.ge.s32.totalorder %v7294_v38, 1  ;;  %vm473_vm13 = vcmp.lt.s32.totalorder %v7294_v38, 127  ;;  %vm579_vm3 = vcmp.lt.s32.totalorder %v7294_v38, 126  ;;  %v6881_v38 = vld [vmem:[%s8716_s4 + $0x28] sm:$0xff]  }
  0x15   :  { %vm7302_vm4 = vmpackc.low %vm177_vm2, %vm177_vm2  ;;  %vm472_vm2 = vcmp.lt.s32.totalorder %v7291_v35, 127 }
  0x16   :  { %vm7323_vm10 = vmpackc.low %vm284_vm7, %vm284_vm7 }
  0x17   :  { %vm7352_vm14 = vmpackc.low %vm473_vm13, %vm473_vm13  ;;  %vm578_vm13 = vcmp.lt.s32.totalorder %v7291_v35, 126  ;;  %v6883_v35 = vld [vmem:[%s8716_s4 + $0x38] sm:$0xff]  }
  0x18   :  { %vm7374_vm7 = vmpackc.low %vm472_vm2, %vm472_vm2 }
  0x19   :  { %vm7378_vm8 = vmpackc.low %vm579_vm3, %vm579_vm3 }
  0x1a   :  { %vm7399_vm2 = vmpackc.low %vm578_vm13, %vm578_vm13 }
  0x82   :  { %v67_v11 = vpop.permute.xlu0 %66 }
  0x86   :  { %v72_v17 = vpop.permute.xlu0 %71 }
  0xdd   :  { %v124_v16 = vpop.f32.mrb[0].mxu1 }
  0xde   :  { %v125_v19 = vadd.f32 %v124_v16, %v67_v11  ;;  %v126_v20 = vpop.f32.mrb[1].mxu1  ;;  %v6879_v16 = vld [vmem:[%s8716_s4 + $0x18] sm:$0xff]  }
  0xdf   :  { %v127_v21 = vadd.f32 %v126_v20, %v67_v11  ;;  %v128_v22 = vpop.f32.mrb[2].mxu1 }
  0xe0   :  { %v7261_v23 = vmul.f32 %v7256_v15, %v125_v19  ;;  %v129_v24 = vadd.f32 %v128_v22, %v72_v17  ;;  %v130_v25 = vpop.f32.mrb[3].mxu1 }
  0xe1   :  { %v7264_v26 = vmul.f32 %v7258_v18, %v127_v21  ;;  %v131_v27 = vadd.f32 %v130_v25, %v72_v17 }
  0xe2   :  { %v7267_v28 = vmul.f32 %v7256_v15, %v129_v24 }
  0xe3   :  { %v7270_v29 = vmul.f32 %v7258_v18, %v131_v27  ;;  %v6563_v30 = vpack.i.bf16 %v7264_v26, %v7261_v23 }
  0xe4   :  { %v6578_v34 = vpack.i.bf16 %v7267_v28, %v7261_v23  ;;  %v376_v12 = vpack.c.bf16 %v7267_v28, %v7261_v23 }
  0xe5   :  { %6564 = vrot.lane.b32.xlu0 %v6563_v30, %s7193_s1  ;;  %6554 = vrot.lane.b32.xlu1 %v6563_v30, %s7194_s7  ;;  %v6573_v31 = vpack.i.bf16 %v7270_v29, %v7264_v26  ;;  %v6558_v32 = vpack.i.bf16 %v7270_v29, %v7267_v28  ;;  %v377_v4 = vpack.c.bf16 %v7270_v29, %v7264_v26  ;;  %v6880_v30 = vld [vmem:[%s8716_s4 + $0x20] sm:$0xff]  }
  0xe9   :  { %6574 = vrot.lane.b32.xlu0 %v6573_v31, %s7195_s8  ;;  %6559 = vrot.lane.b32.xlu1 %v6558_v32, %s7194_s7 }
  0xed   :  { %6584 = vrot.lane.b32.xlu0 %v6573_v31, %s7196_s9  ;;  %6569 = vrot.lane.b32.xlu1 %v6558_v32, %s7193_s1 }
  0xf1   :  { %711 = vperm.xlu0 %6552, %v705_v33   ;;  %6579 = vrot.lane.b32.xlu1 %v6578_v34, %s7195_s8 }
  0xf5   :  { %6589 = vrot.lane.b32.xlu1 %v6578_v34, %s7196_s9 }
 0x157   :  { %v6555_v37 = vpop.permute.xlu1 %6554  ;;  %v6565_v39 = vpop.permute.xlu0 %6564 }
 0x158   :  { %v6557_v40 = vunpack.i.h.bf16 %v6555_v37  ;;  %v6556_v41 = vunpack.i.l.bf16 %v6555_v37  ;;  %v6567_v45 = vunpack.i.h.bf16 %v6565_v39  ;;  %v6566_v46 = vunpack.i.l.bf16 %v6565_v39 }
 0x15a   :  { %v168_v47 = vsel %vm79_vm1, %v6556_v41, %v6557_v40  ;;  %v174_v48 = vsel %vm79_vm1, 0.0, %v6556_v41  ;;  %v275_v59 = vsel %vm274_vm5, %v6566_v46, %v6567_v45  ;;  %v281_v60 = vsel %vm274_vm5, 0.0, %v6566_v46  ;;  %v6972_v45 = vld [vmem:[%s8716_s4 + $0x2d8] sm:$0xff]  }
 0x15b   :  { %v6560_v42 = vpop.permute.xlu1 %6559  ;;  %v6575_v6 = vpop.permute.xlu0 %6574 }
 0x15c   :  { %v6562_v43 = vunpack.i.h.bf16 %v6560_v42  ;;  %v6561_v44 = vunpack.i.l.bf16 %v6560_v42  ;;  %v6577_v7 = vunpack.i.h.bf16 %v6575_v6  ;;  %v6576_v8 = vunpack.i.l.bf16 %v6575_v6 }
 0x15e   :  { %v169_v49 = vsel %vm79_vm1, %v6561_v44, %v6562_v43  ;;  %v175_v50 = vsel %vm79_vm1, 0.0, %v6561_v44  ;;  %v471_v10 = vsel %vm463_vm12, %v6577_v7, 0.0  ;;  %v470_v11 = vsel %vm463_vm12, %v6576_v8, 0.0  ;;  %v6882_v44 = vld [vmem:[%s8716_s4 + $0x30] sm:$0xff]  }
 0x15f   :  { %v5756_v52 = vpack.c.bf16 %v169_v49, %v168_v47  ;;  %v5759_v53 = vpack.c.bf16 %v175_v50, %v174_v48  ;;  %v6570_v54 = vpop.permute.xlu1 %6569  ;;  %v5780_v14 = vpack.c.bf16 %v471_v10, %v470_v11  ;;  %v6585_v19 = vpop.permute.xlu0 %6584  ;;  %v6884_v47 = vld [vmem:[%s8716_s4 + $0x40] sm:$0xff]   ;;  %v6885_v48 = vld [vmem:[%s8716_s4 + $0x48] sm:$0xff]   ;;  %v706_v49 = vld [vmem:[%s8717_s5 + $0x18] sm:$0xff] }
 0x160   :  { %v6572_v56 = vunpack.i.h.bf16 %v6570_v54  ;;  %v6571_v57 = vunpack.i.l.bf16 %v6570_v54  ;;  %v6587_v22 = vunpack.i.h.bf16 %v6585_v19  ;;  %v6586_v24 = vunpack.i.l.bf16 %v6585_v19  ;;  %716 = vperm.xlu1 %6593, %v706_v49   ;;  %v148_v11 = vld [vmem:[%s8714_s2] sm:$0xff] }
 0x161   :  { %5757 = vmatprep.subr.msk.bf16.mxu1 %vm7302_vm4, %v5756_v52 }
 0x162   :  { %v276_v61 = vsel %vm274_vm5, %v6571_v57, %v6572_v56  ;;  %v282_v62 = vsel %vm274_vm5, 0.0, %v6571_v57  ;;  %5760 = vmatpush1.bf16.msk.msra.mxu1 %vm7306_vm6, %v5759_v53  ;;  %v577_v31 = vsel %vm569_vm15, %v6587_v22, 0.0  ;;  %v576_v32 = vsel %vm569_vm15, %v6586_v24, 0.0  ;;  %v152_v56 = vld [vmem:[%s8714_s2 + $0x20] sm:$0xff]  ;;  %v153_v57 = vld [vmem:[%s8714_s2 + $0x28] sm:$0xff] }
 0x163   :  { %v5766_v0 = vpack.c.bf16 %v276_v61, %v275_v59  ;;  %v5769_v1 = vpack.c.bf16 %v282_v62, %v281_v60  ;;  %v6580_v17 = vpop.permute.xlu1 %6579  ;;  %v5790_v37 = vpack.c.bf16 %v577_v31, %v576_v32  ;;  %v154_v59 = vld [vmem:[%s8714_s2 + $0x30] sm:$0xff]  ;;  %v155_v62 = vld [vmem:[%s8714_s2 + $0x38] sm:$0xff] }
 0x164   :  { %v6582_v20 = vunpack.i.h.bf16 %v6580_v17  ;;  %v6581_v21 = vunpack.i.l.bf16 %v6580_v17  ;;  %v151_v17 = vld [vmem:[%s8714_s2 + $0x18] sm:$0xff] }
 0x165   :  { %5761 = vmatmul.mubr.msk.bf16.vlgmr.msra.gmra.mrb[4].mxu1 %vm198_vm9, %v6876_v58  ;;  %5767 = vmatprep.subr.msk.bf16.mxu1 %vm7323_vm10, %v5766_v0 }
 0x166   :  { %5770 = vmatpush1.bf16.msk.msra.mxu1 %vm7327_vm11, %v5769_v1  ;;  %247 = vmatprep.mubr.bf16.mxu1 %v7192_v3  ;;  %v465_v25 = vsel %vm463_vm12, %v6582_v20, %v6577_v7  ;;  %v464_v27 = vsel %vm463_vm12, %v6581_v21, %v6576_v8 }
 0x167   :  { %394 = vmatprep.subr.bf16.mxu1 %v377_v4  ;;  %v5783_v34 = vpack.c.bf16 %v465_v25, %v464_v27  ;;  %v6590_v39 = vpop.permute.xlu1 %6589 }
 0x168   :  { %v6592_v40 = vunpack.i.h.bf16 %v6590_v39  ;;  %v6591_v41 = vunpack.i.l.bf16 %v6590_v39 }
 0x16a   :  { %v571_v42 = vsel %vm569_vm15, %v6592_v40, %v6587_v22  ;;  %v570_v43 = vsel %vm569_vm15, %v6591_v41, %v6586_v24 }
 0x16b   :  { %v5793_v46 = vpack.c.bf16 %v571_v42, %v570_v43 }
 0x16d   :  { %5762 = vmatmul.mubr.msk.bf16.gmra.mrb[8].mxu1 %vm198_vm9, %v6877_v5 }
 0x16e   :  { %343 = vmatprep.mubr.bf16.mxu1 %v7192_v3 }
 0x175   :  { %5771 = vmatmul.mubr.msk.bf16.vlgmr.msra.gmra.mrb[4].mxu1 %vm198_vm9, %v6878_v9 }
 0x176   :  { %395 = vmatpush1.bf16.msra.mxu1 %v376_v12  ;;  %353 = vmatprep.mubr.bf16.mxu1 %v7192_v3  ;;  %v149_v12 = vld [vmem:[%s8714_s2 + $0x8] sm:$0xff] }
 0x177   :  { %5781 = vmatprep.subr.msk.bf16.mxu1 %vm7352_vm14, %v5780_v14  ;;  %v150_v14 = vld [vmem:[%s8714_s2 + $0x10] sm:$0xff] }
 0x17d   :  { %5772 = vmatmul.mubr.msk.bf16.gmra.mrb[8].mxu1 %vm198_vm9, %v6879_v16 }
 0x17e   :  { %426 = vmatprep.mubr.bf16.mxu1 %v7192_v3 }
 0x185   :  { %5775 = vmatmul.mubr.msk.bf16.vlgmr.msra.gmra.mrb[4].mxu1 %vm198_vm9, %v6880_v30 }
 0x186   :  { %5784 = vmatpush1.bf16.msk.msra.mxu1 %vm7374_vm7, %v5783_v34  ;;  %436 = vmatprep.mubr.bf16.mxu1 %v7192_v3 }
 0x187   :  { %5791 = vmatprep.subr.msk.bf16.mxu1 %vm7378_vm8, %v5790_v37 }
 0x18d   :  { %5776 = vmatmul.mubr.msk.bf16.gmra.mrb[8].mxu1 %vm198_vm9, %v6881_v38 }
 0x18e   :  { %532 = vmatprep.mubr.bf16.mxu1 %v7192_v3 }
 0x195   :  { %5785 = vmatmul.mubr.msk.bf16.vlgmr.msra.gmra.mrb[4].mxu1 %vm198_vm9, %v6882_v44 }
 0x196   :  { %5794 = vmatpush1.bf16.msk.msra.mxu1 %vm7399_vm2, %v5793_v46  ;;  %542 = vmatprep.mubr.bf16.mxu1 %v7192_v3 }
 0x19d   :  { %5786 = vmatmul.mubr.msk.bf16.gmra.mrb[8].mxu1 %vm198_vm9, %v6883_v35 }
 0x19e   :  { %638 = vmatprep.mubr.bf16.mxu1 %v7192_v3 }
 0x1a5   :  { %5795 = vmatmul.mubr.msk.bf16.vlgmr.msra.gmra.mrb[4].mxu1 %vm198_vm9, %v6884_v47 }
 0x1a6   :  { %648 = vmatprep.mubr.bf16.mxu1 %v7192_v3 }
 0x1ad   :  { %5796 = vmatmul.mubr.msk.bf16.gmra.mrb[8].mxu1 %vm198_vm9, %v6885_v48 }
 0x1ae   :  { %777 = vmatprep.mubr.bf16.mxu1 %v7192_v3 }
 0x278   :  { %v640_v50 = vpop.f32.mrb[4].mxu1 }
 0x279   :  { %v642_v52 = vpop.f32.mrb[5].mxu1  ;;  %v6178_v16 = vadd.f32 %v640_v50, %v148_v11 }
 0x27a   :  { %v644_v53 = vpop.f32.mrb[6].mxu1  ;;  %v6179_v19 = vadd.f32 %v642_v52, %v149_v12  ;;  %v6886_v52 = vld [vmem:[%s8716_s4 + $0xa0] sm:$0xff]  }
 0x27b   :  { %v646_v54 = vpop.f32.mrb[7].mxu1  ;;  %v6180_v20 = vadd.f32 %v644_v53, %v150_v14  ;;  %v6887_v53 = vld [vmem:[%s8716_s4 + $0xa8] sm:$0xff]  }
 0x27c   :  { %v6181_v21 = vadd.f32 %v646_v54, %v151_v17  ;;  %v712_v54 = vpop.permute.xlu0 %711  ;;  %v707_v17 = vld [vmem:[%s8717_s5 + $0x20] sm:$0xff] }
 0x280   :  { %v650_v58 = vpop.f32.mrb[8].mxu1 }
 0x281   :  { %v6182_v60 = vadd.f32 %v650_v58, %v152_v56  ;;  %v652_v61 = vpop.f32.mrb[9].mxu1 }
 0x282   :  { %v6183_v0 = vadd.f32 %v652_v61, %v153_v57  ;;  %v654_v1 = vpop.f32.mrb[10].mxu1  ;;  %v717_v57 = vpop.permute.xlu1 %716 }
 0x283   :  { %v5797_v4 = vmul.f32 -1.442695, %v6182_v60  ;;  %v6184_v5 = vadd.f32 %v654_v1, %v154_v59  ;;  %v656_v6 = vpop.f32.mrb[11].mxu1 }
 0x284   :  { %v5798_v7 = vmul.f32 -1.442695, %v6183_v0  ;;  %v6185_v8 = vadd.f32 %v656_v6, %v155_v62 }
 0x285   :  { %6975 = vpow2.f32 %v5797_v4  ;;  %v5799_v9 = vmul.f32 -1.442695, %v6184_v5 }
 0x286   :  { %6977 = vpow2.f32 %v5798_v7  ;;  %v5800_v10 = vmul.f32 -1.442695, %v6185_v8 }
 0x287   :  { %6979 = vpow2.f32 %v5799_v9 }
 0x288   :  { %6981 = vpow2.f32 %v5800_v10 }
 0x289   :  { %6983 = vtanh.f32 %v6178_v16 }
 0x28a   :  { %6985 = vtanh.f32 %v6179_v19  ;;  %v708_v19 = vld [vmem:[%s8717_s5 + $0x28] sm:$0xff] }
 0x28b   :  { %6987 = vtanh.f32 %v6180_v20 }
 0x28c   :  { %6989 = vtanh.f32 %v6181_v21 }
 0x28f   :  { %v6976_v22 = vpop.eup %6975 }
 0x290   :  { %v6978_v24 = vpop.eup %6977  ;;  %v683_v25 = vadd.f32 1.0, %v6976_v22  ;;  %v1349_v22 = vld [vmem:[%s8717_s5 + $0x30] sm:$0xff] }
 0x291   :  { %v6980_v27 = vpop.eup %6979  ;;  %v684_v30 = vadd.f32 1.0, %v6978_v24 }
 0x292   :  { %v6982_v31 = vpop.eup %6981  ;;  %6991 = vrcp.f32 %v683_v25  ;;  %v685_v32 = vadd.f32 1.0, %v6980_v27  ;;  %v1350_v25 = vld [vmem:[%s8717_s5 + $0x38] sm:$0xff]  ;;  %v1424_v27 = vld [vmem:[%s8717_s5 + $0x40] sm:$0xff] }
 0x293   :  { %6993 = vrcp.f32 %v684_v30  ;;  %v686_v34 = vadd.f32 1.0, %v6982_v31  ;;  %v6984_v37 = vpop.eup %6983  ;;  %v1502_v30 = vld [vmem:[%s8717_s5 + $0x50] sm:$0xff]  ;;  %v1503_v31 = vld [vmem:[%s8717_s5 + $0x58] sm:$0xff] }
 0x294   :  { %6995 = vrcp.f32 %v685_v32  ;;  %v6986_v38 = vpop.eup %6985 }
 0x295   :  { %6997 = vrcp.f32 %v686_v34  ;;  %v6988_v39 = vpop.eup %6987 }
 0x296   :  { %v6990_v40 = vpop.eup %6989 }
 0x29c   :  { %v6992_v41 = vpop.eup %6991 }
 0x29d   :  { %v6994_v42 = vpop.eup %6993  ;;  %v695_v43 = vmul.f32 %v6992_v41, %v6984_v37 }
 0x29e   :  { %v6996_v44 = vpop.eup %6995  ;;  %v696_v46 = vmul.f32 %v6994_v42, %v6986_v38 }
 0x29f   :  { %v6998_v35 = vpop.eup %6997  ;;  %v697_v47 = vmul.f32 %v6996_v44, %v6988_v39 }
 0x2a0   :  { %v698_v48 = vmul.f32 %v6998_v35, %v6990_v40 }
 0x2a1   :  { %v703_v49 = vpack.c.bf16 %v697_v47, %v695_v43 }
 0x2a2   :  { %v704_v50 = vpack.c.bf16 %v698_v48, %v696_v46 }
 0x2a4   :  { %745 = vmatprep.subr.bf16.mxu1 %v704_v50 }
 0x2a5   :  { %746 = vmatpush1.bf16.msra.mxu1 %v703_v49 }
 0x2a8   :  { %5803 = vmatmul.mubr.msk.bf16.vlgmr.msra.gmra.mrb[12].mxu1 %vm198_vm9, %v6886_v52 }
 0x2a9   :  { %787 = vmatprep.mubr.bf16.mxu1 %v7192_v3 }
 0x2b0   :  { %5804 = vmatmul.mubr.msk.bf16.gmra.mrb[16].mxu1 %vm198_vm9, %v6887_v53 }
 0x2b1   :  { %1475 = vmatprep.mubr.bf16.mxu1 %v7192_v3 }
 0x37b   :  { %v779_v56 = vpop.f32.mrb[12].mxu1 }
 0x37c   :  { %v780_v58 = vadd.f32 %v779_v56, %v712_v54  ;;  %v781_v59 = vpop.f32.mrb[13].mxu1 }
 0x37d   :  { %v782_v60 = vadd.f32 %v781_v59, %v712_v54  ;;  %v783_v61 = vpop.f32.mrb[14].mxu1  ;;  %v6888_v54 = vld [vmem:[%s8716_s4 + $0x50] sm:$0xff]  }
 0x37e   :  { %v798_v62 = vadd.f32 %v780_v58, %v7261_v23  ;;  %v784_v0 = vadd.f32 %v783_v61, %v717_v57  ;;  %v785_v1 = vpop.f32.mrb[15].mxu1 }
 0x37f   :  { %v799_v4 = vadd.f32 %v782_v60, %v7264_v26  ;;  %v786_v5 = vadd.f32 %v785_v1, %v717_v57 }
 0x380   :  { %v7462_v6 = vmul.f32 %v798_v62, %v7256_v15  ;;  %v800_v7 = vadd.f32 %v784_v0, %v7267_v28  ;;  %v6889_v62 = vld [vmem:[%s8716_s4 + $0x58] sm:$0xff]  }
 0x381   :  { %v7466_v8 = vmul.f32 %v799_v4, %v7258_v18  ;;  %v801_v9 = vadd.f32 %v786_v5, %v7270_v29  ;;  %v6890_v5 = vld [vmem:[%s8716_s4 + $0x60] sm:$0xff]  }
 0x382   :  { %v7470_v10 = vmul.f32 %v800_v7, %v7256_v15 }
 0x383   :  { %v7473_v23 = vmul.f32 %v801_v9, %v7258_v18  ;;  %v6594_v26 = vpack.i.bf16 %v7466_v8, %v7462_v6  ;;  %v7491_v16 = vpop.f32.mrb[16].mxu1 }
 0x384   :  { %v6619_v11 = vpack.i.bf16 %v7470_v10, %v7462_v6  ;;  %v1028_v28 = vpack.c.bf16 %v7470_v10, %v7462_v6  ;;  %v7503_v20 = vpop.f32.mrb[17].mxu1 }
 0x385   :  { %6595 = vrot.lane.b32.xlu0 %v6594_v26, %s7194_s7  ;;  %v6599_v29 = vpack.i.bf16 %v7473_v23, %v7470_v10  ;;  %v6614_v12 = vpack.i.bf16 %v7473_v23, %v7466_v8  ;;  %v1029_v14 = vpack.c.bf16 %v7473_v23, %v7466_v8  ;;  %v7505_v21 = vpop.f32.mrb[18].mxu1  ;;  %v6891_v23 = vld [vmem:[%s8716_s4 + $0x68] sm:$0xff]  }
 0x386   :  { %v7510_v24 = vpop.f32.mrb[19].mxu1 }
 0x387   :  { %6600 = vrot.lane.b32.xlu1 %v6599_v29, %s7194_s7 }
 0x389   :  { %6605 = vrot.lane.b32.xlu0 %v6594_v26, %s7193_s1 }
 0x38b   :  { %6610 = vrot.lane.b32.xlu1 %v6599_v29, %s7193_s1 }
 0x38d   :  { %6615 = vrot.lane.b32.xlu0 %v6614_v12, %s7195_s8 }
 0x38f   :  { %6620 = vrot.lane.b32.xlu1 %v6619_v11, %s7195_s8 }
 0x391   :  { %6625 = vrot.lane.b32.xlu0 %v6614_v12, %s7196_s9 }
 0x393   :  { %6630 = vrot.lane.b32.xlu1 %v6619_v11, %s7196_s9 }
 0x395   :  { %721 = vperm.xlu0 %6552, %v707_v17  }
 0x397   :  { %726 = vperm.xlu1 %6593, %v708_v19  }
 0x399   :  { %1353 = vperm.xlu0 %6552, %v1349_v22  }
 0x39b   :  { %1358 = vperm.xlu1 %6593, %v1350_v25  }
 0x39d   :  { %1428 = vperm.xlu0 %6552, %v1424_v27  }
 0x39f   :  { %1506 = vperm.xlu1 %6593, %v1502_v30   ;;  %v6893_v30 = vld [vmem:[%s8716_s4 + $0x78] sm:$0xff]  }
 0x3a1   :  { %1511 = vperm.xlu0 %6552, %v1503_v31  }
 0x3f7   :  { %v6596_v32 = vpop.permute.xlu0 %6595 }
 0x3f8   :  { %v6598_v34 = vunpack.i.h.bf16 %v6596_v32  ;;  %v6597_v37 = vunpack.i.l.bf16 %v6596_v32 }
 0x3f9   :  { %v6601_v38 = vpop.permute.xlu1 %6600 }
 0x3fa   :  { %v6603_v39 = vunpack.i.h.bf16 %v6601_v38  ;;  %v6602_v40 = vunpack.i.l.bf16 %v6601_v38  ;;  %v832_v41 = vsel %vm79_vm1, 0.0, %v6597_v37  ;;  %v826_v43 = vsel %vm79_vm1, %v6597_v37, %v6598_v34 }
 0x3fb   :  { %v6606_v42 = vpop.permute.xlu0 %6605 }
 0x3fc   :  { %v833_v44 = vsel %vm79_vm1, 0.0, %v6602_v40  ;;  %v6608_v46 = vunpack.i.h.bf16 %v6606_v42  ;;  %v6607_v35 = vunpack.i.l.bf16 %v6606_v42  ;;  %v827_v47 = vsel %vm79_vm1, %v6602_v40, %v6603_v39  ;;  %v6894_v39 = vld [vmem:[%s8716_s4 + $0x80] sm:$0xff]   ;;  %v6896_v42 = vld [vmem:[%s8716_s4 + $0x90] sm:$0xff]  }
 0x3fd   :  { %v6611_v48 = vpop.permute.xlu1 %6610  ;;  %v5808_v49 = vpack.c.bf16 %v827_v47, %v826_v43  ;;  %v5811_v50 = vpack.c.bf16 %v833_v44, %v832_v41  ;;  %v6895_v41 = vld [vmem:[%s8716_s4 + $0x88] sm:$0xff]   ;;  %v6897_v43 = vld [vmem:[%s8716_s4 + $0x98] sm:$0xff]  }
 0x3fe   :  { %v6613_v52 = vunpack.i.h.bf16 %v6611_v48  ;;  %v6612_v53 = vunpack.i.l.bf16 %v6611_v48  ;;  %v929_v56 = vsel %vm274_vm5, %v6607_v35, %v6608_v46  ;;  %v935_v57 = vsel %vm274_vm5, 0.0, %v6607_v35  ;;  %v810_v48 = vld [vmem:[%s8714_s2 + $0x60] sm:$0xff] }
 0x3ff   :  { %5809 = vmatprep.subr.msk.bf16.mxu0 %vm7302_vm4, %v5808_v49  ;;  %v6616_v0 = vpop.permute.xlu0 %6615  ;;  %v811_v49 = vld [vmem:[%s8714_s2 + $0x68] sm:$0xff] }
 0x400   :  { %v930_v58 = vsel %vm274_vm5, %v6612_v53, %v6613_v52  ;;  %v936_v59 = vsel %vm274_vm5, 0.0, %v6612_v53  ;;  %5812 = vmatpush1.bf16.msk.msra.mxu0 %vm7306_vm6, %v5811_v50  ;;  %v6618_v1 = vunpack.i.h.bf16 %v6616_v0  ;;  %v6617_v4 = vunpack.i.l.bf16 %v6616_v0  ;;  %v812_v52 = vld [vmem:[%s8714_s2 + $0x70] sm:$0xff] }
 0x401   :  { %v5818_v60 = vpack.c.bf16 %v930_v58, %v929_v56  ;;  %v5821_v61 = vpack.c.bf16 %v936_v59, %v935_v57  ;;  %v6621_v26 = vpop.permute.xlu1 %6620  ;;  %v813_v56 = vld [vmem:[%s8714_s2 + $0x78] sm:$0xff] }
 0x402   :  { %v1122_v7 = vsel %vm463_vm12, %v6618_v1, 0.0  ;;  %v1121_v8 = vsel %vm463_vm12, %v6617_v4, 0.0  ;;  %v6623_v29 = vunpack.i.h.bf16 %v6621_v26  ;;  %v6622_v12 = vunpack.i.l.bf16 %v6621_v26 }
 0x403   :  { %5813 = vmatmul.mubr.msk.bf16.vlgmr.msra.gmra.mrb[0].mxu0 %vm198_vm9, %v6888_v54  ;;  %5819 = vmatprep.subr.msk.bf16.mxu0 %vm7323_vm10, %v5818_v60  ;;  %v5832_v9 = vpack.c.bf16 %v1122_v7, %v1121_v8  ;;  %v6626_v11 = vpop.permute.xlu0 %6625  ;;  %v807_v7 = vld [vmem:[%s8714_s2 + $0x48] sm:$0xff]  ;;  %v808_v8 = vld [vmem:[%s8714_s2 + $0x50] sm:$0xff] }
 0x404   :  { %5822 = vmatpush1.bf16.msk.msra.mxu0 %vm7327_vm11, %v5821_v61  ;;  %902 = vmatprep.mubr.bf16.mxu0 %v7192_v3  ;;  %v6627_v17 = vunpack.i.l.bf16 %v6626_v11  ;;  %v1115_v6 = vsel %vm463_vm12, %v6622_v12, %v6617_v4  ;;  %v1116_v10 = vsel %vm463_vm12, %v6623_v29, %v6618_v1 }
 0x405   :  { %1046 = vmatprep.subr.bf16.mxu0 %v1029_v14  ;;  %v6628_v14 = vunpack.i.h.bf16 %v6626_v11  ;;  %v5835_v25 = vpack.c.bf16 %v1116_v10, %v1115_v6  ;;  %v6631_v31 = vpop.permute.xlu1 %6630 }
 0x406   :  { %v1224_v22 = vsel %vm569_vm15, %v6627_v17, 0.0  ;;  %v6633_v32 = vunpack.i.h.bf16 %v6631_v31  ;;  %v6632_v34 = vunpack.i.l.bf16 %v6631_v31 }
 0x407   :  { %v1225_v19 = vsel %vm569_vm15, %v6628_v14, 0.0 }
 0x408   :  { %v5842_v27 = vpack.c.bf16 %v1225_v19, %v1224_v22  ;;  %v1218_v37 = vsel %vm569_vm15, %v6632_v34, %v6627_v17  ;;  %v1219_v38 = vsel %vm569_vm15, %v6633_v32, %v6628_v14 }
 0x409   :  { %v5845_v40 = vpack.c.bf16 %v1219_v38, %v1218_v37 }
 0x40b   :  { %5814 = vmatmul.mubr.msk.bf16.gmra.mrb[4].mxu0 %vm198_vm9, %v6889_v62 }
 0x40c   :  { %995 = vmatprep.mubr.bf16.mxu0 %v7192_v3 }
 0x413   :  { %5823 = vmatmul.mubr.msk.bf16.vlgmr.msra.gmra.mrb[0].mxu0 %vm198_vm9, %v6890_v5  ;;  %v806_v5 = vld [vmem:[%s8714_s2 + $0x40] sm:$0xff] }
 0x414   :  { %1047 = vmatpush1.bf16.msra.mxu0 %v1028_v28  ;;  %1005 = vmatprep.mubr.bf16.mxu0 %v7192_v3  ;;  %v6892_v28 = vld [vmem:[%s8716_s4 + $0x70] sm:$0xff]  }
 0x415   :  { %5833 = vmatprep.subr.msk.bf16.mxu0 %vm7352_vm14, %v5832_v9 }
 0x41b   :  { %5824 = vmatmul.mubr.msk.bf16.gmra.mrb[4].mxu0 %vm198_vm9, %v6891_v23  ;;  %v809_v23 = vld [vmem:[%s8714_s2 + $0x58] sm:$0xff] }
 0x41c   :  { %1078 = vmatprep.mubr.bf16.mxu0 %v7192_v3 }
 0x423   :  { %5827 = vmatmul.mubr.msk.bf16.vlgmr.msra.gmra.mrb[0].mxu0 %vm198_vm9, %v6892_v28 }
 0x424   :  { %5836 = vmatpush1.bf16.msk.msra.mxu0 %vm7374_vm7, %v5835_v25  ;;  %1088 = vmatprep.mubr.bf16.mxu0 %v7192_v3 }
 0x425   :  { %5843 = vmatprep.subr.msk.bf16.mxu0 %vm7378_vm8, %v5842_v27 }
 0x42b   :  { %5828 = vmatmul.mubr.msk.bf16.gmra.mrb[4].mxu0 %vm198_vm9, %v6893_v30 }
 0x42c   :  { %1181 = vmatprep.mubr.bf16.mxu0 %v7192_v3 }
 0x433   :  { %5837 = vmatmul.mubr.msk.bf16.vlgmr.msra.gmra.mrb[0].mxu0 %vm198_vm9, %v6894_v39 }
 0x434   :  { %5846 = vmatpush1.bf16.msk.msra.mxu0 %vm7399_vm2, %v5845_v40  ;;  %1191 = vmatprep.mubr.bf16.mxu0 %v7192_v3 }
 0x43b   :  { %5838 = vmatmul.mubr.msk.bf16.gmra.mrb[4].mxu0 %vm198_vm9, %v6895_v41 }
 0x43c   :  { %1284 = vmatprep.mubr.bf16.mxu0 %v7192_v3 }
 0x443   :  { %5847 = vmatmul.mubr.msk.bf16.vlgmr.msra.gmra.mrb[0].mxu0 %vm198_vm9, %v6896_v42 }
 0x444   :  { %1294 = vmatprep.mubr.bf16.mxu0 %v7192_v3 }
 0x44b   :  { %5848 = vmatmul.mubr.msk.bf16.gmra.mrb[4].mxu0 %vm198_vm9, %v6897_v43 }
 0x44c   :  { %1401 = vmatprep.mubr.bf16.mxu0 %v7192_v3 }
 0x516   :  { %v1286_v44 = vpop.f32.mrb[0].mxu0 }
 0x517   :  { %v1288_v46 = vpop.f32.mrb[1].mxu0  ;;  %v6198_v9 = vadd.f32 %v1286_v44, %v806_v5 }
 0x518   :  { %v1290_v35 = vpop.f32.mrb[2].mxu0  ;;  %v6199_v26 = vadd.f32 %v1288_v46, %v807_v7  ;;  %v6898_v46 = vld [vmem:[%s8716_s4 + $0xb0] sm:$0xff]  }
 0x519   :  { %v1292_v47 = vpop.f32.mrb[3].mxu0  ;;  %v6200_v11 = vadd.f32 %v1290_v35, %v808_v8  ;;  %v722_v35 = vpop.permute.xlu0 %721 }
 0x51a   :  { %v6201_v29 = vadd.f32 %v1292_v47, %v809_v23  ;;  %v727_v47 = vpop.permute.xlu1 %726  ;;  %v6899_v23 = vld [vmem:[%s8716_s4 + $0xb8] sm:$0xff]  }
 0x51e   :  { %v1296_v50 = vpop.f32.mrb[4].mxu0 }
 0x51f   :  { %v6202_v53 = vadd.f32 %v1296_v50, %v810_v48  ;;  %v1298_v54 = vpop.f32.mrb[5].mxu0  ;;  %v1354_v48 = vpop.permute.xlu0 %1353  ;;  %v792_v50 = vadd.f32 %v7503_v20, %v722_v35 }
 0x520   :  { %v6203_v57 = vadd.f32 %v1298_v54, %v811_v49  ;;  %v1300_v58 = vpop.f32.mrb[6].mxu0  ;;  %v790_v49 = vadd.f32 %v7491_v16, %v722_v35 }
 0x521   :  { %v5849_v59 = vmul.f32 -1.442695, %v6202_v53  ;;  %v6204_v60 = vadd.f32 %v1300_v58, %v812_v52  ;;  %v1302_v61 = vpop.f32.mrb[7].mxu0  ;;  %v1359_v52 = vpop.permute.xlu1 %1358  ;;  %v794_v53 = vadd.f32 %v7505_v21, %v727_v47 }
 0x522   :  { %v5850_v62 = vmul.f32 -1.442695, %v6203_v57  ;;  %v6205_v0 = vadd.f32 %v1302_v61, %v813_v56  ;;  %v6187_v54 = vadd.f32 %v1354_v48, %v790_v49  ;;  %v796_v56 = vadd.f32 %v7510_v24, %v727_v47 }
 0x523   :  { %6999 = vpow2.f32 %v5849_v59  ;;  %v5851_v1 = vmul.f32 -1.442695, %v6204_v60  ;;  %v6190_v57 = vadd.f32 %v1354_v48, %v792_v50  ;;  %v6193_v59 = vadd.f32 %v1359_v52, %v794_v53 }
 0x524   :  { %7001 = vpow2.f32 %v5850_v62  ;;  %v5852_v4 = vmul.f32 -1.442695, %v6205_v0  ;;  %v6196_v62 = vadd.f32 %v1359_v52, %v796_v56 }
 0x525   :  { %7003 = vpow2.f32 %v5851_v1 }
 0x526   :  { %7005 = vpow2.f32 %v5852_v4 }
 0x527   :  { %7007 = vtanh.f32 %v6198_v9 }
 0x528   :  { %7009 = vtanh.f32 %v6199_v26  ;;  %v7653_v26 = vcombine.low %v7256_v15, %v7258_v18 }
 0x529   :  { %7011 = vtanh.f32 %v6200_v11 }
 0x52a   :  { %7013 = vtanh.f32 %v6201_v29  ;;  %v1487_v11 = vrot.slane %v7653_v26, 6  ;;  %v27_v29 = vld [vmem:[%s8712_s0] sm:$0xcc] }
 0x52d   :  { %v7000_v12 = vpop.eup %6999 }
 0x52e   :  { %v7002_v14 = vpop.eup %7001  ;;  %v1329_v17 = vadd.f32 1.0, %v7000_v12  ;;  %v1489_v12 = vmul.f32 %v1487_v11, %v27_v29 }
 0x52f   :  { %v7004_v6 = vpop.eup %7003  ;;  %v1330_v10 = vadd.f32 1.0, %v7002_v14 }
 0x530   :  { %v7006_v28 = vpop.eup %7005  ;;  %7015 = vrcp.f32 %v1329_v17  ;;  %v1331_v19 = vadd.f32 1.0, %v7004_v6  ;;  %v1491_v14 = vcombine.high %v1489_v12, %v1489_v12  ;;  %v1429_v17 = vpop.permute.xlu0 %1428 }
 0x531   :  { %7017 = vrcp.f32 %v1330_v10  ;;  %v1332_v22 = vadd.f32 1.0, %v7006_v28  ;;  %v7008_v25 = vpop.eup %7007  ;;  %v1492_v28 = vrot.slane %v1489_v12, 2 }
 0x532   :  { %7019 = vrcp.f32 %v1331_v19  ;;  %v7010_v27 = vpop.eup %7009 }
 0x533   :  { %7021 = vrcp.f32 %v1332_v22  ;;  %v7012_v30 = vpop.eup %7011 }
 0x534   :  { %v7014_v31 = vpop.eup %7013  ;;  %v1512_v35 = vpop.permute.xlu0 %1511 }
 0x53a   :  { %v7016_v32 = vpop.eup %7015 }
 0x53b   :  { %v7018_v34 = vpop.eup %7017  ;;  %v1341_v37 = vmul.f32 %v7016_v32, %v7008_v25  ;;  %v1493_v25 = vrot.slane %v1491_v14, 2 }
 0x53c   :  { %v7020_v38 = vpop.eup %7019  ;;  %v1342_v39 = vmul.f32 %v7018_v34, %v7010_v27 }
 0x53d   :  { %v7022_v40 = vpop.eup %7021  ;;  %v1343_v41 = vmul.f32 %v7020_v38, %v7012_v30 }
 0x53e   :  { %v1344_v42 = vmul.f32 %v7022_v40, %v7014_v31 }
 0x53f   :  { %v1347_v43 = vpack.c.bf16 %v1343_v41, %v1341_v37  ;;  %v6900_v41 = vld [vmem:[%s8715_s3 + $0x8] sm:$0xff]  }
 0x540   :  { %v1348_v44 = vpack.c.bf16 %v1344_v42, %v1342_v39  ;;  %v1507_v42 = vpop.permute.xlu1 %1506 }
 0x542   :  { %1369 = vmatprep.subr.bf16.mxu0 %v1348_v44 }
 0x543   :  { %1370 = vmatpush1.bf16.msra.mxu0 %v1347_v43 }
 0x546   :  { %5854 = vmatmul.mubr.msk.bf16.vlgmr.msra.gmra.mrb[8].mxu0 %vm198_vm9, %v6898_v46 }
 0x547   :  { %2192 = vmatprep.mubr.bf16.mxu0 %v7192_v3 }
 0x619   :  { %v1403_v58 = vpop.f32.mrb[8].mxu0 }
 0x61a   :  { %v6188_v60 = vadd.f32 %v6187_v54, %v1403_v58  ;;  %v1405_v61 = vpop.f32.mrb[9].mxu0 }
 0x61b   :  { %v6191_v0 = vadd.f32 %v6190_v57, %v1405_v61  ;;  %v1407_v1 = vpop.f32.mrb[10].mxu0 }
 0x61c   :  { %v6194_v4 = vadd.f32 %v6193_v59, %v1407_v1  ;;  %v1409_v5 = vpop.f32.mrb[11].mxu0  ;;  %v1416_v16 = vmul.f32 %v6188_v60, %v7256_v15 }
 0x61d   :  { %v6197_v7 = vadd.f32 %v6196_v62, %v1409_v5  ;;  %v1417_v21 = vmul.f32 %v6191_v0, %v7258_v18  ;;  %v2120_v62 = vld [vmem:[%s8717_s5 + $0x60] sm:$0xff]  ;;  %v2121_v0 = vld [vmem:[%s8717_s5 + $0x68] sm:$0xff] }
 0x61e   :  { %v1418_v20 = vmul.f32 %v6194_v4, %v7256_v15 }
 0x61f   :  { %v1419_v8 = vmul.f32 %v6197_v7, %v7258_v18 }
 0x620   :  { %v1422_v24 = vpack.c.bf16 %v1418_v20, %v1416_v16 }
 0x621   :  { %v1423_v9 = vpack.c.bf16 %v1419_v8, %v1417_v21 }
 0x623   :  { %1443 = vmatprep.subr.bf16.mxu1 %v1423_v9 }
 0x624   :  { %1444 = vmatpush1.bf16.msra.mxu1 %v1422_v24 }
 0x627   :  { %5856 = vmatmul.mubr.msk.bf16.vlgmr.msra.gmra.mrb[20].mxu1 %vm198_vm9, %v6899_v23 }
 0x628   :  { %1560 = vmatprep.mubr.bf16.mxu1 %v7192_v3 }
 0x6fa   :  { %v1477_v6 = vpop.f32.mrb[20].mxu1 }
 0x6fb   :  { %v1478_v10 = vadd.f32 %v1477_v6, %v1429_v17  ;;  %v1479_v19 = vpop.f32.mrb[21].mxu1 }
 0x6fc   :  { %v1480_v22 = vadd.f32 %v1479_v19, %v1429_v17  ;;  %v1481_v27 = vpop.f32.mrb[22].mxu1 }
 0x6fd   :  { %v1484_v30 = vmul.f32 %v1478_v10, %v7256_v15  ;;  %v1482_v31 = vpop.f32.mrb[23].mxu1 }
 0x6fe   :  { %v1485_v32 = vmul.f32 %v1480_v22, %v7258_v18 }
 0x6ff   :  { %v7661_v34 = vadd.f32 %v1492_v28, %v1484_v30  ;;  %v6901_v28 = vld [vmem:[%s8716_s4 + $0xc0] sm:$0xff]  }
 0x700   :  { %v7663_v37 = vadd.f32 %v1493_v25, %v1485_v32 }
 0x701   :  { %v1500_v38 = vpack.c.bf16 %v7661_v34, %v7661_v34 }
 0x702   :  { %v1501_v39 = vpack.c.bf16 %v7663_v37, %v7663_v37 }
 0x703   :  { %v1523_v40 = vsel %vm83_vm0, %v1500_v38, 0  ;;  %v6902_v38 = vld [vmem:[%s8716_s4 + $0xc8] sm:$0xff]  }
 0x704   :  { %5858 = vmatprep.subr.msk.bf16.mxu1 %vm83_vm0, %v1501_v39 }
 0x705   :  { %1529 = vmatpush1.bf16.msra.mxu1 %v1523_v40 }
 0x708   :  { %5859 = vmatmul.mubr.msk.bf16.vlgmr.msra.gmra.mrb[24].mxu1 %vm79_vm1, %v6900_v41 }
 0x709   :  { %1661 = vmatprep.mubr.bf16.mxu1 %v7192_v3 }
 0x7db   :  { %v1562_v43 = vpop.f32.mrb[24].mxu1 }
 0x7dc   :  { %v1563_v44 = vadd.f32 %v1562_v43, %v1507_v42  ;;  %v1564_v46 = vpop.f32.mrb[25].mxu1 }
 0x7dd   :  { %v1565_v47 = vadd.f32 %v1564_v46, %v1507_v42  ;;  %v1566_v48 = vpop.f32.mrb[26].mxu1  ;;  %v6903_v42 = vld [vmem:[%s8716_s4 + $0xd0] sm:$0xff]  }
 0x7de   :  { %v7677_v49 = vmul.f32 %v1563_v44, %v7256_v15  ;;  %v1567_v50 = vadd.f32 %v1566_v48, %v1512_v35  ;;  %v1568_v52 = vpop.f32.mrb[27].mxu1 }
 0x7df   :  { %v7680_v53 = vmul.f32 %v1565_v47, %v7258_v18  ;;  %v1569_v54 = vadd.f32 %v1568_v52, %v1512_v35  ;;  %v6904_v47 = vld [vmem:[%s8716_s4 + $0xd8] sm:$0xff]  }
 0x7e0   :  { %v7683_v56 = vmul.f32 %v1567_v50, %v7256_v15 }
 0x7e1   :  { %v7686_v57 = vmul.f32 %v1569_v54, %v7258_v18  ;;  %v6634_v58 = vpack.i.bf16 %v7680_v53, %v7677_v49 }
 0x7e2   :  { %v6659_v61 = vpack.i.bf16 %v7683_v56, %v7677_v49  ;;  %v1797_v46 = vpack.c.bf16 %v7683_v56, %v7677_v49 }
 0x7e3   :  { %6635 = vrot.lane.b32.xlu1 %v6634_v58, %s7194_s7  ;;  %v6639_v59 = vpack.i.bf16 %v7686_v57, %v7683_v56  ;;  %v6654_v60 = vpack.i.bf16 %v7686_v57, %v7680_v53  ;;  %v1798_v32 = vpack.c.bf16 %v7686_v57, %v7680_v53 }
 0x7e5   :  { %6640 = vrot.lane.b32.xlu0 %v6639_v59, %s7194_s7 }
 0x7e7   :  { %6645 = vrot.lane.b32.xlu1 %v6634_v58, %s7193_s1 }
 0x7e9   :  { %6650 = vrot.lane.b32.xlu0 %v6639_v59, %s7193_s1 }
 0x7eb   :  { %6655 = vrot.lane.b32.xlu1 %v6654_v60, %s7195_s8 }
 0x7ed   :  { %6660 = vrot.lane.b32.xlu0 %v6659_v61, %s7195_s8 }
 0x7ef   :  { %6665 = vrot.lane.b32.xlu1 %v6654_v60, %s7196_s9 }
 0x7f1   :  { %6670 = vrot.lane.b32.xlu0 %v6659_v61, %s7196_s9 }
 0x7f3   :  { %2126 = vperm.xlu1 %6593, %v2120_v62   ;;  %v6905_v62 = vld [vmem:[%s8716_s4 + $0xe0] sm:$0xff]  }
 0x7f5   :  { %2131 = vperm.xlu0 %6552, %v2121_v0  }
 0x855   :  { %v6636_v1 = vpop.permute.xlu1 %6635 }
 0x856   :  { %v6638_v4 = vunpack.i.h.bf16 %v6636_v1  ;;  %v6637_v5 = vunpack.i.l.bf16 %v6636_v1 }
 0x857   :  { %v6641_v7 = vpop.permute.xlu0 %6640 }
 0x858   :  { %v6643_v16 = vunpack.i.h.bf16 %v6641_v7  ;;  %v6642_v20 = vunpack.i.l.bf16 %v6641_v7  ;;  %v1595_v21 = vsel %vm79_vm1, %v6637_v5, %v6638_v4  ;;  %v1601_v8 = vsel %vm79_vm1, 0.0, %v6637_v5  ;;  %v6906_v7 = vld [vmem:[%s8716_s4 + $0xe8] sm:$0xff]  }
 0x859   :  { %v6646_v24 = vpop.permute.xlu1 %6645 }
 0x85a   :  { %v1596_v9 = vsel %vm79_vm1, %v6642_v20, %v6643_v16  ;;  %v1602_v23 = vsel %vm79_vm1, 0.0, %v6642_v20  ;;  %v6648_v11 = vunpack.i.h.bf16 %v6646_v24  ;;  %v6647_v29 = vunpack.i.l.bf16 %v6646_v24 }
 0x85b   :  { %v5863_v12 = vpack.c.bf16 %v1596_v9, %v1595_v21  ;;  %v5866_v14 = vpack.c.bf16 %v1602_v23, %v1601_v8  ;;  %v6651_v17 = vpop.permute.xlu0 %6650  ;;  %v6907_v9 = vld [vmem:[%s8716_s4 + $0xf0] sm:$0xff]  }
 0x85c   :  { %v6653_v6 = vunpack.i.h.bf16 %v6651_v17  ;;  %v6652_v10 = vunpack.i.l.bf16 %v6651_v17  ;;  %v1698_v19 = vsel %vm274_vm5, %v6647_v29, %v6648_v11  ;;  %v1704_v22 = vsel %vm274_vm5, 0.0, %v6647_v29  ;;  %v6908_v11 = vld [vmem:[%s8716_s4 + $0xf8] sm:$0xff]   ;;  %v6909_v29 = vld [vmem:[%s8716_s4 + $0x100] sm:$0xff]  }
 0x85d   :  { %5864 = vmatprep.subr.msk.bf16.mxu1 %vm7302_vm4, %v5863_v12  ;;  %v6656_v39 = vpop.permute.xlu1 %6655  ;;  %v6910_v12 = vld [vmem:[%s8716_s4 + $0x108] sm:$0xff]  }
 0x85e   :  { %v1699_v25 = vsel %vm274_vm5, %v6652_v10, %v6653_v6  ;;  %v1705_v27 = vsel %vm274_vm5, 0.0, %v6652_v10  ;;  %5867 = vmatpush1.bf16.msk.msra.mxu1 %vm7306_vm6, %v5866_v14  ;;  %v6658_v40 = vunpack.i.h.bf16 %v6656_v39  ;;  %v6657_v41 = vunpack.i.l.bf16 %v6656_v39 }
 0x85f   :  { %v5873_v30 = vpack.c.bf16 %v1699_v25, %v1698_v19  ;;  %v5876_v31 = vpack.c.bf16 %v1705_v27, %v1704_v22  ;;  %v6661_v48 = vpop.permute.xlu0 %6660  ;;  %v1580_v19 = vld [vmem:[%s8714_s2 + $0xa8] sm:$0xff]  ;;  %v1581_v25 = vld [vmem:[%s8714_s2 + $0xb0] sm:$0xff] }
 0x860   :  { %v1891_v43 = vsel %vm463_vm12, %v6658_v40, 0.0  ;;  %v1890_v44 = vsel %vm463_vm12, %v6657_v41, 0.0  ;;  %v6663_v52 = vunpack.i.h.bf16 %v6661_v48  ;;  %v6662_v54 = vunpack.i.l.bf16 %v6661_v48  ;;  %v1577_v48 = vld [vmem:[%s8714_s2 + $0x90] sm:$0xff] }
 0x861   :  { %5868 = vmatmul.mubr.msk.bf16.vlgmr.msra.gmra.mrb[28].mxu1 %vm198_vm9, %v6901_v28  ;;  %5874 = vmatprep.subr.msk.bf16.mxu1 %vm7323_vm10, %v5873_v30  ;;  %v5887_v35 = vpack.c.bf16 %v1891_v43, %v1890_v44  ;;  %v6666_v50 = vpop.permute.xlu1 %6665  ;;  %v1579_v28 = vld [vmem:[%s8714_s2 + $0xa0] sm:$0xff] }
 0x862   :  { %5877 = vmatpush1.bf16.msk.msra.mxu1 %vm7327_vm11, %v5876_v31  ;;  %1671 = vmatprep.mubr.bf16.mxu1 %v7192_v3  ;;  %v6668_v58 = vunpack.i.h.bf16 %v6666_v50  ;;  %v6667_v59 = vunpack.i.l.bf16 %v6666_v50  ;;  %v1884_v60 = vsel %vm463_vm12, %v6662_v54, %v6657_v41  ;;  %v1885_v61 = vsel %vm463_vm12, %v6663_v52, %v6658_v40  ;;  %v1582_v31 = vld [vmem:[%s8714_s2 + $0xb8] sm:$0xff] }
 0x863   :  { %1815 = vmatprep.subr.bf16.mxu1 %v1798_v32  ;;  %v5890_v4 = vpack.c.bf16 %v1885_v61, %v1884_v60  ;;  %v6671_v16 = vpop.permute.xlu0 %6670  ;;  %v1578_v52 = vld [vmem:[%s8714_s2 + $0x98] sm:$0xff] }
 0x864   :  { %v1994_v0 = vsel %vm569_vm15, %v6668_v58, 0.0  ;;  %v1993_v1 = vsel %vm569_vm15, %v6667_v59, 0.0  ;;  %v6673_v20 = vunpack.i.h.bf16 %v6671_v16  ;;  %v6672_v21 = vunpack.i.l.bf16 %v6671_v16 }
 0x865   :  { %v5897_v5 = vpack.c.bf16 %v1994_v0, %v1993_v1 }
 0x866   :  { %v1987_v8 = vsel %vm569_vm15, %v6672_v21, %v6667_v59  ;;  %v1988_v24 = vsel %vm569_vm15, %v6673_v20, %v6668_v58 }
 0x867   :  { %v5900_v23 = vpack.c.bf16 %v1988_v24, %v1987_v8 }
 0x869   :  { %5869 = vmatmul.mubr.msk.bf16.gmra.mrb[32].mxu1 %vm198_vm9, %v6902_v38 }
 0x86a   :  { %1764 = vmatprep.mubr.bf16.mxu1 %v7192_v3 }
 0x871   :  { %5878 = vmatmul.mubr.msk.bf16.vlgmr.msra.gmra.mrb[28].mxu1 %vm198_vm9, %v6903_v42 }
 0x872   :  { %1816 = vmatpush1.bf16.msra.mxu1 %v1797_v46  ;;  %1774 = vmatprep.mubr.bf16.mxu1 %v7192_v3 }
 0x873   :  { %5888 = vmatprep.subr.msk.bf16.mxu1 %vm7352_vm14, %v5887_v35  ;;  %v1575_v35 = vld [vmem:[%s8714_s2 + $0x80] sm:$0xff] }
 0x879   :  { %5879 = vmatmul.mubr.msk.bf16.gmra.mrb[32].mxu1 %vm198_vm9, %v6904_v47  ;;  %v1576_v47 = vld [vmem:[%s8714_s2 + $0x88] sm:$0xff] }
 0x87a   :  { %1847 = vmatprep.mubr.bf16.mxu1 %v7192_v3 }
 0x881   :  { %5882 = vmatmul.mubr.msk.bf16.vlgmr.msra.gmra.mrb[28].mxu1 %vm198_vm9, %v6905_v62 }
 0x882   :  { %5891 = vmatpush1.bf16.msk.msra.mxu1 %vm7374_vm7, %v5890_v4  ;;  %1857 = vmatprep.mubr.bf16.mxu1 %v7192_v3 }
 0x883   :  { %5898 = vmatprep.subr.msk.bf16.mxu1 %vm7378_vm8, %v5897_v5 }
 0x889   :  { %5883 = vmatmul.mubr.msk.bf16.gmra.mrb[32].mxu1 %vm198_vm9, %v6906_v7 }
 0x88a   :  { %1950 = vmatprep.mubr.bf16.mxu1 %v7192_v3 }
 0x891   :  { %5892 = vmatmul.mubr.msk.bf16.vlgmr.msra.gmra.mrb[28].mxu1 %vm198_vm9, %v6907_v9 }
 0x892   :  { %5901 = vmatpush1.bf16.msk.msra.mxu1 %vm7399_vm2, %v5900_v23  ;;  %1960 = vmatprep.mubr.bf16.mxu1 %v7192_v3 }
 0x899   :  { %5893 = vmatmul.mubr.msk.bf16.gmra.mrb[32].mxu1 %vm198_vm9, %v6908_v11 }
 0x89a   :  { %2053 = vmatprep.mubr.bf16.mxu1 %v7192_v3 }
 0x8a1   :  { %5902 = vmatmul.mubr.msk.bf16.vlgmr.msra.gmra.mrb[28].mxu1 %vm198_vm9, %v6909_v29 }
 0x8a2   :  { %2063 = vmatprep.mubr.bf16.mxu1 %v7192_v3 }
 0x8a9   :  { %5903 = vmatmul.mubr.msk.bf16.gmra.mrb[32].mxu1 %vm198_vm9, %v6910_v12 }
 0x8aa   :  { %2890 = vmatprep.mubr.bf16.mxu1 %v7192_v3 }
 0x974   :  { %v2055_v14 = vpop.f32.mrb[28].mxu1 }
 0x975   :  { %v2057_v17 = vpop.f32.mrb[29].mxu1  ;;  %v6206_v50 = vadd.f32 %v2055_v14, %v1575_v35 }
 0x976   :  { %v2059_v6 = vpop.f32.mrb[30].mxu1  ;;  %v6207_v54 = vadd.f32 %v2057_v17, %v1576_v47 }
 0x977   :  { %v2061_v10 = vpop.f32.mrb[31].mxu1  ;;  %v6208_v58 = vadd.f32 %v2059_v6, %v1577_v48 }
 0x978   :  { %v6209_v59 = vadd.f32 %v2061_v10, %v1578_v52 }
 0x97c   :  { %v2065_v22 = vpop.f32.mrb[32].mxu1 }
 0x97d   :  { %v6210_v27 = vadd.f32 %v2065_v22, %v1579_v28  ;;  %v2067_v30 = vpop.f32.mrb[33].mxu1  ;;  %v6911_v28 = vld [vmem:[%s8716_s4 + $0x160] sm:$0xff]   ;;  %v2127_v22 = vpop.permute.xlu1 %2126 }
 0x97e   :  { %v6211_v32 = vadd.f32 %v2067_v30, %v1580_v19  ;;  %v2069_v38 = vpop.f32.mrb[34].mxu1  ;;  %v6912_v19 = vld [vmem:[%s8716_s4 + $0x168] sm:$0xff]  }
 0x97f   :  { %v5904_v39 = vmul.f32 -1.442695, %v6210_v27  ;;  %v6212_v40 = vadd.f32 %v2069_v38, %v1581_v25  ;;  %v2071_v41 = vpop.f32.mrb[35].mxu1 }
 0x980   :  { %v5905_v42 = vmul.f32 -1.442695, %v6211_v32  ;;  %v6213_v43 = vadd.f32 %v2071_v41, %v1582_v31  ;;  %v2132_v31 = vpop.permute.xlu0 %2131 }
 0x981   :  { %7023 = vpow2.f32 %v5904_v39  ;;  %v5906_v44 = vmul.f32 -1.442695, %v6212_v40 }
 0x982   :  { %7025 = vpow2.f32 %v5905_v42  ;;  %v5907_v46 = vmul.f32 -1.442695, %v6213_v43 }
 0x983   :  { %7027 = vpow2.f32 %v5906_v44 }
 0x984   :  { %7029 = vpow2.f32 %v5907_v46 }
 0x985   :  { %7031 = vtanh.f32 %v6206_v50 }
 0x986   :  { %7033 = vtanh.f32 %v6207_v54 }
 0x987   :  { %7035 = vtanh.f32 %v6208_v58  ;;  %v2122_v58 = vld [vmem:[%s8717_s5 + $0x70] sm:$0xff] }
 0x988   :  { %7037 = vtanh.f32 %v6209_v59  ;;  %v2123_v59 = vld [vmem:[%s8717_s5 + $0x78] sm:$0xff] }
 0x98b   :  { %v7024_v60 = vpop.eup %7023 }
 0x98c   :  { %v7026_v61 = vpop.eup %7025  ;;  %v2098_v62 = vadd.f32 1.0, %v7024_v60  ;;  %v2764_v60 = vld [vmem:[%s8717_s5 + $0x80] sm:$0xff] }
 0x98d   :  { %v7028_v0 = vpop.eup %7027  ;;  %v2099_v1 = vadd.f32 1.0, %v7026_v61  ;;  %v2765_v61 = vld [vmem:[%s8717_s5 + $0x88] sm:$0xff] }
 0x98e   :  { %v7030_v4 = vpop.eup %7029  ;;  %7039 = vrcp.f32 %v2098_v62  ;;  %v2100_v5 = vadd.f32 1.0, %v7028_v0  ;;  %v2839_v62 = vld [vmem:[%s8717_s5 + $0x90] sm:$0xff]  ;;  %v2912_v0 = vld [vmem:[%s8717_s5 + $0xa0] sm:$0xff] }
 0x98f   :  { %7041 = vrcp.f32 %v2099_v1  ;;  %v2101_v7 = vadd.f32 1.0, %v7030_v4  ;;  %v7032_v16 = vpop.eup %7031  ;;  %v2913_v1 = vld [vmem:[%s8717_s5 + $0xa8] sm:$0xff] }
 0x990   :  { %7043 = vrcp.f32 %v2100_v5  ;;  %v7034_v20 = vpop.eup %7033 }
 0x991   :  { %7045 = vrcp.f32 %v2101_v7  ;;  %v7036_v21 = vpop.eup %7035 }
 0x992   :  { %v7038_v8 = vpop.eup %7037 }
 0x998   :  { %v7040_v24 = vpop.eup %7039 }
 0x999   :  { %v7042_v9 = vpop.eup %7041  ;;  %v2110_v23 = vmul.f32 %v7040_v24, %v7032_v16 }
 0x99a   :  { %v7044_v11 = vpop.eup %7043  ;;  %v2111_v29 = vmul.f32 %v7042_v9, %v7034_v20 }
 0x99b   :  { %v7046_v12 = vpop.eup %7045  ;;  %v2112_v14 = vmul.f32 %v7044_v11, %v7036_v21 }
 0x99c   :  { %v2113_v17 = vmul.f32 %v7046_v12, %v7038_v8 }
 0x99d   :  { %v2118_v6 = vpack.c.bf16 %v2112_v14, %v2110_v23 }
 0x99e   :  { %v2119_v10 = vpack.c.bf16 %v2113_v17, %v2111_v29 }
 0x9a0   :  { %2160 = vmatprep.subr.bf16.mxu0 %v2119_v10 }
 0x9a1   :  { %2161 = vmatpush1.bf16.msra.mxu0 %v2118_v6 }
 0x9a4   :  { %5910 = vmatmul.mubr.msk.bf16.vlgmr.msra.gmra.mrb[12].mxu0 %vm198_vm9, %v6911_v28 }
 0x9a5   :  { %2202 = vmatprep.mubr.bf16.mxu0 %v7192_v3 }
 0x9ac   :  { %5911 = vmatmul.mubr.msk.bf16.gmra.mrb[16].mxu0 %vm198_vm9, %v6912_v19  ;;  %v6913_v19 = vld [vmem:[%s8716_s4 + $0x110] sm:$0xff]  }
 0x9ad   :  { %2307 = vmatprep.mubr.bf16.mxu0 %v7192_v3 }
 0xa77   :  { %v2194_v25 = vpop.f32.mrb[12].mxu0 }
 0xa78   :  { %v2195_v27 = vadd.f32 %v2194_v25, %v2127_v22  ;;  %v2196_v30 = vpop.f32.mrb[13].mxu0 }
 0xa79   :  { %v2197_v32 = vadd.f32 %v2196_v30, %v2127_v22  ;;  %v2198_v38 = vpop.f32.mrb[14].mxu0 }
 0xa7a   :  { %v2213_v39 = vadd.f32 %v2195_v27, %v7677_v49  ;;  %v2199_v40 = vadd.f32 %v2198_v38, %v2132_v31  ;;  %v2200_v41 = vpop.f32.mrb[15].mxu0  ;;  %v6914_v38 = vld [vmem:[%s8716_s4 + $0x118] sm:$0xff]  }
 0xa7b   :  { %v2214_v42 = vadd.f32 %v2197_v32, %v7680_v53  ;;  %v2201_v43 = vadd.f32 %v2200_v41, %v2132_v31 }
 0xa7c   :  { %v7833_v44 = vmul.f32 %v2213_v39, %v7256_v15  ;;  %v2215_v46 = vadd.f32 %v2199_v40, %v7683_v56 }
 0xa7d   :  { %v7837_v35 = vmul.f32 %v2214_v42, %v7258_v18  ;;  %v2216_v47 = vadd.f32 %v2201_v43, %v7686_v57  ;;  %v6915_v42 = vld [vmem:[%s8716_s4 + $0x120] sm:$0xff]  }
 0xa7e   :  { %v7841_v48 = vmul.f32 %v2215_v46, %v7256_v15 }
 0xa7f   :  { %v2220_v49 = vmul.f32 %v2216_v47, %v7258_v18  ;;  %v6674_v50 = vpack.i.bf16 %v7837_v35, %v7833_v44  ;;  %v6916_v47 = vld [vmem:[%s8716_s4 + $0x128] sm:$0xff]  }
 0xa80   :  { %v6699_v53 = vpack.i.bf16 %v7841_v48, %v7833_v44  ;;  %v2443_v52 = vpack.c.bf16 %v7841_v48, %v7833_v44 }
 0xa81   :  { %6675 = vrot.lane.b32.xlu1 %v6674_v50, %s7194_s7  ;;  %v6679_v56 = vpack.i.bf16 %v2220_v49, %v7841_v48  ;;  %v6694_v57 = vpack.i.bf16 %v2220_v49, %v7837_v35  ;;  %v2444_v54 = vpack.c.bf16 %v2220_v49, %v7837_v35 }
 0xa83   :  { %6680 = vrot.lane.b32.xlu0 %v6679_v56, %s7194_s7 }
 0xa85   :  { %6685 = vrot.lane.b32.xlu1 %v6674_v50, %s7193_s1 }
 0xa87   :  { %6690 = vrot.lane.b32.xlu0 %v6679_v56, %s7193_s1 }
 0xa89   :  { %6695 = vrot.lane.b32.xlu1 %v6694_v57, %s7195_s8 }
 0xa8b   :  { %6700 = vrot.lane.b32.xlu0 %v6699_v53, %s7195_s8 }
 0xa8d   :  { %6705 = vrot.lane.b32.xlu1 %v6694_v57, %s7196_s9 }
 0xa8f   :  { %6710 = vrot.lane.b32.xlu0 %v6699_v53, %s7196_s9 }
 0xa91   :  { %2136 = vperm.xlu1 %6593, %v2122_v58  }
 0xa93   :  { %2141 = vperm.xlu0 %6552, %v2123_v59  }
 0xa95   :  { %2768 = vperm.xlu1 %6593, %v2764_v60  }
 0xa97   :  { %2773 = vperm.xlu0 %6552, %v2765_v61  }
 0xa99   :  { %2843 = vperm.xlu1 %6593, %v2839_v62   ;;  %v6918_v62 = vld [vmem:[%s8716_s4 + $0x138] sm:$0xff]  }
 0xa9b   :  { %2916 = vperm.xlu0 %6552, %v2912_v0  }
 0xa9d   :  { %2921 = vperm.xlu1 %6593, %v2913_v1  }
 0xaf3   :  { %v6676_v4 = vpop.permute.xlu1 %6675 }
 0xaf4   :  { %v6678_v5 = vunpack.i.h.bf16 %v6676_v4  ;;  %v6677_v7 = vunpack.i.l.bf16 %v6676_v4 }
 0xaf5   :  { %v6681_v16 = vpop.permute.xlu0 %6680 }
 0xaf6   :  { %v6683_v20 = vunpack.i.h.bf16 %v6681_v16  ;;  %v6682_v21 = vunpack.i.l.bf16 %v6681_v16  ;;  %v2241_v8 = vsel %vm79_vm1, %v6677_v7, %v6678_v5  ;;  %v2247_v24 = vsel %vm79_vm1, 0.0, %v6677_v7  ;;  %v6919_v16 = vld [vmem:[%s8716_s4 + $0x140] sm:$0xff]  }
 0xaf7   :  { %v6686_v9 = vpop.permute.xlu1 %6685 }
 0xaf8   :  { %v2242_v23 = vsel %vm79_vm1, %v6682_v21, %v6683_v20  ;;  %v2248_v11 = vsel %vm79_vm1, 0.0, %v6682_v21  ;;  %v6688_v29 = vunpack.i.h.bf16 %v6686_v9  ;;  %v6687_v12 = vunpack.i.l.bf16 %v6686_v9  ;;  %v6920_v21 = vld [vmem:[%s8716_s4 + $0x148] sm:$0xff]  }
 0xaf9   :  { %v5915_v14 = vpack.c.bf16 %v2242_v23, %v2241_v8  ;;  %v5918_v17 = vpack.c.bf16 %v2248_v11, %v2247_v24  ;;  %v6691_v6 = vpop.permute.xlu0 %6690  ;;  %v6921_v8 = vld [vmem:[%s8716_s4 + $0x150] sm:$0xff]   ;;  %v6922_v24 = vld [vmem:[%s8716_s4 + $0x158] sm:$0xff]  }
 0xafa   :  { %v6693_v10 = vunpack.i.h.bf16 %v6691_v6  ;;  %v6692_v28 = vunpack.i.l.bf16 %v6691_v6  ;;  %v2344_v22 = vsel %vm274_vm5, %v6687_v12, %v6688_v29  ;;  %v2350_v25 = vsel %vm274_vm5, 0.0, %v6687_v12  ;;  %v2225_v12 = vld [vmem:[%s8714_s2 + $0xe0] sm:$0xff]  ;;  %v2227_v6 = vld [vmem:[%s8714_s2 + $0xf0] sm:$0xff] }
 0xafb   :  { %5916 = vmatprep.subr.msk.bf16.mxu0 %vm7302_vm4, %v5915_v14  ;;  %v6696_v39 = vpop.permute.xlu1 %6695  ;;  %v2226_v14 = vld [vmem:[%s8714_s2 + $0xe8] sm:$0xff] }
 0xafc   :  { %v2345_v27 = vsel %vm274_vm5, %v6692_v28, %v6693_v10  ;;  %v2351_v30 = vsel %vm274_vm5, 0.0, %v6692_v28  ;;  %5919 = vmatpush1.bf16.msk.msra.mxu0 %vm7306_vm6, %v5918_v17  ;;  %v6698_v40 = vunpack.i.h.bf16 %v6696_v39  ;;  %v6697_v41 = vunpack.i.l.bf16 %v6696_v39 }
 0xafd   :  { %v5925_v31 = vpack.c.bf16 %v2345_v27, %v2344_v22  ;;  %v5928_v32 = vpack.c.bf16 %v2351_v30, %v2350_v25  ;;  %v6701_v49 = vpop.permute.xlu0 %6700 }
 0xafe   :  { %v2537_v43 = vsel %vm463_vm12, %v6698_v40, 0.0  ;;  %v2536_v46 = vsel %vm463_vm12, %v6697_v41, 0.0  ;;  %v6703_v53 = vunpack.i.h.bf16 %v6701_v49  ;;  %v6702_v56 = vunpack.i.l.bf16 %v6701_v49 }
 0xaff   :  { %5920 = vmatmul.mubr.msk.bf16.vlgmr.msra.gmra.mrb[20].mxu0 %vm198_vm9, %v6913_v19  ;;  %5926 = vmatprep.subr.msk.bf16.mxu0 %vm7323_vm10, %v5925_v31  ;;  %v5939_v35 = vpack.c.bf16 %v2537_v43, %v2536_v46  ;;  %v6706_v50 = vpop.permute.xlu1 %6705  ;;  %v2228_v19 = vld [vmem:[%s8714_s2 + $0xf8] sm:$0xff]  ;;  %v2223_v43 = vld [vmem:[%s8714_s2 + $0xd0] sm:$0xff] }
 0xb00   :  { %5929 = vmatpush1.bf16.msk.msra.mxu0 %vm7327_vm11, %v5928_v32  ;;  %2317 = vmatprep.mubr.bf16.mxu0 %v7192_v3  ;;  %v6708_v57 = vunpack.i.h.bf16 %v6706_v50  ;;  %v2530_v44 = vsel %vm463_vm12, %v6702_v56, %v6697_v41  ;;  %v2531_v48 = vsel %vm463_vm12, %v6703_v53, %v6698_v40  ;;  %v2221_v41 = vld [vmem:[%s8714_s2 + $0xc0] sm:$0xff] }
 0xb01   :  { %2461 = vmatprep.subr.bf16.mxu0 %v2444_v54  ;;  %v6707_v54 = vunpack.i.l.bf16 %v6706_v50  ;;  %v5942_v60 = vpack.c.bf16 %v2531_v48, %v2530_v44  ;;  %v6711_v0 = vpop.permute.xlu0 %6710 }
 0xb02   :  { %v2640_v58 = vsel %vm569_vm15, %v6708_v57, 0.0  ;;  %v6713_v1 = vunpack.i.h.bf16 %v6711_v0  ;;  %v6712_v4 = vunpack.i.l.bf16 %v6711_v0 }
 0xb03   :  { %v2639_v59 = vsel %vm569_vm15, %v6707_v54, 0.0 }
 0xb04   :  { %v5949_v61 = vpack.c.bf16 %v2640_v58, %v2639_v59  ;;  %v2633_v5 = vsel %vm569_vm15, %v6712_v4, %v6707_v54  ;;  %v2634_v7 = vsel %vm569_vm15, %v6713_v1, %v6708_v57 }
 0xb05   :  { %v5952_v20 = vpack.c.bf16 %v2634_v7, %v2633_v5 }
 0xb07   :  { %5921 = vmatmul.mubr.msk.bf16.gmra.mrb[24].mxu0 %vm198_vm9, %v6914_v38 }
 0xb08   :  { %2410 = vmatprep.mubr.bf16.mxu0 %v7192_v3 }
 0xb0f   :  { %5930 = vmatmul.mubr.msk.bf16.vlgmr.msra.gmra.mrb[20].mxu0 %vm198_vm9, %v6915_v42  ;;  %v2222_v42 = vld [vmem:[%s8714_s2 + $0xc8] sm:$0xff] }
 0xb10   :  { %2462 = vmatpush1.bf16.msra.mxu0 %v2443_v52  ;;  %2420 = vmatprep.mubr.bf16.mxu0 %v7192_v3  ;;  %v6917_v52 = vld [vmem:[%s8716_s4 + $0x130] sm:$0xff]  }
 0xb11   :  { %5940 = vmatprep.subr.msk.bf16.mxu0 %vm7352_vm14, %v5939_v35  ;;  %v2224_v35 = vld [vmem:[%s8714_s2 + $0xd8] sm:$0xff] }
 0xb17   :  { %5931 = vmatmul.mubr.msk.bf16.gmra.mrb[24].mxu0 %vm198_vm9, %v6916_v47 }
 0xb18   :  { %2493 = vmatprep.mubr.bf16.mxu0 %v7192_v3 }
 0xb1f   :  { %5934 = vmatmul.mubr.msk.bf16.vlgmr.msra.gmra.mrb[20].mxu0 %vm198_vm9, %v6917_v52 }
 0xb20   :  { %5943 = vmatpush1.bf16.msk.msra.mxu0 %vm7374_vm7, %v5942_v60  ;;  %2503 = vmatprep.mubr.bf16.mxu0 %v7192_v3 }
 0xb21   :  { %5950 = vmatprep.subr.msk.bf16.mxu0 %vm7378_vm8, %v5949_v61 }
 0xb27   :  { %5935 = vmatmul.mubr.msk.bf16.gmra.mrb[24].mxu0 %vm198_vm9, %v6918_v62 }
 0xb28   :  { %2596 = vmatprep.mubr.bf16.mxu0 %v7192_v3 }
 0xb2f   :  { %5944 = vmatmul.mubr.msk.bf16.vlgmr.msra.gmra.mrb[20].mxu0 %vm198_vm9, %v6919_v16 }
 0xb30   :  { %5953 = vmatpush1.bf16.msk.msra.mxu0 %vm7399_vm2, %v5952_v20  ;;  %2606 = vmatprep.mubr.bf16.mxu0 %v7192_v3 }
 0xb37   :  { %5945 = vmatmul.mubr.msk.bf16.gmra.mrb[24].mxu0 %vm198_vm9, %v6920_v21 }
 0xb38   :  { %2699 = vmatprep.mubr.bf16.mxu0 %v7192_v3 }
 0xb3f   :  { %5954 = vmatmul.mubr.msk.bf16.vlgmr.msra.gmra.mrb[20].mxu0 %vm198_vm9, %v6921_v8 }
 0xb40   :  { %2709 = vmatprep.mubr.bf16.mxu0 %v7192_v3 }
 0xb47   :  { %5955 = vmatmul.mubr.msk.bf16.gmra.mrb[24].mxu0 %vm198_vm9, %v6922_v24 }
 0xb48   :  { %2816 = vmatprep.mubr.bf16.mxu0 %v7192_v3 }
 0xc12   :  { %v2701_v9 = vpop.f32.mrb[20].mxu0 }
 0xc13   :  { %v2703_v23 = vpop.f32.mrb[21].mxu0  ;;  %v6222_v46 = vadd.f32 %v2701_v9, %v2221_v41  ;;  %v6923_v9 = vld [vmem:[%s8716_s4 + $0x170] sm:$0xff]  }
 0xc14   :  { %v2705_v11 = vpop.f32.mrb[22].mxu0  ;;  %v6223_v47 = vadd.f32 %v2703_v23, %v2222_v42  ;;  %v2137_v23 = vpop.permute.xlu1 %2136  ;;  %v6924_v42 = vld [vmem:[%s8716_s4 + $0x178] sm:$0xff]  }
 0xc15   :  { %v2707_v29 = vpop.f32.mrb[23].mxu0  ;;  %v6224_v49 = vadd.f32 %v2705_v11, %v2223_v43  ;;  %v2142_v11 = vpop.permute.xlu0 %2141  ;;  %v7167_v43 = vld [vmem:[%s8712_s0] sm:$0x33] }
 0xc16   :  { %v6225_v50 = vadd.f32 %v2707_v29, %v2224_v35 }
 0xc18   :  { %v2769_v29 = vpop.permute.xlu1 %2768 }
 0xc1a   :  { %v2711_v17 = vpop.f32.mrb[24].mxu0 }
 0xc1b   :  { %v6226_v10 = vadd.f32 %v2711_v17, %v2225_v12  ;;  %v2713_v28 = vpop.f32.mrb[25].mxu0  ;;  %v2774_v12 = vpop.permute.xlu0 %2773 }
 0xc1c   :  { %v6227_v22 = vadd.f32 %v2713_v28, %v2226_v14  ;;  %v2715_v25 = vpop.f32.mrb[26].mxu0  ;;  %v6214_v14 = vadd.f32 %v2769_v29, %v2137_v23  ;;  %v2844_v35 = vpop.permute.xlu1 %2843 }
 0xc1d   :  { %v5956_v27 = vmul.f32 -1.442695, %v6226_v10  ;;  %v6228_v30 = vadd.f32 %v2715_v25, %v2227_v6  ;;  %v2717_v31 = vpop.f32.mrb[27].mxu0  ;;  %v6218_v6 = vadd.f32 %v2774_v12, %v2142_v11 }
 0xc1e   :  { %v5957_v32 = vmul.f32 -1.442695, %v6227_v22  ;;  %v6229_v38 = vadd.f32 %v2717_v31, %v2228_v19 }
 0xc1f   :  { %7047 = vpow2.f32 %v5956_v27  ;;  %v5958_v39 = vmul.f32 -1.442695, %v6228_v30 }
 0xc20   :  { %7049 = vpow2.f32 %v5957_v32  ;;  %v5959_v40 = vmul.f32 -1.442695, %v6229_v38 }
 0xc21   :  { %7051 = vpow2.f32 %v5958_v39 }
 0xc22   :  { %7053 = vpow2.f32 %v5959_v40 }
 0xc23   :  { %7055 = vtanh.f32 %v6222_v46  ;;  %v2902_v46 = vmul.f32 %v7167_v43, %v7653_v26 }
 0xc24   :  { %7057 = vtanh.f32 %v6223_v47 }
 0xc25   :  { %7059 = vtanh.f32 %v6224_v49 }
 0xc26   :  { %7061 = vtanh.f32 %v6225_v50 }
 0xc29   :  { %v7048_v53 = vpop.eup %7047 }
 0xc2a   :  { %v7050_v56 = vpop.eup %7049  ;;  %v2744_v57 = vadd.f32 1.0, %v7048_v53 }
 0xc2b   :  { %v7052_v54 = vpop.eup %7051  ;;  %v2745_v44 = vadd.f32 1.0, %v7050_v56  ;;  %v2904_v56 = vcombine.high %v2902_v46, %v2902_v46 }
 0xc2c   :  { %v7054_v48 = vpop.eup %7053  ;;  %7063 = vrcp.f32 %v2744_v57  ;;  %v2746_v52 = vadd.f32 1.0, %v7052_v54 }
 0xc2d   :  { %7065 = vrcp.f32 %v2745_v44  ;;  %v2747_v58 = vadd.f32 1.0, %v7054_v48  ;;  %v7056_v59 = vpop.eup %7055 }
 0xc2e   :  { %7067 = vrcp.f32 %v2746_v52  ;;  %v7058_v60 = vpop.eup %7057 }
 0xc2f   :  { %7069 = vrcp.f32 %v2747_v58  ;;  %v7060_v61 = vpop.eup %7059 }
 0xc30   :  { %v7062_v62 = vpop.eup %7061 }
 0xc36   :  { %v7064_v0 = vpop.eup %7063 }
 0xc37   :  { %v7066_v1 = vpop.eup %7065  ;;  %v2756_v4 = vmul.f32 %v7064_v0, %v7056_v59 }
 0xc38   :  { %v7068_v5 = vpop.eup %7067  ;;  %v2757_v7 = vmul.f32 %v7066_v1, %v7058_v60 }
 0xc39   :  { %v7070_v16 = vpop.eup %7069  ;;  %v2758_v20 = vmul.f32 %v7068_v5, %v7060_v61  ;;  %v6925_v61 = vld [vmem:[%s8715_s3 + $0x10] sm:$0xff]   ;;  %v2922_v5 = vpop.permute.xlu1 %2921 }
 0xc3a   :  { %v2759_v21 = vmul.f32 %v7070_v16, %v7062_v62  ;;  %v2917_v62 = vpop.permute.xlu0 %2916 }
 0xc3b   :  { %v2762_v8 = vpack.c.bf16 %v2758_v20, %v2756_v4 }
 0xc3c   :  { %v2763_v24 = vpack.c.bf16 %v2759_v21, %v2757_v7 }
 0xc3e   :  { %2784 = vmatprep.subr.bf16.mxu0 %v2763_v24 }
 0xc3f   :  { %2785 = vmatpush1.bf16.msra.mxu0 %v2762_v8 }
 0xc42   :  { %5961 = vmatmul.mubr.msk.bf16.vlgmr.msra.gmra.mrb[16].mxu0 %vm198_vm9, %v6923_v9 }
 0xc43   :  { %3602 = vmatprep.mubr.bf16.mxu0 %v7192_v3 }
 0xd15   :  { %v2818_v17 = vpop.f32.mrb[16].mxu0 }
 0xd16   :  { %v6215_v10 = vadd.f32 %v6214_v14, %v2818_v17  ;;  %v2820_v28 = vpop.f32.mrb[17].mxu0 }
 0xd17   :  { %v6217_v19 = vadd.f32 %v6214_v14, %v2820_v28  ;;  %v2822_v22 = vpop.f32.mrb[18].mxu0 }
 0xd18   :  { %v6219_v25 = vadd.f32 %v6218_v6, %v2822_v22  ;;  %v2824_v27 = vpop.f32.mrb[19].mxu0  ;;  %v2831_v31 = vmul.f32 %v6215_v10, %v7256_v15  ;;  %v3531_v10 = vld [vmem:[%s8717_s5 + $0xb8] sm:$0xff] }
 0xd19   :  { %v6221_v30 = vadd.f32 %v6218_v6, %v2824_v27  ;;  %v2832_v38 = vmul.f32 %v6217_v19, %v7258_v18  ;;  %v3530_v6 = vld [vmem:[%s8717_s5 + $0xb0] sm:$0xff] }
 0xd1a   :  { %v2833_v32 = vmul.f32 %v6219_v25, %v7256_v15 }
 0xd1b   :  { %v2834_v39 = vmul.f32 %v6221_v30, %v7258_v18 }
 0xd1c   :  { %v2837_v40 = vpack.c.bf16 %v2833_v32, %v2831_v31 }
 0xd1d   :  { %v2838_v41 = vpack.c.bf16 %v2834_v39, %v2832_v38 }
 0xd1f   :  { %2858 = vmatprep.subr.bf16.mxu1 %v2838_v41 }
 0xd20   :  { %2859 = vmatpush1.bf16.msra.mxu1 %v2837_v40 }
 0xd23   :  { %5963 = vmatmul.mubr.msk.bf16.vlgmr.msra.gmra.mrb[36].mxu1 %vm198_vm9, %v6924_v42 }
 0xd24   :  { %2970 = vmatprep.mubr.bf16.mxu1 %v7192_v3 }
 0xdf6   :  { %v2892_v47 = vpop.f32.mrb[36].mxu1 }
 0xdf7   :  { %v2893_v49 = vadd.f32 %v2892_v47, %v2844_v35  ;;  %v2894_v50 = vpop.f32.mrb[37].mxu1 }
 0xdf8   :  { %v2895_v53 = vadd.f32 %v2894_v50, %v2844_v35  ;;  %v2896_v57 = vpop.f32.mrb[38].mxu1  ;;  %v6926_v50 = vld [vmem:[%s8716_s4 + $0x180] sm:$0xff]  }
 0xdf9   :  { %v2899_v54 = vmul.f32 %v2893_v49, %v7256_v15  ;;  %v2897_v44 = vpop.f32.mrb[39].mxu1 }
 0xdfa   :  { %v2900_v48 = vmul.f32 %v2895_v53, %v7258_v18 }
 0xdfb   :  { %v8011_v52 = vadd.f32 %v2902_v46, %v2899_v54 }
 0xdfc   :  { %v8013_v58 = vadd.f32 %v2904_v56, %v2900_v48 }
 0xdfd   :  { %v2910_v59 = vpack.c.bf16 %v8011_v52, %v8011_v52 }
 0xdfe   :  { %v2911_v26 = vpack.c.bf16 %v8013_v58, %v8013_v58 }
 0xdff   :  { %v2933_v60 = vsel %vm83_vm0, %v2910_v59, 0 }
 0xe00   :  { %5965 = vmatprep.subr.msk.bf16.mxu1 %vm83_vm0, %v2911_v26  ;;  %v6927_v26 = vld [vmem:[%s8716_s4 + $0x188] sm:$0xff]  }
 0xe01   :  { %2939 = vmatpush1.bf16.msra.mxu1 %v2933_v60 }
 0xe04   :  { %5966 = vmatmul.mubr.msk.bf16.vlgmr.msra.gmra.mrb[40].mxu1 %vm79_vm1, %v6925_v61 }
 0xe05   :  { %3071 = vmatprep.mubr.bf16.mxu1 %v7192_v3 }
 0xed7   :  { %v2972_v0 = vpop.f32.mrb[40].mxu1 }
 0xed8   :  { %v2973_v1 = vadd.f32 %v2972_v0, %v2917_v62  ;;  %v2974_v4 = vpop.f32.mrb[41].mxu1  ;;  %v6928_v0 = vld [vmem:[%s8716_s4 + $0x190] sm:$0xff]  }
 0xed9   :  { %v2975_v7 = vadd.f32 %v2974_v4, %v2917_v62  ;;  %v2976_v16 = vpop.f32.mrb[42].mxu1 }
 0xeda   :  { %v8027_v20 = vmul.f32 %v2973_v1, %v7256_v15  ;;  %v2977_v21 = vadd.f32 %v2976_v16, %v2922_v5  ;;  %v2978_v8 = vpop.f32.mrb[43].mxu1  ;;  %v6929_v16 = vld [vmem:[%s8716_s4 + $0x198] sm:$0xff]  }
 0xedb   :  { %v8030_v24 = vmul.f32 %v2975_v7, %v7258_v18  ;;  %v2979_v9 = vadd.f32 %v2978_v8, %v2922_v5 }
 0xedc   :  { %v8033_v23 = vmul.f32 %v2977_v21, %v7256_v15 }
 0xedd   :  { %v8036_v11 = vmul.f32 %v2979_v9, %v7258_v18  ;;  %v6714_v29 = vpack.i.bf16 %v8030_v24, %v8027_v20 }
 0xede   :  { %v6739_v17 = vpack.i.bf16 %v8033_v23, %v8027_v20  ;;  %v3207_v5 = vpack.c.bf16 %v8033_v23, %v8027_v20 }
 0xedf   :  { %6715 = vrot.lane.b32.xlu0 %v6714_v29, %s7194_s7  ;;  %v6719_v12 = vpack.i.bf16 %v8036_v11, %v8033_v23  ;;  %v6734_v14 = vpack.i.bf16 %v8036_v11, %v8030_v24  ;;  %v3208_v59 = vpack.c.bf16 %v8036_v11, %v8030_v24 }
 0xee1   :  { %6720 = vrot.lane.b32.xlu1 %v6719_v12, %s7194_s7 }
 0xee3   :  { %6725 = vrot.lane.b32.xlu0 %v6714_v29, %s7193_s1 }
 0xee5   :  { %6730 = vrot.lane.b32.xlu1 %v6719_v12, %s7193_s1 }
 0xee7   :  { %6735 = vrot.lane.b32.xlu0 %v6734_v14, %s7195_s8 }
 0xee9   :  { %6740 = vrot.lane.b32.xlu1 %v6739_v17, %s7195_s8 }
 0xeeb   :  { %6745 = vrot.lane.b32.xlu0 %v6734_v14, %s7196_s9 }
 0xeed   :  { %6750 = vrot.lane.b32.xlu1 %v6739_v17, %s7196_s9 }
 0xeef   :  { %3536 = vperm.xlu0 %6552, %v3530_v6  }
 0xef1   :  { %3541 = vperm.xlu1 %6593, %v3531_v10   ;;  %v6930_v10 = vld [vmem:[%s8716_s4 + $0x1a0] sm:$0xff]  }
 0xf51   :  { %v6716_v28 = vpop.permute.xlu0 %6715 }
 0xf52   :  { %v6718_v19 = vunpack.i.h.bf16 %v6716_v28  ;;  %v6717_v22 = vunpack.i.l.bf16 %v6716_v28 }
 0xf53   :  { %v6721_v25 = vpop.permute.xlu1 %6720 }
 0xf54   :  { %v6723_v27 = vunpack.i.h.bf16 %v6721_v25  ;;  %v6722_v30 = vunpack.i.l.bf16 %v6721_v25  ;;  %v3005_v31 = vsel %vm79_vm1, %v6717_v22, %v6718_v19  ;;  %v3011_v32 = vsel %vm79_vm1, 0.0, %v6717_v22 }
 0xf55   :  { %v6726_v38 = vpop.permute.xlu0 %6725 }
 0xf56   :  { %v3006_v39 = vsel %vm79_vm1, %v6722_v30, %v6723_v27  ;;  %v3012_v40 = vsel %vm79_vm1, 0.0, %v6722_v30  ;;  %v6728_v41 = vunpack.i.h.bf16 %v6726_v38  ;;  %v6727_v42 = vunpack.i.l.bf16 %v6726_v38  ;;  %v6931_v27 = vld [vmem:[%s8716_s4 + $0x1a8] sm:$0xff]  }
 0xf57   :  { %v5970_v43 = vpack.c.bf16 %v3006_v39, %v3005_v31  ;;  %v5973_v46 = vpack.c.bf16 %v3012_v40, %v3011_v32  ;;  %v6731_v35 = vpop.permute.xlu1 %6730  ;;  %v6932_v40 = vld [vmem:[%s8716_s4 + $0x1b0] sm:$0xff]  }
 0xf58   :  { %v6733_v47 = vunpack.i.h.bf16 %v6731_v35  ;;  %v6732_v49 = vunpack.i.l.bf16 %v6731_v35  ;;  %v3108_v53 = vsel %vm274_vm5, %v6727_v42, %v6728_v41  ;;  %v3114_v56 = vsel %vm274_vm5, 0.0, %v6727_v42  ;;  %v6933_v42 = vld [vmem:[%s8716_s4 + $0x1b8] sm:$0xff]  }
 0xf59   :  { %5971 = vmatprep.subr.msk.bf16.mxu1 %vm7302_vm4, %v5970_v43  ;;  %v6736_v60 = vpop.permute.xlu0 %6735  ;;  %v6934_v43 = vld [vmem:[%s8716_s4 + $0x1c0] sm:$0xff]  }
 0xf5a   :  { %v3109_v57 = vsel %vm274_vm5, %v6732_v49, %v6733_v47  ;;  %v3115_v54 = vsel %vm274_vm5, 0.0, %v6732_v49  ;;  %5974 = vmatpush1.bf16.msk.msra.mxu1 %vm7306_vm6, %v5973_v46  ;;  %v6738_v61 = vunpack.i.h.bf16 %v6736_v60  ;;  %v6737_v62 = vunpack.i.l.bf16 %v6736_v60  ;;  %v6935_v46 = vld [vmem:[%s8716_s4 + $0x1c8] sm:$0xff]  }
 0xf5b   :  { %v5980_v44 = vpack.c.bf16 %v3109_v57, %v3108_v53  ;;  %v5983_v48 = vpack.c.bf16 %v3115_v54, %v3114_v56  ;;  %v6741_v21 = vpop.permute.xlu1 %6740  ;;  %v2989_v53 = vld [vmem:[%s8714_s2 + $0x120] sm:$0xff]  ;;  %v2990_v56 = vld [vmem:[%s8714_s2 + $0x128] sm:$0xff]  ;;  %v2991_v54 = vld [vmem:[%s8714_s2 + $0x130] sm:$0xff] }
 0xf5c   :  { %v3301_v1 = vsel %vm463_vm12, %v6738_v61, 0.0  ;;  %v3300_v4 = vsel %vm463_vm12, %v6737_v62, 0.0  ;;  %v6743_v9 = vunpack.i.h.bf16 %v6741_v21  ;;  %v6742_v29 = vunpack.i.l.bf16 %v6741_v21  ;;  %v2986_v21 = vld [vmem:[%s8714_s2 + $0x108] sm:$0xff] }
 0xf5d   :  { %5975 = vmatmul.mubr.msk.bf16.vlgmr.msra.gmra.mrb[44].mxu1 %vm198_vm9, %v6926_v50  ;;  %5981 = vmatprep.subr.msk.bf16.mxu1 %vm7323_vm10, %v5980_v44  ;;  %v5994_v7 = vpack.c.bf16 %v3301_v1, %v3300_v4  ;;  %v6746_v8 = vpop.permute.xlu0 %6745 }
 0xf5e   :  { %5984 = vmatpush1.bf16.msk.msra.mxu1 %vm7327_vm11, %v5983_v48  ;;  %3081 = vmatprep.mubr.bf16.mxu1 %v7192_v3  ;;  %v6748_v12 = vunpack.i.h.bf16 %v6746_v8  ;;  %v6747_v14 = vunpack.i.l.bf16 %v6746_v8  ;;  %v3294_v17 = vsel %vm463_vm12, %v6742_v29, %v6737_v62  ;;  %v3295_v6 = vsel %vm463_vm12, %v6743_v9, %v6738_v61  ;;  %v2987_v8 = vld [vmem:[%s8714_s2 + $0x110] sm:$0xff]  ;;  %v2988_v29 = vld [vmem:[%s8714_s2 + $0x118] sm:$0xff] }
 0xf5f   :  { %3225 = vmatprep.subr.bf16.mxu1 %v3208_v59  ;;  %v5997_v22 = vpack.c.bf16 %v3295_v6, %v3294_v17  ;;  %v6751_v30 = vpop.permute.xlu1 %6750  ;;  %v2992_v59 = vld [vmem:[%s8714_s2 + $0x138] sm:$0xff] }
 0xf60   :  { %v3404_v28 = vsel %vm569_vm15, %v6748_v12, 0.0  ;;  %v3403_v19 = vsel %vm569_vm15, %v6747_v14, 0.0  ;;  %v6753_v31 = vunpack.i.h.bf16 %v6751_v30  ;;  %v6752_v32 = vunpack.i.l.bf16 %v6751_v30 }
 0xf61   :  { %v6004_v25 = vpack.c.bf16 %v3404_v28, %v3403_v19 }
 0xf62   :  { %v3397_v38 = vsel %vm569_vm15, %v6752_v32, %v6747_v14  ;;  %v3398_v39 = vsel %vm569_vm15, %v6753_v31, %v6748_v12 }
 0xf63   :  { %v6007_v41 = vpack.c.bf16 %v3398_v39, %v3397_v38 }
 0xf65   :  { %5976 = vmatmul.mubr.msk.bf16.gmra.mrb[48].mxu1 %vm198_vm9, %v6927_v26 }
 0xf66   :  { %3174 = vmatprep.mubr.bf16.mxu1 %v7192_v3 }
 0xf6d   :  { %5985 = vmatmul.mubr.msk.bf16.vlgmr.msra.gmra.mrb[44].mxu1 %vm198_vm9, %v6928_v0 }
 0xf6e   :  { %3226 = vmatpush1.bf16.msra.mxu1 %v3207_v5  ;;  %3184 = vmatprep.mubr.bf16.mxu1 %v7192_v3 }
 0xf6f   :  { %5995 = vmatprep.subr.msk.bf16.mxu1 %vm7352_vm14, %v5994_v7 }
 0xf75   :  { %5986 = vmatmul.mubr.msk.bf16.gmra.mrb[48].mxu1 %vm198_vm9, %v6929_v16  ;;  %v2985_v16 = vld [vmem:[%s8714_s2 + $0x100] sm:$0xff] }
 0xf76   :  { %3257 = vmatprep.mubr.bf16.mxu1 %v7192_v3 }
 0xf7d   :  { %5989 = vmatmul.mubr.msk.bf16.vlgmr.msra.gmra.mrb[44].mxu1 %vm198_vm9, %v6930_v10 }
 0xf7e   :  { %5998 = vmatpush1.bf16.msk.msra.mxu1 %vm7374_vm7, %v5997_v22  ;;  %3267 = vmatprep.mubr.bf16.mxu1 %v7192_v3 }
 0xf7f   :  { %6005 = vmatprep.subr.msk.bf16.mxu1 %vm7378_vm8, %v6004_v25 }
 0xf85   :  { %5990 = vmatmul.mubr.msk.bf16.gmra.mrb[48].mxu1 %vm198_vm9, %v6931_v27 }
 0xf86   :  { %3360 = vmatprep.mubr.bf16.mxu1 %v7192_v3 }
 0xf8d   :  { %5999 = vmatmul.mubr.msk.bf16.vlgmr.msra.gmra.mrb[44].mxu1 %vm198_vm9, %v6932_v40 }
 0xf8e   :  { %6008 = vmatpush1.bf16.msk.msra.mxu1 %vm7399_vm2, %v6007_v41  ;;  %3370 = vmatprep.mubr.bf16.mxu1 %v7192_v3 }
 0xf95   :  { %6000 = vmatmul.mubr.msk.bf16.gmra.mrb[48].mxu1 %vm198_vm9, %v6933_v42 }
 0xf96   :  { %3463 = vmatprep.mubr.bf16.mxu1 %v7192_v3 }
 0xf9d   :  { %6009 = vmatmul.mubr.msk.bf16.vlgmr.msra.gmra.mrb[44].mxu1 %vm198_vm9, %v6934_v43 }
 0xf9e   :  { %3473 = vmatprep.mubr.bf16.mxu1 %v7192_v3 }
 0xfa5   :  { %6010 = vmatmul.mubr.msk.bf16.gmra.mrb[48].mxu1 %vm198_vm9, %v6935_v46 }
 0xfa6   :  { %4300 = vmatprep.mubr.bf16.mxu1 %v7192_v3 }
0x1070   :  { %v3465_v35 = vpop.f32.mrb[44].mxu1 }
0x1071   :  { %v3467_v47 = vpop.f32.mrb[45].mxu1  ;;  %v6230_v9 = vadd.f32 %v3465_v35, %v2985_v16 }
0x1072   :  { %v3469_v49 = vpop.f32.mrb[46].mxu1  ;;  %v6231_v12 = vadd.f32 %v3467_v47, %v2986_v21 }
0x1073   :  { %v3471_v50 = vpop.f32.mrb[47].mxu1  ;;  %v6232_v14 = vadd.f32 %v3469_v49, %v2987_v8 }
0x1074   :  { %v6233_v17 = vadd.f32 %v3471_v50, %v2988_v29 }
0x1078   :  { %v3475_v57 = vpop.f32.mrb[48].mxu1 }
0x1079   :  { %v6234_v44 = vadd.f32 %v3475_v57, %v2989_v53  ;;  %v3477_v48 = vpop.f32.mrb[49].mxu1  ;;  %v6937_v57 = vld [vmem:[%s8716_s4 + $0x228] sm:$0xff]  }
0x107a   :  { %v6235_v26 = vadd.f32 %v3477_v48, %v2990_v56  ;;  %v3479_v60 = vpop.f32.mrb[50].mxu1  ;;  %v6936_v56 = vld [vmem:[%s8716_s4 + $0x220] sm:$0xff]  }
0x107b   :  { %v6011_v61 = vmul.f32 -1.442695, %v6234_v44  ;;  %v6236_v62 = vadd.f32 %v3479_v60, %v2991_v54  ;;  %v3481_v0 = vpop.f32.mrb[51].mxu1  ;;  %v3537_v54 = vpop.permute.xlu0 %3536 }
0x107c   :  { %v6012_v1 = vmul.f32 -1.442695, %v6235_v26  ;;  %v6237_v4 = vadd.f32 %v3481_v0, %v2992_v59  ;;  %v3542_v26 = vpop.permute.xlu1 %3541 }
0x107d   :  { %7071 = vpow2.f32 %v6011_v61  ;;  %v6013_v5 = vmul.f32 -1.442695, %v6236_v62 }
0x107e   :  { %7073 = vpow2.f32 %v6012_v1  ;;  %v6014_v7 = vmul.f32 -1.442695, %v6237_v4 }
0x107f   :  { %7075 = vpow2.f32 %v6013_v5 }
0x1080   :  { %7077 = vpow2.f32 %v6014_v7 }
0x1081   :  { %7079 = vtanh.f32 %v6230_v9 }
0x1082   :  { %7081 = vtanh.f32 %v6231_v12 }
0x1083   :  { %7083 = vtanh.f32 %v6232_v14 }
0x1084   :  { %7085 = vtanh.f32 %v6233_v17  ;;  %v3532_v17 = vld [vmem:[%s8717_s5 + $0xc0] sm:$0xff] }
0x1087   :  { %v7072_v6 = vpop.eup %7071 }
0x1088   :  { %v7074_v10 = vpop.eup %7073  ;;  %v3508_v28 = vadd.f32 1.0, %v7072_v6  ;;  %v3533_v6 = vld [vmem:[%s8717_s5 + $0xc8] sm:$0xff] }
0x1089   :  { %v7076_v19 = vpop.eup %7075  ;;  %v3509_v22 = vadd.f32 1.0, %v7074_v10  ;;  %v4174_v10 = vld [vmem:[%s8717_s5 + $0xd0] sm:$0xff] }
0x108a   :  { %v7078_v25 = vpop.eup %7077  ;;  %7087 = vrcp.f32 %v3508_v28  ;;  %v3510_v27 = vadd.f32 1.0, %v7076_v19  ;;  %v4175_v28 = vld [vmem:[%s8717_s5 + $0xd8] sm:$0xff]  ;;  %v4249_v19 = vld [vmem:[%s8717_s5 + $0xe0] sm:$0xff] }
0x108b   :  { %7089 = vrcp.f32 %v3509_v22  ;;  %v3511_v30 = vadd.f32 1.0, %v7078_v25  ;;  %v7080_v31 = vpop.eup %7079  ;;  %v4319_v22 = vld [vmem:[%s8717_s5 + $0xf0] sm:$0xff]  ;;  %v4320_v25 = vld [vmem:[%s8717_s5 + $0xf8] sm:$0xff] }
0x108c   :  { %7091 = vrcp.f32 %v3510_v27  ;;  %v7082_v32 = vpop.eup %7081 }
0x108d   :  { %7093 = vrcp.f32 %v3511_v30  ;;  %v7084_v38 = vpop.eup %7083 }
0x108e   :  { %v7086_v39 = vpop.eup %7085 }
0x1094   :  { %v7088_v40 = vpop.eup %7087 }
0x1095   :  { %v7090_v41 = vpop.eup %7089  ;;  %v3520_v42 = vmul.f32 %v7088_v40, %v7080_v31 }
0x1096   :  { %v7092_v43 = vpop.eup %7091  ;;  %v3521_v46 = vmul.f32 %v7090_v41, %v7082_v32 }
0x1097   :  { %v7094_v35 = vpop.eup %7093  ;;  %v3522_v47 = vmul.f32 %v7092_v43, %v7084_v38 }
0x1098   :  { %v3523_v49 = vmul.f32 %v7094_v35, %v7086_v39 }
0x1099   :  { %v3528_v50 = vpack.c.bf16 %v3522_v47, %v3520_v42 }
0x109a   :  { %v3529_v53 = vpack.c.bf16 %v3523_v49, %v3521_v46 }
0x109c   :  { %3570 = vmatprep.subr.bf16.mxu0 %v3529_v53 }
0x109d   :  { %3571 = vmatpush1.bf16.msra.mxu0 %v3528_v50 }
0x10a0   :  { %6017 = vmatmul.mubr.msk.bf16.vlgmr.msra.gmra.mrb[28].mxu0 %vm198_vm9, %v6936_v56 }
0x10a1   :  { %3612 = vmatprep.mubr.bf16.mxu0 %v7192_v3 }
0x10a8   :  { %6018 = vmatmul.mubr.msk.bf16.gmra.mrb[32].mxu0 %vm198_vm9, %v6937_v57 }
0x10a9   :  { %3717 = vmatprep.mubr.bf16.mxu0 %v7192_v3 }
0x1173   :  { %v3604_v44 = vpop.f32.mrb[28].mxu0 }
0x1174   :  { %v3605_v48 = vadd.f32 %v3604_v44, %v3537_v54  ;;  %v3606_v59 = vpop.f32.mrb[29].mxu0 }
0x1175   :  { %v3607_v60 = vadd.f32 %v3606_v59, %v3537_v54  ;;  %v3608_v61 = vpop.f32.mrb[30].mxu0  ;;  %v6938_v54 = vld [vmem:[%s8716_s4 + $0x1d0] sm:$0xff]  }
0x1176   :  { %v3623_v62 = vadd.f32 %v3605_v48, %v8027_v20  ;;  %v3609_v0 = vadd.f32 %v3608_v61, %v3542_v26  ;;  %v3610_v1 = vpop.f32.mrb[31].mxu0 }
0x1177   :  { %v3624_v4 = vadd.f32 %v3607_v60, %v8030_v24  ;;  %v3611_v5 = vadd.f32 %v3610_v1, %v3542_v26 }
0x1178   :  { %v8183_v7 = vmul.f32 %v3623_v62, %v7256_v15  ;;  %v3625_v16 = vadd.f32 %v3609_v0, %v8033_v23  ;;  %v6939_v62 = vld [vmem:[%s8716_s4 + $0x1d8] sm:$0xff]  }
0x1179   :  { %v8187_v21 = vmul.f32 %v3624_v4, %v7258_v18  ;;  %v3626_v8 = vadd.f32 %v3611_v5, %v8036_v11  ;;  %v6940_v5 = vld [vmem:[%s8716_s4 + $0x1e0] sm:$0xff]  }
0x117a   :  { %v8191_v9 = vmul.f32 %v3625_v16, %v7256_v15 }
0x117b   :  { %v3630_v20 = vmul.f32 %v3626_v8, %v7258_v18  ;;  %v6754_v29 = vpack.i.bf16 %v8187_v21, %v8183_v7 }
0x117c   :  { %v6779_v24 = vpack.i.bf16 %v8191_v9, %v8183_v7  ;;  %v3853_v12 = vpack.c.bf16 %v8191_v9, %v8183_v7 }
0x117d   :  { %6755 = vrot.lane.b32.xlu0 %v6754_v29, %s7194_s7  ;;  %v6759_v23 = vpack.i.bf16 %v3630_v20, %v8191_v9  ;;  %v6774_v11 = vpack.i.bf16 %v3630_v20, %v8187_v21  ;;  %v3854_v14 = vpack.c.bf16 %v3630_v20, %v8187_v21  ;;  %v6941_v20 = vld [vmem:[%s8716_s4 + $0x1e8] sm:$0xff]  }
0x117f   :  { %6760 = vrot.lane.b32.xlu1 %v6759_v23, %s7194_s7 }
0x1181   :  { %6765 = vrot.lane.b32.xlu0 %v6754_v29, %s7193_s1 }
0x1183   :  { %6770 = vrot.lane.b32.xlu1 %v6759_v23, %s7193_s1 }
0x1185   :  { %6775 = vrot.lane.b32.xlu0 %v6774_v11, %s7195_s8 }
0x1187   :  { %6780 = vrot.lane.b32.xlu1 %v6779_v24, %s7195_s8 }
0x1189   :  { %6785 = vrot.lane.b32.xlu0 %v6774_v11, %s7196_s9 }
0x118b   :  { %6790 = vrot.lane.b32.xlu1 %v6779_v24, %s7196_s9 }
0x118d   :  { %3546 = vperm.xlu0 %6552, %v3532_v17  }
0x118f   :  { %3551 = vperm.xlu1 %6593, %v3533_v6  }
0x1191   :  { %4178 = vperm.xlu0 %6552, %v4174_v10  }
0x1193   :  { %4183 = vperm.xlu1 %6593, %v4175_v28  }
0x1195   :  { %4253 = vperm.xlu0 %6552, %v4249_v19  }
0x1197   :  { %4323 = vperm.xlu1 %6593, %v4319_v22   ;;  %v6943_v22 = vld [vmem:[%s8716_s4 + $0x1f8] sm:$0xff]  }
0x1199   :  { %4328 = vperm.xlu0 %6552, %v4320_v25  }
0x11ef   :  { %v6756_v27 = vpop.permute.xlu0 %6755 }
0x11f0   :  { %v6758_v30 = vunpack.i.h.bf16 %v6756_v27  ;;  %v6757_v31 = vunpack.i.l.bf16 %v6756_v27 }
0x11f1   :  { %v6761_v32 = vpop.permute.xlu1 %6760 }
0x11f2   :  { %v6763_v38 = vunpack.i.h.bf16 %v6761_v32  ;;  %v6762_v39 = vunpack.i.l.bf16 %v6761_v32  ;;  %v3651_v40 = vsel %vm79_vm1, %v6757_v31, %v6758_v30  ;;  %v3657_v41 = vsel %vm79_vm1, 0.0, %v6757_v31 }
0x11f3   :  { %v6766_v42 = vpop.permute.xlu0 %6765 }
0x11f4   :  { %v3652_v43 = vsel %vm79_vm1, %v6762_v39, %v6763_v38  ;;  %v3658_v46 = vsel %vm79_vm1, 0.0, %v6762_v39  ;;  %v6768_v35 = vunpack.i.h.bf16 %v6766_v42  ;;  %v6767_v47 = vunpack.i.l.bf16 %v6766_v42  ;;  %v6944_v38 = vld [vmem:[%s8716_s4 + $0x200] sm:$0xff]   ;;  %v6947_v42 = vld [vmem:[%s8716_s4 + $0x218] sm:$0xff]  }
0x11f5   :  { %v6022_v49 = vpack.c.bf16 %v3652_v43, %v3651_v40  ;;  %v6025_v50 = vpack.c.bf16 %v3658_v46, %v3657_v41  ;;  %v6771_v53 = vpop.permute.xlu1 %6770  ;;  %v6945_v40 = vld [vmem:[%s8716_s4 + $0x208] sm:$0xff]   ;;  %v6946_v41 = vld [vmem:[%s8716_s4 + $0x210] sm:$0xff]  }
0x11f6   :  { %v6773_v56 = vunpack.i.h.bf16 %v6771_v53  ;;  %v6772_v57 = vunpack.i.l.bf16 %v6771_v53  ;;  %v3754_v44 = vsel %vm274_vm5, %v6767_v47, %v6768_v35  ;;  %v3760_v48 = vsel %vm274_vm5, 0.0, %v6767_v47 }
0x11f7   :  { %6023 = vmatprep.subr.msk.bf16.mxu0 %vm7302_vm4, %v6022_v49  ;;  %v6776_v0 = vpop.permute.xlu0 %6775  ;;  %v3635_v49 = vld [vmem:[%s8714_s2 + $0x160] sm:$0xff] }
0x11f8   :  { %v3755_v59 = vsel %vm274_vm5, %v6772_v57, %v6773_v56  ;;  %v3761_v26 = vsel %vm274_vm5, 0.0, %v6772_v57  ;;  %6026 = vmatpush1.bf16.msk.msra.mxu0 %vm7306_vm6, %v6025_v50  ;;  %v6778_v1 = vunpack.i.h.bf16 %v6776_v0  ;;  %v6777_v4 = vunpack.i.l.bf16 %v6776_v0  ;;  %v3636_v50 = vld [vmem:[%s8714_s2 + $0x168] sm:$0xff]  ;;  %v3637_v56 = vld [vmem:[%s8714_s2 + $0x170] sm:$0xff] }
0x11f9   :  { %v6032_v60 = vpack.c.bf16 %v3755_v59, %v3754_v44  ;;  %v6035_v61 = vpack.c.bf16 %v3761_v26, %v3760_v48  ;;  %v6781_v29 = vpop.permute.xlu1 %6780  ;;  %v3638_v44 = vld [vmem:[%s8714_s2 + $0x178] sm:$0xff] }
0x11fa   :  { %v3947_v16 = vsel %vm463_vm12, %v6778_v1, 0.0  ;;  %v3946_v21 = vsel %vm463_vm12, %v6777_v4, 0.0  ;;  %v6783_v23 = vunpack.i.h.bf16 %v6781_v29  ;;  %v6782_v11 = vunpack.i.l.bf16 %v6781_v29 }
0x11fb   :  { %6027 = vmatmul.mubr.msk.bf16.vlgmr.msra.gmra.mrb[36].mxu0 %vm198_vm9, %v6938_v54  ;;  %6033 = vmatprep.subr.msk.bf16.mxu0 %vm7323_vm10, %v6032_v60  ;;  %v6046_v8 = vpack.c.bf16 %v3947_v16, %v3946_v21  ;;  %v6786_v24 = vpop.permute.xlu0 %6785  ;;  %v3632_v16 = vld [vmem:[%s8714_s2 + $0x148] sm:$0xff]  ;;  %v3633_v21 = vld [vmem:[%s8714_s2 + $0x150] sm:$0xff] }
0x11fc   :  { %6036 = vmatpush1.bf16.msk.msra.mxu0 %vm7327_vm11, %v6035_v61  ;;  %3727 = vmatprep.mubr.bf16.mxu0 %v7192_v3  ;;  %v6787_v17 = vunpack.i.l.bf16 %v6786_v24  ;;  %v3940_v7 = vsel %vm463_vm12, %v6782_v11, %v6777_v4  ;;  %v3941_v9 = vsel %vm463_vm12, %v6783_v23, %v6778_v1 }
0x11fd   :  { %3871 = vmatprep.subr.bf16.mxu0 %v3854_v14  ;;  %v6788_v14 = vunpack.i.h.bf16 %v6786_v24  ;;  %v6049_v28 = vpack.c.bf16 %v3941_v9, %v3940_v7  ;;  %v6791_v25 = vpop.permute.xlu1 %6790 }
0x11fe   :  { %v4049_v10 = vsel %vm569_vm15, %v6787_v17, 0.0  ;;  %v6793_v27 = vunpack.i.h.bf16 %v6791_v25  ;;  %v6792_v30 = vunpack.i.l.bf16 %v6791_v25 }
0x11ff   :  { %v4050_v6 = vsel %vm569_vm15, %v6788_v14, 0.0 }
0x1200   :  { %v6056_v19 = vpack.c.bf16 %v4050_v6, %v4049_v10  ;;  %v4043_v31 = vsel %vm569_vm15, %v6792_v30, %v6787_v17  ;;  %v4044_v32 = vsel %vm569_vm15, %v6793_v27, %v6788_v14 }
0x1201   :  { %v6059_v39 = vpack.c.bf16 %v4044_v32, %v4043_v31 }
0x1203   :  { %6028 = vmatmul.mubr.msk.bf16.gmra.mrb[40].mxu0 %vm198_vm9, %v6939_v62 }
0x1204   :  { %3820 = vmatprep.mubr.bf16.mxu0 %v7192_v3 }
0x120b   :  { %6037 = vmatmul.mubr.msk.bf16.vlgmr.msra.gmra.mrb[36].mxu0 %vm198_vm9, %v6940_v5  ;;  %v3631_v5 = vld [vmem:[%s8714_s2 + $0x140] sm:$0xff] }
0x120c   :  { %3872 = vmatpush1.bf16.msra.mxu0 %v3853_v12  ;;  %3830 = vmatprep.mubr.bf16.mxu0 %v7192_v3  ;;  %v6942_v12 = vld [vmem:[%s8716_s4 + $0x1f0] sm:$0xff]  }
0x120d   :  { %6047 = vmatprep.subr.msk.bf16.mxu0 %vm7352_vm14, %v6046_v8 }
0x1213   :  { %6038 = vmatmul.mubr.msk.bf16.gmra.mrb[40].mxu0 %vm198_vm9, %v6941_v20  ;;  %v3634_v20 = vld [vmem:[%s8714_s2 + $0x158] sm:$0xff] }
0x1214   :  { %3903 = vmatprep.mubr.bf16.mxu0 %v7192_v3 }
0x121b   :  { %6041 = vmatmul.mubr.msk.bf16.vlgmr.msra.gmra.mrb[36].mxu0 %vm198_vm9, %v6942_v12 }
0x121c   :  { %6050 = vmatpush1.bf16.msk.msra.mxu0 %vm7374_vm7, %v6049_v28  ;;  %3913 = vmatprep.mubr.bf16.mxu0 %v7192_v3 }
0x121d   :  { %6057 = vmatprep.subr.msk.bf16.mxu0 %vm7378_vm8, %v6056_v19 }
0x1223   :  { %6042 = vmatmul.mubr.msk.bf16.gmra.mrb[40].mxu0 %vm198_vm9, %v6943_v22 }
0x1224   :  { %4006 = vmatprep.mubr.bf16.mxu0 %v7192_v3 }
0x122b   :  { %6051 = vmatmul.mubr.msk.bf16.vlgmr.msra.gmra.mrb[36].mxu0 %vm198_vm9, %v6944_v38 }
0x122c   :  { %6060 = vmatpush1.bf16.msk.msra.mxu0 %vm7399_vm2, %v6059_v39  ;;  %4016 = vmatprep.mubr.bf16.mxu0 %v7192_v3 }
0x1233   :  { %6052 = vmatmul.mubr.msk.bf16.gmra.mrb[40].mxu0 %vm198_vm9, %v6945_v40 }
0x1234   :  { %4109 = vmatprep.mubr.bf16.mxu0 %v7192_v3 }
0x123b   :  { %6061 = vmatmul.mubr.msk.bf16.vlgmr.msra.gmra.mrb[36].mxu0 %vm198_vm9, %v6946_v41 }
0x123c   :  { %4119 = vmatprep.mubr.bf16.mxu0 %v7192_v3 }
0x1243   :  { %6062 = vmatmul.mubr.msk.bf16.gmra.mrb[40].mxu0 %vm198_vm9, %v6947_v42 }
0x1244   :  { %4226 = vmatprep.mubr.bf16.mxu0 %v7192_v3 }
0x130e   :  { %v4111_v43 = vpop.f32.mrb[36].mxu0 }
0x130f   :  { %v4113_v46 = vpop.f32.mrb[37].mxu0  ;;  %v6246_v8 = vadd.f32 %v4111_v43, %v3631_v5 }
0x1310   :  { %v4115_v35 = vpop.f32.mrb[38].mxu0  ;;  %v6247_v29 = vadd.f32 %v4113_v46, %v3632_v16  ;;  %v6948_v46 = vld [vmem:[%s8716_s4 + $0x230] sm:$0xff]  }
0x1311   :  { %v4117_v47 = vpop.f32.mrb[39].mxu0  ;;  %v6248_v24 = vadd.f32 %v4115_v35, %v3633_v21  ;;  %v3547_v35 = vpop.permute.xlu0 %3546  ;;  %v6949_v21 = vld [vmem:[%s8716_s4 + $0x238] sm:$0xff]  }
0x1312   :  { %v6249_v23 = vadd.f32 %v4117_v47, %v3634_v20  ;;  %v3552_v47 = vpop.permute.xlu1 %3551 }
0x1316   :  { %v4121_v53 = vpop.f32.mrb[40].mxu0 }
0x1317   :  { %v6250_v57 = vadd.f32 %v4121_v53, %v3635_v49  ;;  %v4123_v54 = vpop.f32.mrb[41].mxu0  ;;  %v4179_v49 = vpop.permute.xlu0 %4178 }
0x1318   :  { %v6251_v48 = vadd.f32 %v4123_v54, %v3636_v50  ;;  %v4125_v59 = vpop.f32.mrb[42].mxu0  ;;  %v4184_v50 = vpop.permute.xlu1 %4183  ;;  %v6238_v53 = vadd.f32 %v4179_v49, %v3547_v35 }
0x1319   :  { %v6063_v26 = vmul.f32 -1.442695, %v6250_v57  ;;  %v6252_v60 = vadd.f32 %v4125_v59, %v3637_v56  ;;  %v4127_v61 = vpop.f32.mrb[43].mxu0  ;;  %v6242_v57 = vadd.f32 %v4184_v50, %v3552_v47 }
0x131a   :  { %v6064_v62 = vmul.f32 -1.442695, %v6251_v48  ;;  %v6253_v0 = vadd.f32 %v4127_v61, %v3638_v44 }
0x131b   :  { %7095 = vpow2.f32 %v6063_v26  ;;  %v6065_v1 = vmul.f32 -1.442695, %v6252_v60 }
0x131c   :  { %7097 = vpow2.f32 %v6064_v62  ;;  %v6066_v4 = vmul.f32 -1.442695, %v6253_v0 }
0x131d   :  { %7099 = vpow2.f32 %v6065_v1 }
0x131e   :  { %7101 = vpow2.f32 %v6066_v4 }
0x131f   :  { %7103 = vtanh.f32 %v6246_v8  ;;  %v4254_v8 = vpop.permute.xlu0 %4253 }
0x1320   :  { %7105 = vtanh.f32 %v6247_v29 }
0x1321   :  { %7107 = vtanh.f32 %v6248_v24 }
0x1322   :  { %7109 = vtanh.f32 %v6249_v23 }
0x1325   :  { %v7096_v11 = vpop.eup %7095 }
0x1326   :  { %v7098_v14 = vpop.eup %7097  ;;  %v4154_v17 = vadd.f32 1.0, %v7096_v11 }
0x1327   :  { %v7100_v7 = vpop.eup %7099  ;;  %v4155_v9 = vadd.f32 1.0, %v7098_v14 }
0x1328   :  { %v7102_v12 = vpop.eup %7101  ;;  %7111 = vrcp.f32 %v4154_v17  ;;  %v4156_v6 = vadd.f32 1.0, %v7100_v7  ;;  %v4311_v17 = vmul.f32 %v7661_v34, %v7256_v15  ;;  %v6950_v34 = vld [vmem:[%s8715_s3 + $0x18] sm:$0xff]  }
0x1329   :  { %7113 = vrcp.f32 %v4155_v9  ;;  %v4157_v10 = vadd.f32 1.0, %v7102_v12  ;;  %v7104_v28 = vpop.eup %7103  ;;  %v4312_v12 = vmul.f32 %v7663_v37, %v7258_v18  ;;  %v4324_v37 = vpop.permute.xlu1 %4323 }
0x132a   :  { %7115 = vrcp.f32 %v4156_v6  ;;  %v7106_v19 = vpop.eup %7105 }
0x132b   :  { %7117 = vrcp.f32 %v4157_v10  ;;  %v7108_v22 = vpop.eup %7107 }
0x132c   :  { %v7110_v25 = vpop.eup %7109 }
0x1332   :  { %v7112_v27 = vpop.eup %7111 }
0x1333   :  { %v7114_v30 = vpop.eup %7113  ;;  %v4166_v31 = vmul.f32 %v7112_v27, %v7104_v28 }
0x1334   :  { %v7116_v32 = vpop.eup %7115  ;;  %v4167_v38 = vmul.f32 %v7114_v30, %v7106_v19 }
0x1335   :  { %v7118_v39 = vpop.eup %7117  ;;  %v4168_v40 = vmul.f32 %v7116_v32, %v7108_v22 }
0x1336   :  { %v4169_v41 = vmul.f32 %v7118_v39, %v7110_v25 }
0x1337   :  { %v4172_v42 = vpack.c.bf16 %v4168_v40, %v4166_v31  ;;  %v4329_v31 = vpop.permute.xlu0 %4328 }
0x1338   :  { %v4173_v43 = vpack.c.bf16 %v4169_v41, %v4167_v38 }
0x133a   :  { %4194 = vmatprep.subr.bf16.mxu0 %v4173_v43 }
0x133b   :  { %4195 = vmatpush1.bf16.msra.mxu0 %v4172_v42 }
0x133e   :  { %6068 = vmatmul.mubr.msk.bf16.vlgmr.msra.gmra.mrb[32].mxu0 %vm198_vm9, %v6948_v46 }
0x133f   :  { %5009 = vmatprep.mubr.bf16.mxu0 %v7192_v3 }
0x1411   :  { %v4228_v56 = vpop.f32.mrb[32].mxu0 }
0x1412   :  { %v6239_v54 = vadd.f32 %v6238_v53, %v4228_v56  ;;  %v4230_v44 = vpop.f32.mrb[33].mxu0  ;;  %v4937_v56 = vld [vmem:[%s8717_s5 + $0x100] sm:$0xff] }
0x1413   :  { %v6241_v48 = vadd.f32 %v6238_v53, %v4230_v44  ;;  %v4232_v59 = vpop.f32.mrb[34].mxu0 }
0x1414   :  { %v6243_v26 = vadd.f32 %v6242_v57, %v4232_v59  ;;  %v4234_v60 = vpop.f32.mrb[35].mxu0  ;;  %v4241_v62 = vmul.f32 %v6239_v54, %v7256_v15 }
0x1415   :  { %v6245_v61 = vadd.f32 %v6242_v57, %v4234_v60  ;;  %v4242_v1 = vmul.f32 %v6241_v48, %v7258_v18  ;;  %v4938_v57 = vld [vmem:[%s8717_s5 + $0x108] sm:$0xff] }
0x1416   :  { %v4243_v0 = vmul.f32 %v6243_v26, %v7256_v15 }
0x1417   :  { %v4244_v4 = vmul.f32 %v6245_v61, %v7258_v18 }
0x1418   :  { %v4247_v5 = vpack.c.bf16 %v4243_v0, %v4241_v62 }
0x1419   :  { %v4248_v16 = vpack.c.bf16 %v4244_v4, %v4242_v1 }
0x141b   :  { %4268 = vmatprep.subr.bf16.mxu1 %v4248_v16 }
0x141c   :  { %4269 = vmatpush1.bf16.msra.mxu1 %v4247_v5 }
0x141f   :  { %6070 = vmatmul.mubr.msk.bf16.vlgmr.msra.gmra.mrb[52].mxu1 %vm198_vm9, %v6949_v21 }
0x1420   :  { %4377 = vmatprep.mubr.bf16.mxu1 %v7192_v3 }
0x14f2   :  { %v4302_v20 = vpop.f32.mrb[52].mxu1 }
0x14f3   :  { %v4303_v29 = vadd.f32 %v4302_v20, %v4254_v8  ;;  %v4304_v24 = vpop.f32.mrb[53].mxu1 }
0x14f4   :  { %v4305_v23 = vadd.f32 %v4304_v24, %v4254_v8  ;;  %v4306_v11 = vpop.f32.mrb[54].mxu1 }
0x14f5   :  { %v4309_v14 = vmul.f32 %v4303_v29, %v7256_v15  ;;  %v4307_v7 = vpop.f32.mrb[55].mxu1 }
0x14f6   :  { %v4310_v9 = vmul.f32 %v4305_v23, %v7258_v18  ;;  %v6951_v23 = vld [vmem:[%s8716_s4 + $0x240] sm:$0xff]  }
0x14f7   :  { %v8361_v6 = vadd.f32 %v4311_v17, %v4309_v14 }
0x14f8   :  { %v8363_v10 = vadd.f32 %v4312_v12, %v4310_v9 }
0x14f9   :  { %v4317_v28 = vpack.c.bf16 %v8361_v6, %v8361_v6 }
0x14fa   :  { %v4318_v19 = vpack.c.bf16 %v8363_v10, %v8363_v10 }
0x14fb   :  { %v4340_v22 = vsel %vm83_vm0, %v4317_v28, 0 }
0x14fc   :  { %6072 = vmatprep.subr.msk.bf16.mxu1 %vm83_vm0, %v4318_v19  ;;  %v6952_v19 = vld [vmem:[%s8716_s4 + $0x248] sm:$0xff]   ;;  %vm5728_vm0 = vcmask 1041408  }
0x14fd   :  { %4346 = vmatpush1.bf16.msra.mxu1 %v4340_v22 }
0x1500   :  { %6073 = vmatmul.mubr.msk.bf16.vlgmr.msra.gmra.mrb[56].mxu1 %vm79_vm1, %v6950_v34 }
0x1501   :  { %4478 = vmatprep.mubr.bf16.mxu1 %v7192_v3 }
0x15d3   :  { %v4379_v25 = vpop.f32.mrb[56].mxu1 }
0x15d4   :  { %v4380_v27 = vadd.f32 %v4379_v25, %v4324_v37  ;;  %v4381_v30 = vpop.f32.mrb[57].mxu1  ;;  %v6953_v25 = vld [vmem:[%s8716_s4 + $0x250] sm:$0xff]  }
0x15d5   :  { %v4382_v32 = vadd.f32 %v4381_v30, %v4324_v37  ;;  %v4383_v38 = vpop.f32.mrb[58].mxu1 }
0x15d6   :  { %v8377_v39 = vmul.f32 %v4380_v27, %v7256_v15  ;;  %v4384_v40 = vadd.f32 %v4383_v38, %v4329_v31  ;;  %v4385_v41 = vpop.f32.mrb[59].mxu1  ;;  %v6954_v38 = vld [vmem:[%s8716_s4 + $0x258] sm:$0xff]  }
0x15d7   :  { %v8380_v42 = vmul.f32 %v4382_v32, %v7258_v18  ;;  %v4386_v43 = vadd.f32 %v4385_v41, %v4329_v31 }
0x15d8   :  { %v8383_v46 = vmul.f32 %v4384_v40, %v7256_v15 }
0x15d9   :  { %v8386_v35 = vmul.f32 %v4386_v43, %v7258_v18  ;;  %v6794_v47 = vpack.i.bf16 %v8380_v42, %v8377_v39 }
0x15da   :  { %v6819_v53 = vpack.i.bf16 %v8383_v46, %v8377_v39  ;;  %v4614_v31 = vpack.c.bf16 %v8383_v46, %v8377_v39 }
0x15db   :  { %6795 = vrot.lane.b32.xlu1 %v6794_v47, %s7194_s7  ;;  %v6799_v49 = vpack.i.bf16 %v8386_v35, %v8383_v46  ;;  %v6814_v50 = vpack.i.bf16 %v8386_v35, %v8380_v42  ;;  %v4615_v28 = vpack.c.bf16 %v8386_v35, %v8380_v42 }
0x15dd   :  { %6800 = vrot.lane.b32.xlu0 %v6799_v49, %s7194_s7 }
0x15df   :  { %6805 = vrot.lane.b32.xlu1 %v6794_v47, %s7193_s1 }
0x15e1   :  { %6810 = vrot.lane.b32.xlu0 %v6799_v49, %s7193_s1 }
0x15e3   :  { %6815 = vrot.lane.b32.xlu1 %v6814_v50, %s7195_s8 }
0x15e5   :  { %6820 = vrot.lane.b32.xlu0 %v6819_v53, %s7195_s8 }
0x15e7   :  { %6825 = vrot.lane.b32.xlu1 %v6814_v50, %s7196_s9 }
0x15e9   :  { %6830 = vrot.lane.b32.xlu0 %v6819_v53, %s7196_s9 }
0x15eb   :  { %4943 = vperm.xlu1 %6593, %v4937_v56  }
0x15ed   :  { %4948 = vperm.xlu0 %6552, %v4938_v57   ;;  %v6955_v57 = vld [vmem:[%s8716_s4 + $0x260] sm:$0xff]  }
0x164d   :  { %v6796_v54 = vpop.permute.xlu1 %6795 }
0x164e   :  { %v6798_v44 = vunpack.i.h.bf16 %v6796_v54  ;;  %v6797_v48 = vunpack.i.l.bf16 %v6796_v54 }
0x164f   :  { %v6801_v59 = vpop.permute.xlu0 %6800 }
0x1650   :  { %v6803_v26 = vunpack.i.h.bf16 %v6801_v59  ;;  %v6802_v60 = vunpack.i.l.bf16 %v6801_v59  ;;  %v4412_v61 = vsel %vm79_vm1, %v6797_v48, %v6798_v44  ;;  %v4418_v62 = vsel %vm79_vm1, 0.0, %v6797_v48 }
0x1651   :  { %v6806_v0 = vpop.permute.xlu1 %6805 }
0x1652   :  { %v4413_v1 = vsel %vm79_vm1, %v6802_v60, %v6803_v26  ;;  %v4419_v4 = vsel %vm79_vm1, 0.0, %v6802_v60  ;;  %v6808_v5 = vunpack.i.h.bf16 %v6806_v0  ;;  %v6807_v16 = vunpack.i.l.bf16 %v6806_v0  ;;  %v6956_v26 = vld [vmem:[%s8716_s4 + $0x268] sm:$0xff]  }
0x1653   :  { %v6077_v21 = vpack.c.bf16 %v4413_v1, %v4412_v61  ;;  %v6080_v8 = vpack.c.bf16 %v4419_v4, %v4418_v62  ;;  %v6811_v20 = vpop.permute.xlu0 %6810  ;;  %v6957_v4 = vld [vmem:[%s8716_s4 + $0x270] sm:$0xff]  }
0x1654   :  { %v6813_v29 = vunpack.i.h.bf16 %v6811_v20  ;;  %v6812_v24 = vunpack.i.l.bf16 %v6811_v20  ;;  %v4515_v11 = vsel %vm274_vm5, %v6807_v16, %v6808_v5  ;;  %v4521_v14 = vsel %vm274_vm5, 0.0, %v6807_v16  ;;  %v6958_v16 = vld [vmem:[%s8716_s4 + $0x278] sm:$0xff]  }
0x1655   :  { %6078 = vmatprep.subr.msk.bf16.mxu1 %vm7302_vm4, %v6077_v21  ;;  %v6816_v22 = vpop.permute.xlu1 %6815  ;;  %v6959_v21 = vld [vmem:[%s8716_s4 + $0x280] sm:$0xff]  }
0x1656   :  { %v4516_v17 = vsel %vm274_vm5, %v6812_v24, %v6813_v29  ;;  %v4522_v7 = vsel %vm274_vm5, 0.0, %v6812_v24  ;;  %6081 = vmatpush1.bf16.msk.msra.mxu1 %vm7306_vm6, %v6080_v8  ;;  %v6818_v34 = vunpack.i.h.bf16 %v6816_v22  ;;  %v6817_v37 = vunpack.i.l.bf16 %v6816_v22  ;;  %v6960_v8 = vld [vmem:[%s8716_s4 + $0x288] sm:$0xff]  }
0x1657   :  { %v6087_v9 = vpack.c.bf16 %v4516_v17, %v4515_v11  ;;  %v6090_v12 = vpack.c.bf16 %v4522_v7, %v4521_v14  ;;  %v6821_v40 = vpop.permute.xlu0 %6820  ;;  %v4396_v11 = vld [vmem:[%s8714_s2 + $0x1a0] sm:$0xff]  ;;  %v4397_v14 = vld [vmem:[%s8714_s2 + $0x1a8] sm:$0xff]  ;;  %v4398_v7 = vld [vmem:[%s8714_s2 + $0x1b0] sm:$0xff] }
0x1658   :  { %v4708_v27 = vsel %vm463_vm12, %v6818_v34, 0.0  ;;  %v4707_v30 = vsel %vm463_vm12, %v6817_v37, 0.0  ;;  %v6823_v43 = vunpack.i.h.bf16 %v6821_v40  ;;  %v6822_v47 = vunpack.i.l.bf16 %v6821_v40  ;;  %v4393_v40 = vld [vmem:[%s8714_s2 + $0x188] sm:$0xff] }
0x1659   :  { %6082 = vmatmul.mubr.msk.bf16.vlgmr.msra.gmra.mrb[60].mxu1 %vm198_vm9, %v6951_v23  ;;  %6088 = vmatprep.subr.msk.bf16.mxu1 %vm7323_vm10, %v6087_v9  ;;  %v6101_v32 = vpack.c.bf16 %v4708_v27, %v4707_v30  ;;  %v6826_v41 = vpop.permute.xlu1 %6825 }
0x165a   :  { %6091 = vmatpush1.bf16.msk.msra.mxu1 %vm7327_vm11, %v6090_v12  ;;  %4488 = vmatprep.mubr.bf16.mxu1 %v7192_v3  ;;  %v6828_v49 = vunpack.i.h.bf16 %v6826_v41  ;;  %v6827_v50 = vunpack.i.l.bf16 %v6826_v41  ;;  %v4701_v53 = vsel %vm463_vm12, %v6822_v47, %v6817_v37  ;;  %v4702_v56 = vsel %vm463_vm12, %v6823_v43, %v6818_v34  ;;  %v4394_v41 = vld [vmem:[%s8714_s2 + $0x190] sm:$0xff]  ;;  %v4395_v47 = vld [vmem:[%s8714_s2 + $0x198] sm:$0xff] }
0x165b   :  { %4632 = vmatprep.subr.bf16.mxu1 %v4615_v28  ;;  %v6104_v48 = vpack.c.bf16 %v4702_v56, %v4701_v53  ;;  %v6831_v60 = vpop.permute.xlu0 %6830  ;;  %v4399_v28 = vld [vmem:[%s8714_s2 + $0x1b8] sm:$0xff] }
0x165c   :  { %v4811_v54 = vsel %vm569_vm15, %v6828_v49, 0.0  ;;  %v4810_v44 = vsel %vm569_vm15, %v6827_v50, 0.0  ;;  %v6833_v61 = vunpack.i.h.bf16 %v6831_v60  ;;  %v6832_v62 = vunpack.i.l.bf16 %v6831_v60 }
0x165d   :  { %v6111_v59 = vpack.c.bf16 %v4811_v54, %v4810_v44 }
0x165e   :  { %v4804_v0 = vsel %vm569_vm15, %v6832_v62, %v6827_v50  ;;  %v4805_v1 = vsel %vm569_vm15, %v6833_v61, %v6828_v49 }
0x165f   :  { %v6114_v5 = vpack.c.bf16 %v4805_v1, %v4804_v0 }
0x1661   :  { %6083 = vmatmul.mubr.msk.bf16.gmra.mrb[64].mxu1 %vm198_vm9, %v6952_v19 }
0x1662   :  { %4581 = vmatprep.mubr.bf16.mxu1 %v7192_v3 }
0x1669   :  { %6092 = vmatmul.mubr.msk.bf16.vlgmr.msra.gmra.mrb[60].mxu1 %vm198_vm9, %v6953_v25 }
0x166a   :  { %4633 = vmatpush1.bf16.msra.mxu1 %v4614_v31  ;;  %4591 = vmatprep.mubr.bf16.mxu1 %v7192_v3 }
0x166b   :  { %6102 = vmatprep.subr.msk.bf16.mxu1 %vm7352_vm14, %v6101_v32 }
0x1671   :  { %6093 = vmatmul.mubr.msk.bf16.gmra.mrb[64].mxu1 %vm198_vm9, %v6954_v38  ;;  %v4392_v38 = vld [vmem:[%s8714_s2 + $0x180] sm:$0xff] }
0x1672   :  { %4664 = vmatprep.mubr.bf16.mxu1 %v7192_v3 }
0x1679   :  { %6096 = vmatmul.mubr.msk.bf16.vlgmr.msra.gmra.mrb[60].mxu1 %vm198_vm9, %v6955_v57 }
0x167a   :  { %6105 = vmatpush1.bf16.msk.msra.mxu1 %vm7374_vm7, %v6104_v48  ;;  %4674 = vmatprep.mubr.bf16.mxu1 %v7192_v3 }
0x167b   :  { %6112 = vmatprep.subr.msk.bf16.mxu1 %vm7378_vm8, %v6111_v59 }
0x1681   :  { %6097 = vmatmul.mubr.msk.bf16.gmra.mrb[64].mxu1 %vm198_vm9, %v6956_v26 }
0x1682   :  { %4767 = vmatprep.mubr.bf16.mxu1 %v7192_v3 }
0x1689   :  { %6106 = vmatmul.mubr.msk.bf16.vlgmr.msra.gmra.mrb[60].mxu1 %vm198_vm9, %v6957_v4 }
0x168a   :  { %6115 = vmatpush1.bf16.msk.msra.mxu1 %vm7399_vm2, %v6114_v5  ;;  %4777 = vmatprep.mubr.bf16.mxu1 %v7192_v3 }
0x1691   :  { %6107 = vmatmul.mubr.msk.bf16.gmra.mrb[64].mxu1 %vm198_vm9, %v6958_v16 }
0x1692   :  { %4870 = vmatprep.mubr.bf16.mxu1 %v7192_v3 }
0x1699   :  { %6116 = vmatmul.mubr.msk.bf16.vlgmr.msra.gmra.mrb[60].mxu1 %vm198_vm9, %v6959_v21 }
0x169a   :  { %4880 = vmatprep.mubr.bf16.mxu1 %v7192_v3 }
0x16a1   :  { %6117 = vmatmul.mubr.msk.bf16.gmra.mrb[64].mxu1 %vm198_vm9, %v6960_v8 }
0x16a2   :  { %5707 = vmatprep.mubr.bf16.mxu1 %v7192_v3 }
0x176c   :  { %v4872_v20 = vpop.f32.mrb[60].mxu1 }
0x176d   :  { %v4874_v29 = vpop.f32.mrb[61].mxu1  ;;  %v6254_v43 = vadd.f32 %v4872_v20, %v4392_v38 }
0x176e   :  { %v4876_v24 = vpop.f32.mrb[62].mxu1  ;;  %v6255_v49 = vadd.f32 %v4874_v29, %v4393_v40 }
0x176f   :  { %v4878_v23 = vpop.f32.mrb[63].mxu1  ;;  %v6256_v50 = vadd.f32 %v4876_v24, %v4394_v41 }
0x1770   :  { %v6257_v53 = vadd.f32 %v4878_v23, %v4395_v47 }
0x1774   :  { %v4882_v17 = vpop.f32.mrb[64].mxu1 }
0x1775   :  { %v6258_v9 = vadd.f32 %v4882_v17, %v4396_v11  ;;  %v4884_v12 = vpop.f32.mrb[65].mxu1  ;;  %v6962_v17 = vld [vmem:[%s8716_s4 + $0x2e8] sm:$0xff]  }
0x1776   :  { %v6259_v19 = vadd.f32 %v4884_v12, %v4397_v14  ;;  %v4886_v22 = vpop.f32.mrb[66].mxu1  ;;  %v6961_v14 = vld [vmem:[%s8716_s4 + $0x2e0] sm:$0xff]  }
0x1777   :  { %v6118_v34 = vmul.f32 -1.442695, %v6258_v9  ;;  %v6260_v37 = vadd.f32 %v4886_v22, %v4398_v7  ;;  %v4888_v25 = vpop.f32.mrb[67].mxu1  ;;  %v4944_v7 = vpop.permute.xlu1 %4943 }
0x1778   :  { %v6119_v27 = vmul.f32 -1.442695, %v6259_v19  ;;  %v6261_v30 = vadd.f32 %v4888_v25, %v4399_v28  ;;  %v4949_v19 = vpop.permute.xlu0 %4948 }
0x1779   :  { %7119 = vpow2.f32 %v6118_v34  ;;  %v6120_v31 = vmul.f32 -1.442695, %v6260_v37 }
0x177a   :  { %7121 = vpow2.f32 %v6119_v27  ;;  %v6121_v32 = vmul.f32 -1.442695, %v6261_v30 }
0x177b   :  { %7123 = vpow2.f32 %v6120_v31 }
0x177c   :  { %7125 = vpow2.f32 %v6121_v32 }
0x177d   :  { %7127 = vtanh.f32 %v6254_v43 }
0x177e   :  { %7129 = vtanh.f32 %v6255_v49 }
0x177f   :  { %7131 = vtanh.f32 %v6256_v50 }
0x1780   :  { %7133 = vtanh.f32 %v6257_v53 }
0x1783   :  { %v7120_v56 = vpop.eup %7119 }
0x1784   :  { %v7122_v57 = vpop.eup %7121  ;;  %v4915_v54 = vadd.f32 1.0, %v7120_v56  ;;  %v4940_v56 = vld [vmem:[%s8717_s5 + $0x118] sm:$0xff] }
0x1785   :  { %v7124_v44 = vpop.eup %7123  ;;  %v4916_v48 = vadd.f32 1.0, %v7122_v57  ;;  %v5581_v57 = vld [vmem:[%s8717_s5 + $0x120] sm:$0xff] }
0x1786   :  { %v7126_v59 = vpop.eup %7125  ;;  %7135 = vrcp.f32 %v4915_v54  ;;  %v4917_v26 = vadd.f32 1.0, %v7124_v44  ;;  %v5582_v54 = vld [vmem:[%s8717_s5 + $0x128] sm:$0xff]  ;;  %v5656_v44 = vld [vmem:[%s8717_s5 + $0x130] sm:$0xff] }
0x1787   :  { %7137 = vrcp.f32 %v4916_v48  ;;  %v4918_v60 = vadd.f32 1.0, %v7126_v59  ;;  %v7128_v61 = vpop.eup %7127 }
0x1788   :  { %7139 = vrcp.f32 %v4917_v26  ;;  %v7130_v62 = vpop.eup %7129 }
0x1789   :  { %7141 = vrcp.f32 %v4918_v60  ;;  %v7132_v0 = vpop.eup %7131 }
0x178a   :  { %v7134_v1 = vpop.eup %7133 }
0x1790   :  { %v7136_v4 = vpop.eup %7135 }
0x1791   :  { %v7138_v5 = vpop.eup %7137  ;;  %v4927_v16 = vmul.f32 %v7136_v4, %v7128_v61 }
0x1792   :  { %v7140_v21 = vpop.eup %7139  ;;  %v4928_v8 = vmul.f32 %v7138_v5, %v7130_v62 }
0x1793   :  { %v7142_v20 = vpop.eup %7141  ;;  %v4929_v29 = vmul.f32 %v7140_v21, %v7132_v0 }
0x1794   :  { %v4930_v24 = vmul.f32 %v7142_v20, %v7134_v1 }
0x1795   :  { %v4935_v23 = vpack.c.bf16 %v4929_v29, %v4927_v16 }
0x1796   :  { %v4936_v11 = vpack.c.bf16 %v4930_v24, %v4928_v8 }
0x1798   :  { %4977 = vmatprep.subr.bf16.mxu0 %v4936_v11 }
0x1799   :  { %4978 = vmatpush1.bf16.msra.mxu0 %v4935_v23 }
0x179c   :  { %6124 = vmatmul.mubr.msk.bf16.vlgmr.msra.gmra.mrb[44].mxu0 %vm198_vm9, %v6961_v14  ;;  %v6963_v14 = vld [vmem:[%s8716_s4 + $0x290] sm:$0xff]  }
0x179d   :  { %5019 = vmatprep.mubr.bf16.mxu0 %v7192_v3 }
0x17a4   :  { %6125 = vmatmul.mubr.msk.bf16.gmra.mrb[48].mxu0 %vm198_vm9, %v6962_v17 }
0x17a5   :  { %5124 = vmatprep.mubr.bf16.mxu0 %v7192_v3 }
0x186f   :  { %v5011_v9 = vpop.f32.mrb[44].mxu0 }
0x1870   :  { %v5012_v12 = vadd.f32 %v5011_v9, %v4944_v7  ;;  %v5013_v28 = vpop.f32.mrb[45].mxu0 }
0x1871   :  { %v5014_v22 = vadd.f32 %v5013_v28, %v4944_v7  ;;  %v5015_v34 = vpop.f32.mrb[46].mxu0 }
0x1872   :  { %v5030_v37 = vadd.f32 %v5012_v12, %v8377_v39  ;;  %v5016_v25 = vadd.f32 %v5015_v34, %v4949_v19  ;;  %v5017_v27 = vpop.f32.mrb[47].mxu0 }
0x1873   :  { %v5031_v30 = vadd.f32 %v5014_v22, %v8380_v42  ;;  %v5018_v31 = vadd.f32 %v5017_v27, %v4949_v19  ;;  %v6966_v27 = vld [vmem:[%s8716_s4 + $0x2a8] sm:$0xff]  }
0x1874   :  { %v8533_v32 = vmul.f32 %v5030_v37, %v7256_v15  ;;  %v5032_v38 = vadd.f32 %v5016_v25, %v8383_v46 }
0x1875   :  { %v5035_v40 = vmul.f32 %v5031_v30, %v7258_v18  ;;  %v5033_v41 = vadd.f32 %v5018_v31, %v8386_v35  ;;  %v4939_v35 = vld [vmem:[%s8717_s5 + $0x110] sm:$0xff] }
0x1876   :  { %v8539_v43 = vmul.f32 %v5032_v38, %v7256_v15 }
0x1877   :  { %v5037_v47 = vmul.f32 %v5033_v41, %v7258_v18  ;;  %v6834_v39 = vpack.i.bf16 %v5035_v40, %v8533_v32 }
0x1878   :  { %v6859_v42 = vpack.i.bf16 %v8539_v43, %v8533_v32  ;;  %v5260_v49 = vpack.c.bf16 %v8539_v43, %v8533_v32 }
0x1879   :  { %6835 = vrot.lane.b32.xlu1 %v6834_v39, %s7194_s7  ;;  %v6839_v46 = vpack.i.bf16 %v5037_v47, %v8539_v43  ;;  %v6854_v50 = vpack.i.bf16 %v5037_v47, %v5035_v40  ;;  %v5261_v53 = vpack.c.bf16 %v5037_v47, %v5035_v40 }
0x187b   :  { %6840 = vrot.lane.b32.xlu0 %v6839_v46, %s7194_s7 }
0x187d   :  { %6845 = vrot.lane.b32.xlu1 %v6834_v39, %s7193_s1 }
0x187f   :  { %6850 = vrot.lane.b32.xlu0 %v6839_v46, %s7193_s1 }
0x1881   :  { %6855 = vrot.lane.b32.xlu1 %v6854_v50, %s7195_s8 }
0x1883   :  { %6860 = vrot.lane.b32.xlu0 %v6859_v42, %s7195_s8 }
0x1885   :  { %6865 = vrot.lane.b32.xlu1 %v6854_v50, %s7196_s9  ;;  %v6968_v50 = vld [vmem:[%s8716_s4 + $0x2b8] sm:$0xff]  }
0x1887   :  { %6870 = vrot.lane.b32.xlu0 %v6859_v42, %s7196_s9 }
0x1889   :  { %4953 = vperm.xlu1 %6593, %v4939_v35  }
0x188b   :  { %4958 = vperm.xlu0 %6552, %v4940_v56  }
0x188d   :  { %5585 = vperm.xlu1 %6593, %v5581_v57  }
0x188f   :  { %5590 = vperm.xlu0 %6552, %v5582_v54  }
0x1891   :  { %5660 = vperm.xlu1 %6593, %v5656_v44   ;;  %v6970_v44 = vld [vmem:[%s8716_s4 + $0x2c8] sm:$0xff]  }
0x18eb   :  { %v6836_v48 = vpop.permute.xlu1 %6835 }
0x18ec   :  { %v6838_v59 = vunpack.i.h.bf16 %v6836_v48  ;;  %v6837_v26 = vunpack.i.l.bf16 %v6836_v48  ;;  %v6971_v48 = vld [vmem:[%s8716_s4 + $0x2d0] sm:$0xff]  }
0x18ed   :  { %v6841_v60 = vpop.permute.xlu0 %6840 }
0x18ee   :  { %v6843_v61 = vunpack.i.h.bf16 %v6841_v60  ;;  %v6842_v62 = vunpack.i.l.bf16 %v6841_v60  ;;  %v5058_v0 = vsel %vm79_vm1, %v6837_v26, %v6838_v59  ;;  %v5064_v1 = vsel %vm79_vm1, 0.0, %v6837_v26 }
0x18ef   :  { %v6846_v4 = vpop.permute.xlu1 %6845 }
0x18f0   :  { %v5059_v5 = vsel %vm79_vm1, %v6842_v62, %v6843_v61  ;;  %v5065_v16 = vsel %vm79_vm1, 0.0, %v6842_v62  ;;  %v6848_v21 = vunpack.i.h.bf16 %v6846_v4  ;;  %v6847_v8 = vunpack.i.l.bf16 %v6846_v4  ;;  %v5042_v62 = vld [vmem:[%s8714_s2 + $0x1e0] sm:$0xff]  ;;  %v5044_v4 = vld [vmem:[%s8714_s2 + $0x1f0] sm:$0xff] }
0x18f1   :  { %v6129_v20 = vpack.c.bf16 %v5059_v5, %v5058_v0  ;;  %v6132_v29 = vpack.c.bf16 %v5065_v16, %v5064_v1  ;;  %v6851_v24 = vpop.permute.xlu0 %6850  ;;  %v5043_v0 = vld [vmem:[%s8714_s2 + $0x1e8] sm:$0xff] }
0x18f2   :  { %v6853_v23 = vunpack.i.h.bf16 %v6851_v24  ;;  %v6852_v11 = vunpack.i.l.bf16 %v6851_v24  ;;  %v5161_v17 = vsel %vm274_vm5, %v6847_v8, %v6848_v21  ;;  %v5167_v7 = vsel %vm274_vm5, 0.0, %v6847_v8 }
0x18f3   :  { %6130 = vmatprep.subr.msk.bf16.mxu0 %vm7302_vm4, %v6129_v20  ;;  %v6856_v22 = vpop.permute.xlu1 %6855 }
0x18f4   :  { %v5162_v9 = vsel %vm274_vm5, %v6852_v11, %v6853_v23  ;;  %v5168_v12 = vsel %vm274_vm5, 0.0, %v6852_v11  ;;  %6133 = vmatpush1.bf16.msk.msra.mxu0 %vm7306_vm6, %v6132_v29  ;;  %v6858_v55 = vunpack.i.h.bf16 %v6856_v22  ;;  %v6857_v34 = vunpack.i.l.bf16 %v6856_v22 }
0x18f5   :  { %v6139_v28 = vpack.c.bf16 %v5162_v9, %v5161_v17  ;;  %v6142_v19 = vpack.c.bf16 %v5168_v12, %v5167_v7  ;;  %v6861_v30 = vpop.permute.xlu0 %6860  ;;  %v5038_v7 = vld [vmem:[%s8714_s2 + $0x1c0] sm:$0xff]  ;;  %v5039_v9 = vld [vmem:[%s8714_s2 + $0x1c8] sm:$0xff]  ;;  %v5040_v12 = vld [vmem:[%s8714_s2 + $0x1d0] sm:$0xff] }
0x18f6   :  { %v5354_v2 = vsel %vm463_vm12, %v6858_v55, 0.0  ;;  %v5353_v37 = vsel %vm463_vm12, %v6857_v34, 0.0  ;;  %v6863_v38 = vunpack.i.h.bf16 %v6861_v30  ;;  %v6862_v40 = vunpack.i.l.bf16 %v6861_v30 }
0x18f7   :  { %6134 = vmatmul.mubr.msk.bf16.vlgmr.msra.gmra.mrb[52].mxu0 %vm198_vm9, %v6963_v14  ;;  %6140 = vmatprep.subr.msk.bf16.mxu0 %vm7323_vm10, %v6139_v28  ;;  %v6153_v25 = vpack.c.bf16 %v5354_v2, %v5353_v37  ;;  %v6866_v31 = vpop.permute.xlu1 %6865 }
0x18f8   :  { %6143 = vmatpush1.bf16.msk.msra.mxu0 %vm7327_vm11, %v6142_v19  ;;  %5134 = vmatprep.mubr.bf16.mxu0 %v7192_v3  ;;  %v6868_v41 = vunpack.i.h.bf16 %v6866_v31  ;;  %v6867_v47 = vunpack.i.l.bf16 %v6866_v31  ;;  %v5347_v32 = vsel %vm463_vm12, %v6862_v40, %v6857_v34  ;;  %v5348_v43 = vsel %vm463_vm12, %v6863_v38, %v6858_v55  ;;  %v5041_v19 = vld [vmem:[%s8714_s2 + $0x1d8] sm:$0xff] }
0x18f9   :  { %5278 = vmatprep.subr.bf16.mxu0 %v5261_v53  ;;  %v6871_v53 = vpop.permute.xlu0 %6870 }
0x18fa   :  { %v5457_v39 = vsel %vm569_vm15, %v6868_v41, 0.0  ;;  %v5456_v42 = vsel %vm569_vm15, %v6867_v47, 0.0  ;;  %v6873_v35 = vunpack.i.h.bf16 %v6871_v53  ;;  %v6872_v56 = vunpack.i.l.bf16 %v6871_v53 }
0x18fb   :  { %v6163_v46 = vpack.c.bf16 %v5457_v39, %v5456_v42 }
0x18fc   :  { %v5450_v57 = vsel %vm569_vm15, %v6872_v56, %v6867_v47  ;;  %v5451_v33 = vsel %vm569_vm15, %v6873_v35, %v6868_v41  ;;  %v6973_v56 = vld [vmem:[%s8716_s4 + $0x2f0] sm:$0xff]  }
0x18fd   :  { %v6166_v54 = vpack.c.bf16 %v5451_v33, %v5450_v57 }
0x18ff   :  { %6135 = vmatmul.mubr.msk.bf16.gmra.mrb[56].mxu0 %vm198_vm9, %v6964_v51 }
0x1900   :  { %5227 = vmatprep.mubr.bf16.mxu0 %v7192_v3 }
0x1907   :  { %6144 = vmatmul.mubr.msk.bf16.vlgmr.msra.gmra.mrb[52].mxu0 %vm198_vm9, %v6965_v63 }
0x1908   :  { %5279 = vmatpush1.bf16.msra.mxu0 %v5260_v49  ;;  %5237 = vmatprep.mubr.bf16.mxu0 %v7192_v3  ;;  %v6156_v49 = vpack.c.bf16 %v5348_v43, %v5347_v32  ;;  %v4954_v57 = vpop.permute.xlu1 %4953 }
0x1909   :  { %6154 = vmatprep.subr.msk.bf16.mxu0 %vm7352_vm14, %v6153_v25 }
0x190a   :  { %v4959_v33 = vpop.permute.xlu0 %4958 }
0x190f   :  { %6145 = vmatmul.mubr.msk.bf16.gmra.mrb[56].mxu0 %vm198_vm9, %v6966_v27 }
0x1910   :  { %5310 = vmatprep.mubr.bf16.mxu0 %v7192_v3 }
0x1917   :  { %6148 = vmatmul.mubr.msk.bf16.vlgmr.msra.gmra.mrb[52].mxu0 %vm198_vm9, %v6967_v13 }
0x1918   :  { %6157 = vmatpush1.bf16.msk.msra.mxu0 %vm7374_vm7, %v6156_v49  ;;  %5320 = vmatprep.mubr.bf16.mxu0 %v7192_v3 }
0x1919   :  { %6164 = vmatprep.subr.msk.bf16.mxu0 %vm7378_vm8, %v6163_v46 }
0x191f   :  { %6149 = vmatmul.mubr.msk.bf16.gmra.mrb[56].mxu0 %vm198_vm9, %v6968_v50 }
0x1920   :  { %5413 = vmatprep.mubr.bf16.mxu0 %v7192_v3 }
0x1927   :  { %6158 = vmatmul.mubr.msk.bf16.vlgmr.msra.gmra.mrb[52].mxu0 %vm198_vm9, %v6969_v36  ;;  %v5586_v36 = vpop.permute.xlu1 %5585 }
0x1928   :  { %6167 = vmatpush1.bf16.msk.msra.mxu0 %vm7399_vm2, %v6166_v54  ;;  %5423 = vmatprep.mubr.bf16.mxu0 %v7192_v3  ;;  %v5591_v54 = vpop.permute.xlu0 %5590 }
0x192f   :  { %6159 = vmatmul.mubr.msk.bf16.gmra.mrb[56].mxu0 %vm198_vm9, %v6970_v44  ;;  %v6262_v44 = vadd.f32 %v5586_v36, %v4954_v57 }
0x1930   :  { %5516 = vmatprep.mubr.bf16.mxu0 %v7192_v3 }
0x1937   :  { %6168 = vmatmul.mubr.msk.bf16.vlgmr.msra.gmra.mrb[52].mxu0 %vm198_vm9, %v6971_v48 }
0x1938   :  { %5526 = vmatprep.mubr.bf16.mxu0 %v7192_v3 }
0x193f   :  { %6169 = vmatmul.mubr.msk.bf16.gmra.mrb[56].mxu0 %vm198_vm9, %v6972_v45  ;;  %v6266_v45 = vadd.f32 %v5591_v54, %v4959_v33 }
0x1940   :  { %5633 = vmatprep.mubr.bf16.mxu0 %v7192_v3  ;;  %v5045_v3 = vld [vmem:[%s8714_s2 + $0x1f8] sm:$0xff] }
0x1a0a   :  { %v5518_v59 = vpop.f32.mrb[52].mxu0 }
0x1a0b   :  { %v5520_v26 = vpop.f32.mrb[53].mxu0  ;;  %v6270_v28 = vadd.f32 %v5518_v59, %v5038_v7 }
0x1a0c   :  { %v5522_v60 = vpop.f32.mrb[54].mxu0  ;;  %v6271_v51 = vadd.f32 %v5520_v26, %v5039_v9  ;;  %v5718_v9 = vmul.f32 %v8011_v52, %v7256_v15 }
0x1a0d   :  { %v5524_v61 = vpop.f32.mrb[55].mxu0  ;;  %v6272_v22 = vadd.f32 %v5522_v60, %v5040_v12 }
0x1a0e   :  { %v6273_v55 = vadd.f32 %v5524_v61, %v5041_v19  ;;  %v5719_v19 = vmul.f32 %v8013_v58, %v7258_v18 }
0x1a12   :  { %v5528_v1 = vpop.f32.mrb[56].mxu0 }
0x1a13   :  { %v6274_v5 = vadd.f32 %v5528_v1, %v5042_v62  ;;  %v5530_v16 = vpop.f32.mrb[57].mxu0 }
0x1a14   :  { %v6275_v21 = vadd.f32 %v5530_v16, %v5043_v0  ;;  %v5532_v8 = vpop.f32.mrb[58].mxu0 }
0x1a15   :  { %v6170_v20 = vmul.f32 -1.442695, %v6274_v5  ;;  %v6276_v29 = vadd.f32 %v5532_v8, %v5044_v4  ;;  %v5534_v24 = vpop.f32.mrb[59].mxu0 }
0x1a16   :  { %v6171_v23 = vmul.f32 -1.442695, %v6275_v21  ;;  %v6277_v11 = vadd.f32 %v5534_v24, %v5045_v3 }
0x1a17   :  { %7143 = vpow2.f32 %v6170_v20  ;;  %v6172_v14 = vmul.f32 -1.442695, %v6276_v29  ;;  %v6974_v20 = vld [vmem:[%s8716_s4 + $0x2f8] sm:$0xff]   ;;  %v5661_v29 = vpop.permute.xlu1 %5660  ;;  %s7197_s4 = smov [#allocation2]  }
0x1a18   :  { %7145 = vpow2.f32 %v6171_v23  ;;  %v6173_v17 = vmul.f32 -1.442695, %v6277_v11  ;;  %s5742_s27 = sshll.u32 %s7197_s4, 4  ;;  %s5743_s27 = int_to_ptr.vmem [resolvable:$true] %s5742_s27 }
0x1a19   :  { %7147 = vpow2.f32 %v6172_v14  ;;  %s7168_s28 = scalar_lea.vmem %s5743_s27, 128  ;;  %p7173_p1 = scmp.lt.s32.totalorder %s5743_s27, %s5743_s27 }
0x1a1a   :  { %7149 = vpow2.f32 %v6173_v17  ;;  %p7169_p0 = scmp.ne.s32.totalorder %s5743_s27, %s7168_s28  ;;  %p7174_p2 = scmp.lt.s32.totalorder %s7168_s28, %s7168_s28 }
0x1a1b   :  { %7151 = vtanh.f32 %v6270_v28 }
0x1a1c   :  { %7153 = vtanh.f32 %v6271_v51  ;;  %v5724_v51 = vrot.slane %v8361_v6, 6  ;;  %p7175_p3 = por %p7174_p2, %p7173_p1 }
0x1a1d   :  { %7155 = vtanh.f32 %v6272_v22 }
0x1a1e   :  { %7157 = vtanh.f32 %v6273_v55  ;;  %v5725_v55 = vrot.slane %v8363_v10, 6  ;;  %p7176_p4 = pnand %p7175_p3, %p7169_p0 }
0x1a21   :  { %v7144_v34 = vpop.eup %7143 }
0x1a22   :  { %v7146_v63 = vpop.eup %7145  ;;  %v5561_v2 = vadd.f32 1.0, %v7144_v34 }
0x1a23   :  { %v7148_v37 = vpop.eup %7147  ;;  %v5562_v25 = vadd.f32 1.0, %v7146_v63 }
0x1a24   :  { %v7150_v27 = vpop.eup %7149  ;;  %7159 = vrcp.f32 %v5561_v2  ;;  %v5563_v30 = vadd.f32 1.0, %v7148_v37 }
0x1a25   :  { %7161 = vrcp.f32 %v5562_v25  ;;  %v5564_v31 = vadd.f32 1.0, %v7150_v27  ;;  %v7152_v38 = vpop.eup %7151 }
0x1a26   :  { %7163 = vrcp.f32 %v5563_v30  ;;  %v7154_v40 = vpop.eup %7153 }
0x1a27   :  { %7165 = vrcp.f32 %v5564_v31  ;;  %v7156_v41 = vpop.eup %7155 }
0x1a28   :  { %v7158_v47 = vpop.eup %7157 }
0x1a2e   :  { %v7160_v32 = vpop.eup %7159 }
0x1a2f   :  { %v7162_v43 = vpop.eup %7161  ;;  %v5573_v13 = vmul.f32 %v7160_v32, %v7152_v38 }
0x1a30   :  { %v7164_v39 = vpop.eup %7163  ;;  %v5574_v42 = vmul.f32 %v7162_v43, %v7154_v40 }
0x1a31   :  { %v7166_v49 = vpop.eup %7165  ;;  %v5575_v46 = vmul.f32 %v7164_v39, %v7156_v41 }
0x1a32   :  { %v5576_v50 = vmul.f32 %v7166_v49, %v7158_v47 }
0x1a33   :  { %v5579_v53 = vpack.c.bf16 %v5575_v46, %v5573_v13 }
0x1a34   :  { %v5580_v35 = vpack.c.bf16 %v5576_v50, %v5574_v42 }
0x1a36   :  { %5601 = vmatprep.subr.bf16.mxu0 %v5580_v35 }
0x1a37   :  { %5602 = vmatpush1.bf16.msra.mxu0 %v5579_v53 }
0x1a3a   :  { %6175 = vmatmul.mubr.msk.bf16.vlgmr.msra.gmra.mrb[48].mxu0 %vm198_vm9, %v6973_v56 }
0x1b0d   :  { %v5635_v48 = vpop.f32.mrb[48].mxu0 }
0x1b0e   :  { %v6263_v59 = vadd.f32 %v6262_v44, %v5635_v48  ;;  %v5637_v26 = vpop.f32.mrb[49].mxu0 }
0x1b0f   :  { %v6265_v60 = vadd.f32 %v6262_v44, %v5637_v26  ;;  %v5639_v61 = vpop.f32.mrb[50].mxu0 }
0x1b10   :  { %v6267_v62 = vadd.f32 %v6266_v45, %v5639_v61  ;;  %v5641_v0 = vpop.f32.mrb[51].mxu0  ;;  %v5648_v4 = vmul.f32 %v6263_v59, %v7256_v15 }
0x1b11   :  { %v6269_v1 = vadd.f32 %v6266_v45, %v5641_v0  ;;  %v5649_v16 = vmul.f32 %v6265_v60, %v7258_v18 }
0x1b12   :  { %v5650_v5 = vmul.f32 %v6267_v62, %v7256_v15 }
0x1b13   :  { %v5651_v3 = vmul.f32 %v6269_v1, %v7258_v18 }
0x1b14   :  { %v5654_v21 = vpack.c.bf16 %v5650_v5, %v5648_v4 }
0x1b15   :  { %v5655_v8 = vpack.c.bf16 %v5651_v3, %v5649_v16 }
0x1b17   :  { %5675 = vmatprep.subr.bf16.mxu1 %v5655_v8 }
0x1b18   :  { %5676 = vmatpush1.bf16.msra.mxu1 %v5654_v21 }
0x1b1b   :  { %6177 = vmatmul.mubr.msk.bf16.vlgmr.msra.gmra.mrb[68].mxu1 %vm198_vm9, %v6974_v20 }
0x1bee   :  { %v5709_v24 = vpop.f32.mrb[68].mxu1 }
0x1bef   :  { %v5710_v23 = vadd.f32 %v5709_v24, %v5661_v29  ;;  %v5711_v11 = vpop.f32.mrb[69].mxu1 }
0x1bf0   :  { %v5712_v14 = vadd.f32 %v5711_v11, %v5661_v29  ;;  %v5713_v17 = vpop.f32.mrb[70].mxu1 }
0x1bf1   :  { %v5716_v7 = vmul.f32 %v5710_v23, %v7256_v15  ;;  %v5714_v12 = vpop.f32.mrb[71].mxu1 }
0x1bf2   :  { %v5717_v28 = vmul.f32 %v5712_v14, %v7258_v18 }
0x1bf3   :  { %v5720_v22 = vadd.f32 %v5718_v9, %v5716_v7 }
0x1bf4   :  { %v5721_v34 = vadd.f32 %v5719_v19, %v5717_v28 }
0x1bf5   :  { %v5729_v63 = vsel %vm5728_vm0, %v5720_v22, %v5724_v51 }
0x1bf6   :  { %v5730_v2 = vsel %vm5728_vm0, %v5721_v34, %v5725_v55 }
0x1bf7   :  { %v5733_v37 = vcombine.low %v5729_v63, %v5730_v2 }
0x1bf9   :  { %5735 = vst [vmem:[#allocation2] sm:$0xff] %v5733_v37 }
0x1bfa   :  { %7179 = shalt.err (!%p7176_p4)
}
0x1bfb   :  { %s7180_s10 = scalar_lea.hbm %s8718_s6, 128 }
0x1bfc   :  { %p7181_p5 = scmp.ne.s32.totalorder %s8718_s6, %s7180_s10  ;;  %p7184_p6 = scmp.lt.u32.totalorder %s7180_s10, %s8718_s6 }
0x1bfe   :  { %p7186_p7 = pnand %p7184_p6, %p7181_p5 }
0x1c00   :  { %7189 = shalt.err (!%p7186_p7)
}
0x1c01   :  { %5745 = dma.vmem_to_hbm [thread:$0]  %s5743_s27, 128, %s8718_s6, [#allocation3]  }
0x1c02   :  { %7190 = dma.done.wait [#allocation3], 128  }
0x1c03   :  { %7191 = vsyncadd [#allocation3], 4294967168 }
0x1c04   :  { %5749 = vsyncpa [#allocation3], 1 }

</bundles_post_ra>
